<compile_context>
chip_gen: v7x
topology: tpu7x:2x2x1
jax: 0.10.0
libtpu: 0.0.40
codegen_flags: <defaults>
</compile_context>

<pallas_src>
import functools
import math

import jax
import jax.numpy as jnp
from jax.experimental import pallas as pl
from jax.experimental.pallas import tpu as pltpu

VMEM = pltpu.MemorySpace.VMEM
MXU_DTYPE = jnp.bfloat16     # matmul operand dtype; accumulation stays f32
NEG_INF = -1e9
LN_EPS = 1e-5


def _vm_specs(n):
    return [pl.BlockSpec(memory_space=VMEM) for _ in range(n)]


# --------------------------- in-kernel building blocks ---------------------------

def _mm(a, b):
    """(M, K) @ (K, N): bf16 operands into the MXU, f32 accumulation."""
    return jax.lax.dot_general(a.astype(MXU_DTYPE), b.astype(MXU_DTYPE),
                               (((1,), (0,)), ((), ())),
                               preferred_element_type=jnp.float32)


def _mm_nt(a, b):
    """(M, K) @ (N, K)^T (flash-attention style Q K^T, no explicit transpose)."""
    return jax.lax.dot_general(a.astype(MXU_DTYPE), b.astype(MXU_DTYPE),
                               (((1,), (1,)), ((), ())),
                               preferred_element_type=jnp.float32)


def _layernorm(x, g, b):
    """Residual-fused LayerNorm; single-pass sum + sum-of-squares, all f32."""
    d = x.shape[-1]
    s1 = jnp.sum(x, axis=-1, keepdims=True)
    s2 = jnp.sum(x * x, axis=-1, keepdims=True)
    mu = s1 * (1.0 / d)
    var = s2 * (1.0 / d) - mu * mu
    return (x - mu) * jax.lax.rsqrt(var + LN_EPS) * g + b


def _mha(x, kv, wq, bq, wk, bk, wv, bv, wo, bo, bias, num_heads):
    """Multi-head attention on flattened (batch*seq, D) rows.

    wq/wk/wv are refs of shape (H, D, Dh); wo is (H, Dh, D); bq/bk/bv are (H, 1, Dh);
    bo is (1, D).  `bias` is the (Mq, Mk) additive mask (block-diagonal batch mask +
    optional key-padding) already built in-kernel, shared across heads.
    """
    d = x.shape[-1]
    dh = d // num_heads
    scale = 1.0 / math.sqrt(dh)
    out = None
    for h in range(num_heads):                       # static unroll, H small
        qh = _mm(x, wq[h]) + bq[h]
        kh = _mm(kv, wk[h]) + bk[h]
        vh = _mm(kv, wv[h]) + bv[h]
        s = _mm_nt(qh, kh) * scale + bias            # f32 scores
        mx = jnp.max(s, axis=-1, keepdims=True)
        p = jnp.exp(s - mx)
        denom = jnp.sum(p, axis=-1, keepdims=True)
        p = p * pl.reciprocal(denom, approx=True)    # EUP slot, frees VALU
        oh = _mm(p, vh)
        contrib = _mm(oh, wo[h])                     # concat-heads folded into out-proj
        out = contrib if out is None else out + contrib
    return out + bo[...]


def _ffn(x, w1, b1, w2, b2):
    h = jnp.maximum(_mm(x, w1[...]) + b1[...], 0.0)
    return _mm(h, w2[...]) + b2[...]


# ----------------------------------- kernels -----------------------------------

def _patch_embed_kernel(x_ref, w_ref, b_ref, pos_ref, o_ref, *, batch):
    y = _mm(x_ref[...], w_ref[...]) + b_ref[...]
    pos = pos_ref[...]                               # (Np, D)
    if batch > 1:
        pos = jnp.concatenate([pos] * batch, axis=0)  # tile over batch in VMEM
    o_ref[...] = y + pos


def _encoder_layer_kernel(x_ref, rowb_ref, colb_ref,
                          wq, bq, wk, bk, wv, bv, wo, bo,
                          ln1g, ln1b, w1, b1, w2, b2, ln2g, ln2b,
                          o_ref, *, num_heads):
    x = x_ref[...]
    # block-diagonal batch mask built in-kernel from tiny batch-id vectors
    bias = jnp.where(rowb_ref[...] == colb_ref[...], 0.0, NEG_INF).astype(jnp.float32)
    a = _mha(x, x, wq, bq, wk, bk, wv, bv, wo, bo, bias, num_heads)
    x = _layernorm(x + a, ln1g[...], ln1b[...])
    f = _ffn(x, w1, b1, w2, b2)
    o_ref[...] = _layernorm(x + f, ln2g[...], ln2b[...])


def _decoder_layer_kernel(x_ref, enc_ref, keep_ref, rowbt_ref, colbt_ref, colbe_ref,
                          swq, sbq, swk, sbk, swv, sbv, swo, sbo, ln1g, ln1b,
                          cwq, cbq, cwk, cbk, cwv, cbv, cwo, cbo, ln2g, ln2b,
                          w1, b1, w2, b2, ln3g, ln3b,
                          o_ref, *, num_heads):
    x = x_ref[...]
    enc = enc_ref[...]
    # self-attention: block-diagonal batch mask AND key-padding mask (built in-kernel)
    same = rowbt_ref[...] == colbt_ref[...]
    keep = keep_ref[...] > 0.5
    self_bias = jnp.where(jnp.logical_and(same, keep), 0.0, NEG_INF).astype(jnp.float32)
    a = _mha(x, x, swq, sbq, swk, sbk, swv, sbv, swo, sbo, self_bias, num_heads)
    x = _layernorm(x + a, ln1g[...], ln1b[...])
    # cross-attention: encoder_mask is None in forward() -> batch mask only
    cross_bias = jnp.where(rowbt_ref[...] == colbe_ref[...], 0.0, NEG_INF).astype(jnp.float32)
    c = _mha(x, enc, cwq, cbq, cwk, cbk, cwv, cbv, cwo, cbo, cross_bias, num_heads)
    x = _layernorm(x + c, ln2g[...], ln2b[...])
    f = _ffn(x, w1, b1, w2, b2)
    o_ref[...] = _layernorm(x + f, ln3g[...], ln3b[...])


def _vocab_proj_kernel(x_ref, w_ref, b_ref, o_ref):
    o_ref[...] = _mm(x_ref[...], w_ref[...]) + b_ref[...]


# --------------------------------- call wrappers ---------------------------------

def patch_embed(p, patches, batch):
    m = patches.shape[0]
    d = p["w_proj"].shape[1]
    return pl.pallas_call(
        functools.partial(_patch_embed_kernel, batch=batch),
        out_shape=jax.ShapeDtypeStruct((m, d), jnp.float32),
        in_specs=_vm_specs(4),
        out_specs=pl.BlockSpec(memory_space=VMEM),
    )(patches, p["w_proj"], p["b_proj"], p["pos_emb"])


def encoder_layer(p, x, rowb, colb, num_heads):
    m = p["mha"]
    return pl.pallas_call(
        functools.partial(_encoder_layer_kernel, num_heads=num_heads),
        out_shape=jax.ShapeDtypeStruct(x.shape, jnp.float32),
        in_specs=_vm_specs(19),
        out_specs=pl.BlockSpec(memory_space=VMEM),
    )(x, rowb, colb,
      m["wq"], m["bq"], m["wk"], m["bk"], m["wv"], m["bv"], m["wo"], m["bo"],
      p["ln1_g"], p["ln1_b"], p["w1"], p["b1"], p["w2"], p["b2"],
      p["ln2_g"], p["ln2_b"])


def decoder_layer(p, x, enc, keep, rowb_t, colb_t, colb_e, num_heads):
    s, c = p["self_mha"], p["cross_mha"]
    return pl.pallas_call(
        functools.partial(_decoder_layer_kernel, num_heads=num_heads),
        out_shape=jax.ShapeDtypeStruct(x.shape, jnp.float32),
        in_specs=_vm_specs(32),
        out_specs=pl.BlockSpec(memory_space=VMEM),
    )(x, enc, keep, rowb_t, colb_t, colb_e,
      s["wq"], s["bq"], s["wk"], s["bk"], s["wv"], s["bv"], s["wo"], s["bo"],
      p["ln1_g"], p["ln1_b"],
      c["wq"], c["bq"], c["wk"], c["bk"], c["wv"], c["bv"], c["wo"], c["bo"],
      p["ln2_g"], p["ln2_b"],
      p["w1"], p["b1"], p["w2"], p["b2"], p["ln3_g"], p["ln3_b"])


def vocab_projection(x, w, b, tile_n=128):
    """Vocab logits, tiled lane-dense over N so large vocabs never sit whole in VMEM.
    Grid axis marked 'parallel' so v7x can shard it across its two TensorCores."""
    m, d = x.shape
    v = w.shape[1]
    if v % tile_n != 0:
        tile_n = v                      # small / ragged vocab: single whole-V tile
    # TODO(synk): for realistic D (>~1k) add a K grid axis with a pl.when-gated accumulator.
    return pl.pallas_call(
        _vocab_proj_kernel,
        out_shape=jax.ShapeDtypeStruct((m, v), jnp.float32),
        grid=(v // tile_n,),
        in_specs=[pl.BlockSpec((m, d), lambda j: (0, 0)),
                  pl.BlockSpec((d, tile_n), lambda j: (0, j)),
                  pl.BlockSpec((1, tile_n), lambda j: (0, j))],
        out_specs=pl.BlockSpec((m, tile_n), lambda j: (0, j)),
        compiler_params=pltpu.CompilerParams(dimension_semantics=("parallel",)),
    )(x, w, b)


# ----------------------------------- forward -----------------------------------

def image_caption_forward(params, images, token_ids, *, num_heads, patch_size, pad_id):
    b, c, h, w = images.shape
    p_sz = patch_size
    hp, wp = h // p_sz, w // p_sz
    n_patch = hp * wp
    d = params["patch"]["w_proj"].shape[1]

    # Pure layout glue (no compute): NCHW -> (B*Np, C*P*P), flatten order (c, kh, kw)
    patches = images.reshape(b, c, hp, p_sz, wp, p_sz)
    patches = patches.transpose(0, 2, 4, 1, 3, 5).reshape(b * n_patch, c * p_sz * p_sz)

    feats = patch_embed(params["patch"], patches, b)          # proj + pos-emb in one kernel

    # Tiny per-row / per-column batch-id vectors drive the in-kernel block-diagonal mask.
    rowb_p = jnp.repeat(jnp.arange(b, dtype=jnp.float32), n_patch).reshape(b * n_patch, 1)
    colb_p = rowb_p.reshape(1, b * n_patch)

    x = feats
    for lp in params["encoder"]:
        x = encoder_layer(lp, x, rowb_p, colb_p, num_heads)

    seq = token_ids.shape[1]
    keep = (token_ids != pad_id).astype(jnp.float32).reshape(1, b * seq)   # key-padding mask
    # TODO(synk): embedding lookup is a data-dependent gather; kept as jnp.take glue
    # (could be folded into the decoder kernel via PrefetchScalarGridSpec + Element specs).
    emb = jnp.take(params["tok_emb"], token_ids, axis=0).reshape(b * seq, d)

    rowb_t = jnp.repeat(jnp.arange(b, dtype=jnp.float32), seq).reshape(b * seq, 1)
    colb_t = rowb_t.reshape(1, b * seq)

    dec = decoder_layer(params["decoder"], emb, x, keep, rowb_t, colb_t, colb_p, num_heads)
    logits = vocab_projection(dec, params["decoder"]["w_vocab"], params["decoder"]["b_vocab"])
    return logits.reshape(b, seq, -1)


# ------------------------------- parameter init -------------------------------

def _dense_init(key, din, dout):
    w = jax.random.normal(key, (din, dout), jnp.float32) * 0.02
    return w, jnp.zeros((1, dout), jnp.float32)


def _init_mha(key, d, num_heads):
    dh = d // num_heads
    ks = jax.random.split(key, 4)
    wq, bq = _dense_init(ks[0], d, d)
    wk, bk = _dense_init(ks[1], d, d)
    wv, bv = _dense_init(ks[2], d, d)
    wo, bo = _dense_init(ks[3], d, d)
    # pre-split per head so kernels just index wq[h] (no in-kernel lane slicing)
    split_in = lambda m: m.reshape(d, num_heads, dh).transpose(1, 0, 2)   # (H, D, Dh)
    split_b = lambda v: v.reshape(num_heads, 1, dh)                       # (H, 1, Dh)
    return dict(wq=split_in(wq), bq=split_b(bq),
                wk=split_in(wk), bk=split_b(bk),
                wv=split_in(wv), bv=split_b(bv),
                wo=wo.reshape(num_heads, dh, d),                          # (H, Dh, D)
                bo=bo)                                                    # (1, D)


def _init_encoder_layer(key, d, ffn, num_heads):
    k1, k2, k3 = jax.random.split(key, 3)
    w1, b1 = _dense_init(k2, d, ffn)
    w2, b2 = _dense_init(k3, ffn, d)
    ones, zeros = jnp.ones((1, d), jnp.float32), jnp.zeros((1, d), jnp.float32)
    return dict(mha=_init_mha(k1, d, num_heads),
                ln1_g=ones, ln1_b=zeros, ln2_g=ones, ln2_b=zeros,
                w1=w1, b1=b1, w2=w2, b2=b2)


def _init_decoder(key, d, ffn, vocab_size, num_heads):
    k1, k2, k3, k4, k5 = jax.random.split(key, 5)
    w1, b1 = _dense_init(k3, d, ffn)
    w2, b2 = _dense_init(k4, ffn, d)
    wv, bv = _dense_init(k5, d, vocab_size)
    ones, zeros = jnp.ones((1, d), jnp.float32), jnp.zeros((1, d), jnp.float32)
    return dict(self_mha=_init_mha(k1, d, num_heads),
                cross_mha=_init_mha(k2, d, num_heads),
                ln1_g=ones, ln1_b=zeros, ln2_g=ones, ln2_b=zeros,
                ln3_g=ones, ln3_b=zeros,
                w1=w1, b1=b1, w2=w2, b2=b2,
                w_vocab=wv, b_vocab=bv)


def init_params(key, *, img_size, patch_size, in_ch, embed_dim, ffn_dim,
                vocab_size, num_heads):
    num_patches = (img_size // patch_size) ** 2
    k_patch, k_pos, k_e1, k_e2, k_emb, k_dec = jax.random.split(key, 6)
    w_proj, b_proj = _dense_init(k_patch, in_ch * patch_size * patch_size, embed_dim)
    return dict(
        patch=dict(w_proj=w_proj, b_proj=b_proj,
                   pos_emb=jax.random.normal(k_pos, (num_patches, embed_dim),
                                             jnp.float32) * 0.02),
        encoder=[_init_encoder_layer(k_e1, embed_dim, ffn_dim, num_heads),
                 _init_encoder_layer(k_e2, embed_dim, ffn_dim, num_heads)],
        tok_emb=jax.random.normal(k_emb, (vocab_size, embed_dim), jnp.float32) * 0.02,
        decoder=_init_decoder(k_dec, embed_dim, ffn_dim, vocab_size, num_heads),
    )


# ------------------------------------- main -------------------------------------

if __name__ == "__main__":
    B = 2
    C = 3
    IMG = 32
    PATCH = 16          # -> 4 patches per image
    EMBED = 32
    HEADS = 4
    FFN = 4 * EMBED
    VOCAB = 128
    SEQ = 8
    PAD_ID = 0

    root = jax.random.PRNGKey(0)
    k_par, k_img, k_tok = jax.random.split(root, 3)

    params = init_params(k_par, img_size=IMG, patch_size=PATCH, in_ch=C,
                         embed_dim=EMBED, ffn_dim=FFN, vocab_size=VOCAB,
                         num_heads=HEADS)

    images = jax.random.normal(k_img, (B, C, IMG, IMG), jnp.float32)
    token_ids = jax.random.randint(k_tok, (B, SEQ), 1, VOCAB)
    token_ids = token_ids.at[:, -2:].set(PAD_ID)       # some padding tokens

    fwd = jax.jit(functools.partial(image_caption_forward,
                                    num_heads=HEADS, patch_size=PATCH, pad_id=PAD_ID))
    logits = fwd(params, images, token_ids)
    jax.block_until_ready(logits)

    assert logits.shape == (B, SEQ, VOCAB), logits.shape
    assert logits.dtype == jnp.float32
    assert bool(jnp.all(jnp.isfinite(logits)))
    print("KERNEL_OK")
</pallas_src>

<mosaic_0001>
module attributes {stable_mosaic.version = 11 : i64} {
  func.func @_patch_embed_kernel(%arg0: memref<8x768xf32, #tpu.memory_space<vmem>>, %arg1: memref<768x32xf32, #tpu.memory_space<vmem>>, %arg2: memref<1x32xf32, #tpu.memory_space<vmem>>, %arg3: memref<4x32xf32, #tpu.memory_space<vmem>>, %arg4: memref<8x32xf32, #tpu.memory_space<vmem>>) attributes {dimension_semantics = [], scalar_prefetch = 0 : i64, scratch_operands = 0 : i64, tpu.core_type = #tpu.core_type<tc>} {
    %c0 = arith.constant 0 : index
    %c0_0 = arith.constant 0 : index
    %0 = vector.load %arg0[%c0, %c0_0] : memref<8x768xf32, #tpu.memory_space<vmem>>, vector<8x768xf32>
    %c0_1 = arith.constant 0 : index
    %c0_2 = arith.constant 0 : index
    %1 = vector.load %arg1[%c0_1, %c0_2] : memref<768x32xf32, #tpu.memory_space<vmem>>, vector<768x32xf32>
    %2 = arith.truncf %0 : vector<8x768xf32> to vector<8x768xbf16>
    %3 = arith.truncf %1 : vector<768x32xf32> to vector<768x32xbf16>
    %cst = arith.constant dense<0.000000e+00> : vector<8x32xf32>
    %4 = tpu.matmul %2, %3, %cst {dimension_numbers = #tpu.dot_dimension_numbers<[1], [0], [0], [1], [0, 0, 1, 1], [], []>} : vector<8x768xbf16>, vector<768x32xbf16>, vector<8x32xf32> -> vector<8x32xf32>
    %c0_3 = arith.constant 0 : index
    %c0_4 = arith.constant 0 : index
    %5 = vector.load %arg2[%c0_3, %c0_4] : memref<1x32xf32, #tpu.memory_space<vmem>>, vector<1x32xf32>
    %6 = vector.broadcast %5 : vector<1x32xf32> to vector<8x32xf32>
    %7 = arith.addf %4, %6 : vector<8x32xf32>
    %c0_5 = arith.constant 0 : index
    %c0_6 = arith.constant 0 : index
    %8 = vector.load %arg3[%c0_5, %c0_6] : memref<4x32xf32, #tpu.memory_space<vmem>>, vector<4x32xf32>
    %9 = tpu.concatenate %8, %8 in 0 : vector<4x32xf32>, vector<4x32xf32> -> vector<8x32xf32>
    %10 = arith.addf %7, %9 : vector<8x32xf32>
    %c0_7 = arith.constant 0 : index
    %c0_8 = arith.constant 0 : index
    %11 = vector.load %arg4[%c0_7, %c0_8] : memref<8x32xf32, #tpu.memory_space<vmem>>, vector<8x32xf32>
    tpu.vector_store %arg4[%c0_7, %c0_8], %10 {strides = array<i32>} : memref<8x32xf32, #tpu.memory_space<vmem>>, vector<8x32xf32>,
    return
  }
}

module attributes {stable_mosaic.version = 11 : i64} {
  func.func @_encoder_layer_kernel(%arg0: memref<8x32xf32, #tpu.memory_space<vmem>>, %arg1: memref<8x1xf32, #tpu.memory_space<vmem>>, %arg2: memref<1x8xf32, #tpu.memory_space<vmem>>, %arg3: memref<4x32x8xf32, #tpu.memory_space<vmem>>, %arg4: memref<4x1x8xf32, #tpu.memory_space<vmem>>, %arg5: memref<4x32x8xf32, #tpu.memory_space<vmem>>, %arg6: memref<4x1x8xf32, #tpu.memory_space<vmem>>, %arg7: memref<4x32x8xf32, #tpu.memory_space<vmem>>, %arg8: memref<4x1x8xf32, #tpu.memory_space<vmem>>, %arg9: memref<4x8x32xf32, #tpu.memory_space<vmem>>, %arg10: memref<1x32xf32, #tpu.memory_space<vmem>>, %arg11: memref<1x32xf32, #tpu.memory_space<vmem>>, %arg12: memref<1x32xf32, #tpu.memory_space<vmem>>, %arg13: memref<32x128xf32, #tpu.memory_space<vmem>>, %arg14: memref<1x128xf32, #tpu.memory_space<vmem>>, %arg15: memref<128x32xf32, #tpu.memory_space<vmem>>, %arg16: memref<1x32xf32, #tpu.memory_space<vmem>>, %arg17: memref<1x32xf32, #tpu.memory_space<vmem>>, %arg18: memref<1x32xf32, #tpu.memory_space<vmem>>, %arg19: memref<8x32xf32, #tpu.memory_space<vmem>>) attributes {dimension_semantics = [], scalar_prefetch = 0 : i64, scratch_operands = 0 : i64, tpu.core_type = #tpu.core_type<tc>} {
    %c0 = arith.constant 0 : index
    %c0_0 = arith.constant 0 : index
    %0 = vector.load %arg0[%c0, %c0_0] : memref<8x32xf32, #tpu.memory_space<vmem>>, vector<8x32xf32>
    %c0_1 = arith.constant 0 : index
    %c0_2 = arith.constant 0 : index
    %1 = vector.load %arg1[%c0_1, %c0_2] : memref<8x1xf32, #tpu.memory_space<vmem>>, vector<8x1xf32>
    %c0_3 = arith.constant 0 : index
    %c0_4 = arith.constant 0 : index
    %2 = vector.load %arg2[%c0_3, %c0_4] : memref<1x8xf32, #tpu.memory_space<vmem>>, vector<1x8xf32>
    %3 = vector.broadcast %1 : vector<8x1xf32> to vector<8x8xf32>
    %4 = vector.broadcast %2 : vector<1x8xf32> to vector<8x8xf32>
    %5 = arith.cmpf oeq, %3, %4 : vector<8x8xf32>
    %cst = arith.constant 0.000000e+00 : f32
    %cst_5 = arith.constant -1.000000e+09 : f32
    %6 = vector.broadcast %cst : f32 to vector<8x8xf32>
    %7 = vector.broadcast %cst_5 : f32 to vector<8x8xf32>
    %8 = arith.select %5, %6, %7 : vector<8x8xi1>, vector<8x8xf32>
    %c0_6 = arith.constant 0 : index
    %c0_7 = arith.constant 0 : index
    %c0_8 = arith.constant 0 : index
    %9 = vector.load %arg3[%c0_6, %c0_7, %c0_8] : memref<4x32x8xf32, #tpu.memory_space<vmem>>, vector<1x32x8xf32>
    %10 = vector.shape_cast %9 : vector<1x32x8xf32> to vector<32x8xf32>
    %11 = arith.truncf %0 : vector<8x32xf32> to vector<8x32xbf16>
    %12 = arith.truncf %10 : vector<32x8xf32> to vector<32x8xbf16>
    %cst_9 = arith.constant dense<0.000000e+00> : vector<8x8xf32>
    %13 = tpu.matmul %11, %12, %cst_9 {dimension_numbers = #tpu.dot_dimension_numbers<[1], [0], [0], [1], [0, 0, 1, 1], [], []>} : vector<8x32xbf16>, vector<32x8xbf16>, vector<8x8xf32> -> vector<8x8xf32>
    %c0_10 = arith.constant 0 : index
    %c0_11 = arith.constant 0 : index
    %c0_12 = arith.constant 0 : index
    %14 = vector.load %arg4[%c0_10, %c0_11, %c0_12] : memref<4x1x8xf32, #tpu.memory_space<vmem>>, vector<1x1x8xf32>
    %15 = vector.shape_cast %14 : vector<1x1x8xf32> to vector<1x8xf32>
    %16 = vector.broadcast %15 : vector<1x8xf32> to vector<8x8xf32>
    %17 = arith.addf %13, %16 : vector<8x8xf32>
    %c0_13 = arith.constant 0 : index
    %c0_14 = arith.constant 0 : index
    %c0_15 = arith.constant 0 : index
    %18 = vector.load %arg5[%c0_13, %c0_14, %c0_15] : memref<4x32x8xf32, #tpu.memory_space<vmem>>, vector<1x32x8xf32>
    %19 = vector.shape_cast %18 : vector<1x32x8xf32> to vector<32x8xf32>
    %20 = arith.truncf %0 : vector<8x32xf32> to vector<8x32xbf16>
    %21 = arith.truncf %19 : vector<32x8xf32> to vector<32x8xbf16>
    %cst_16 = arith.constant dense<0.000000e+00> : vector<8x8xf32>
    %22 = tpu.matmul %20, %21, %cst_16 {dimension_numbers = #tpu.dot_dimension_numbers<[1], [0], [0], [1], [0, 0, 1, 1], [], []>} : vector<8x32xbf16>, vector<32x8xbf16>, vector<8x8xf32> -> vector<8x8xf32>
    %c0_17 = arith.constant 0 : index
    %c0_18 = arith.constant 0 : index
    %c0_19 = arith.constant 0 : index
    %23 = vector.load %arg6[%c0_17, %c0_18, %c0_19] : memref<4x1x8xf32, #tpu.memory_space<vmem>>, vector<1x1x8xf32>
    %24 = vector.shape_cast %23 : vector<1x1x8xf32> to vector<1x8xf32>
    %25 = vector.broadcast %24 : vector<1x8xf32> to vector<8x8xf32>
    %26 = arith.addf %22, %25 : vector<8x8xf32>
    %c0_20 = arith.constant 0 : index
    %c0_21 = arith.constant 0 : index
    %c0_22 = arith.constant 0 : index
    %27 = vector.load %arg7[%c0_20, %c0_21, %c0_22] : memref<4x32x8xf32, #tpu.memory_space<vmem>>, vector<1x32x8xf32>
    %28 = vector.shape_cast %27 : vector<1x32x8xf32> to vector<32x8xf32>
    %29 = arith.truncf %0 : vector<8x32xf32> to vector<8x32xbf16>
    %30 = arith.truncf %28 : vector<32x8xf32> to vector<32x8xbf16>
    %cst_23 = arith.constant dense<0.000000e+00> : vector<8x8xf32>
    %31 = tpu.matmul %29, %30, %cst_23 {dimension_numbers = #tpu.dot_dimension_numbers<[1], [0], [0], [1], [0, 0, 1, 1], [], []>} : vector<8x32xbf16>, vector<32x8xbf16>, vector<8x8xf32> -> vector<8x8xf32>
    %c0_24 = arith.constant 0 : index
    %c0_25 = arith.constant 0 : index
    %c0_26 = arith.constant 0 : index
    %32 = vector.load %arg8[%c0_24, %c0_25, %c0_26] : memref<4x1x8xf32, #tpu.memory_space<vmem>>, vector<1x1x8xf32>
    %33 = vector.shape_cast %32 : vector<1x1x8xf32> to vector<1x8xf32>
    %34 = vector.broadcast %33 : vector<1x8xf32> to vector<8x8xf32>
    %35 = arith.addf %31, %34 : vector<8x8xf32>
    %36 = arith.truncf %17 : vector<8x8xf32> to vector<8x8xbf16>
    %37 = arith.truncf %26 : vector<8x8xf32> to vector<8x8xbf16>
    %cst_27 = arith.constant dense<0.000000e+00> : vector<8x8xf32>
    %38 = tpu.matmul %36, %37, %cst_27 {dimension_numbers = #tpu.dot_dimension_numbers<[1], [1], [0], [0], [0, 0, 1, 0], [], []>} : vector<8x8xbf16>, vector<8x8xbf16>, vector<8x8xf32> -> vector<8x8xf32>
    %cst_28 = arith.constant 0.353553385 : f32
    %39 = vector.broadcast %cst_28 : f32 to vector<8x8xf32>
    %40 = arith.mulf %38, %39 : vector<8x8xf32>
    %41 = arith.addf %40, %8 : vector<8x8xf32>
    %cst_29 = arith.constant dense<0xFF800000> : vector<8xf32>
    %42 = vector.multi_reduction <maximumf>, %41, %cst_29 [1] : vector<8x8xf32> to vector<8xf32>
    %43 = vector.shape_cast %42 : vector<8xf32> to vector<8x1xf32>
    %44 = vector.broadcast %43 : vector<8x1xf32> to vector<8x8xf32>
    %45 = arith.subf %41, %44 : vector<8x8xf32>
    %46 = math.exp %45 : vector<8x8xf32>
    %cst_30 = arith.constant dense<0.000000e+00> : vector<8xf32>
    %47 = vector.multi_reduction <add>, %46, %cst_30 [1] : vector<8x8xf32> to vector<8xf32>
    %48 = vector.shape_cast %47 : vector<8xf32> to vector<8x1xf32>
    %49 = tpu.reciprocal %48 {approx = true} : vector<8x1xf32> -> vector<8x1xf32>
    %50 = vector.broadcast %49 : vector<8x1xf32> to vector<8x8xf32>
    %51 = arith.mulf %46, %50 : vector<8x8xf32>
    %52 = arith.truncf %51 : vector<8x8xf32> to vector<8x8xbf16>
    %53 = arith.truncf %35 : vector<8x8xf32> to vector<8x8xbf16>
    %cst_31 = arith.constant dense<0.000000e+00> : vector<8x8xf32>
    %54 = tpu.matmul %52, %53, %cst_31 {dimension_numbers = #tpu.dot_dimension_numbers<[1], [0], [0], [1], [0, 0, 1, 1], [], []>} : vector<8x8xbf16>, vector<8x8xbf16>, vector<8x8xf32> -> vector<8x8xf32>
    %c0_32 = arith.constant 0 : index
    %c0_33 = arith.constant 0 : index
    %c0_34 = arith.constant 0 : index
    %55 = vector.load %arg9[%c0_32, %c0_33, %c0_34] : memref<4x8x32xf32, #tpu.memory_space<vmem>>, vector<1x8x32xf32>
    %56 = vector.shape_cast %55 : vector<1x8x32xf32> to vector<8x32xf32>
    %57 = arith.truncf %54 : vector<8x8xf32> to vector<8x8xbf16>
    %58 = arith.truncf %56 : vector<8x32xf32> to vector<8x32xbf16>
    %cst_35 = arith.constant dense<0.000000e+00> : vector<8x32xf32>
    %59 = tpu.matmul %57, %58, %cst_35 {dimension_numbers = #tpu.dot_dimension_numbers<[1], [0], [0], [1], [0, 0, 1, 1], [], []>} : vector<8x8xbf16>, vector<8x32xbf16>, vector<8x32xf32> -> vector<8x32xf32>
    %c1 = arith.constant 1 : index
    %c0_36 = arith.constant 0 : index
    %c0_37 = arith.constant 0 : index
    %60 = vector.load %arg3[%c1, %c0_36, %c0_37] : memref<4x32x8xf32, #tpu.memory_space<vmem>>, vector<1x32x8xf32>
    %61 = vector.shape_cast %60 : vector<1x32x8xf32> to vector<32x8xf32>
    %62 = arith.truncf %0 : vector<8x32xf32> to vector<8x32xbf16>
    %63 = arith.truncf %61 : vector<32x8xf32> to vector<32x8xbf16>
    %cst_38 = arith.constant dense<0.000000e+00> : vector<8x8xf32>
    %64 = tpu.matmul %62, %63, %cst_38 {dimension_numbers = #tpu.dot_dimension_numbers<[1], [0], [0], [1], [0, 0, 1, 1], [], []>} : vector<8x32xbf16>, vector<32x8xbf16>, vector<8x8xf32> -> vector<8x8xf32>
    %c1_39 = arith.constant 1 : index
    %c0_40 = arith.constant 0 : index
    %c0_41 = arith.constant 0 : index
    %65 = vector.load %arg4[%c1_39, %c0_40, %c0_41] : memref<4x1x8xf32, #tpu.memory_space<vmem>>, vector<1x1x8xf32>
    %66 = vector.shape_cast %65 : vector<1x1x8xf32> to vector<1x8xf32>
    %67 = vector.broadcast %66 : vector<1x8xf32> to vector<8x8xf32>
    %68 = arith.addf %64, %67 : vector<8x8xf32>
    %c1_42 = arith.constant 1 : index
    %c0_43 = arith.constant 0 : index
    %c0_44 = arith.constant 0 : index
    %69 = vector.load %arg5[%c1_42, %c0_43, %c0_44] : memref<4x32x8xf32, #tpu.memory_space<vmem>>, vector<1x32x8xf32>
    %70 = vector.shape_cast %69 : vector<1x32x8xf32> to vector<32x8xf32>
    %71 = arith.truncf %0 : vector<8x32xf32> to vector<8x32xbf16>
    %72 = arith.truncf %70 : vector<32x8xf32> to vector<32x8xbf16>
    %cst_45 = arith.constant dense<0.000000e+00> : vector<8x8xf32>
    %73 = tpu.matmul %71, %72, %cst_45 {dimension_numbers = #tpu.dot_dimension_numbers<[1], [0], [0], [1], [0, 0, 1, 1], [], []>} : vector<8x32xbf16>, vector<32x8xbf16>, vector<8x8xf32> -> vector<8x8xf32>
    %c1_46 = arith.constant 1 : index
    %c0_47 = arith.constant 0 : index
    %c0_48 = arith.constant 0 : index
    %74 = vector.load %arg6[%c1_46, %c0_47, %c0_48] : memref<4x1x8xf32, #tpu.memory_space<vmem>>, vector<1x1x8xf32>
    %75 = vector.shape_cast %74 : vector<1x1x8xf32> to vector<1x8xf32>
    %76 = vector.broadcast %75 : vector<1x8xf32> to vector<8x8xf32>
    %77 = arith.addf %73, %76 : vector<8x8xf32>
    %c1_49 = arith.constant 1 : index
    %c0_50 = arith.constant 0 : index
    %c0_51 = arith.constant 0 : index
    %78 = vector.load %arg7[%c1_49, %c0_50, %c0_51] : memref<4x32x8xf32, #tpu.memory_space<vmem>>, vector<1x32x8xf32>
    %79 = vector.shape_cast %78 : vector<1x32x8xf32> to vector<32x8xf32>
    %80 = arith.truncf %0 : vector<8x32xf32> to vector<8x32xbf16>
    %81 = arith.truncf %79 : vector<32x8xf32> to vector<32x8xbf16>
    %cst_52 = arith.constant dense<0.000000e+00> : vector<8x8xf32>
    %82 = tpu.matmul %80, %81, %cst_52 {dimension_numbers = #tpu.dot_dimension_numbers<[1], [0], [0], [1], [0, 0, 1, 1], [], []>} : vector<8x32xbf16>, vector<32x8xbf16>, vector<8x8xf32> -> vector<8x8xf32>
    %c1_53 = arith.constant 1 : index
    %c0_54 = arith.constant 0 : index
    %c0_55 = arith.constant 0 : index
    %83 = vector.load %arg8[%c1_53, %c0_54, %c0_55] : memref<4x1x8xf32, #tpu.memory_space<vmem>>, vector<1x1x8xf32>
    %84 = vector.shape_cast %83 : vector<1x1x8xf32> to vector<1x8xf32>
    %85 = vector.broadcast %84 : vector<1x8xf32> to vector<8x8xf32>
    %86 = arith.addf %82, %85 : vector<8x8xf32>
    %87 = arith.truncf %68 : vector<8x8xf32> to vector<8x8xbf16>
    %88 = arith.truncf %77 : vector<8x8xf32> to vector<8x8xbf16>
    %cst_56 = arith.constant dense<0.000000e+00> : vector<8x8xf32>
    %89 = tpu.matmul %87, %88, %cst_56 {dimension_numbers = #tpu.dot_dimension_numbers<[1], [1], [0], [0], [0, 0, 1, 0], [], []>} : vector<8x8xbf16>, vector<8x8xbf16>, vector<8x8xf32> -> vector<8x8xf32>
    %cst_57 = arith.constant 0.353553385 : f32
    %90 = vector.broadcast %cst_57 : f32 to vector<8x8xf32>
    %91 = arith.mulf %89, %90 : vector<8x8xf32>
    %92 = arith.addf %91, %8 : vector<8x8xf32>
    %cst_58 = arith.constant dense<0xFF800000> : vector<8xf32>
    %93 = vector.multi_reduction <maximumf>, %92, %cst_58 [1] : vector<8x8xf32> to vector<8xf32>
    %94 = vector.shape_cast %93 : vector<8xf32> to vector<8x1xf32>
    %95 = vector.broadcast %94 : vector<8x1xf32> to vector<8x8xf32>
    %96 = arith.subf %92, %95 : vector<8x8xf32>
    %97 = math.exp %96 : vector<8x8xf32>
    %cst_59 = arith.constant dense<0.000000e+00> : vector<8xf32>
    %98 = vector.multi_reduction <add>, %97, %cst_59 [1] : vector<8x8xf32> to vector<8xf32>
    %99 = vector.shape_cast %98 : vector<8xf32> to vector<8x1xf32>
    %100 = tpu.reciprocal %99 {approx = true} : vector<8x1xf32> -> vector<8x1xf32>
    %101 = vector.broadcast %100 : vector<8x1xf32> to vector<8x8xf32>
    %102 = arith.mulf %97, %101 : vector<8x8xf32>
    %103 = arith.truncf %102 : vector<8x8xf32> to vector<8x8xbf16>
    %104 = arith.truncf %86 : vector<8x8xf32> to vector<8x8xbf16>
    %cst_60 = arith.constant dense<0.000000e+00> : vector<8x8xf32>
    %105 = tpu.matmul %103, %104, %cst_60 {dimension_numbers = #tpu.dot_dimension_numbers<[1], [0], [0], [1], [0, 0, 1, 1], [], []>} : vector<8x8xbf16>, vector<8x8xbf16>, vector<8x8xf32> -> vector<8x8xf32>
    %c1_61 = arith.constant 1 : index
    %c0_62 = arith.constant 0 : index
    %c0_63 = arith.constant 0 : index
    %106 = vector.load %arg9[%c1_61, %c0_62, %c0_63] : memref<4x8x32xf32, #tpu.memory_space<vmem>>, vector<1x8x32xf32>
    %107 = vector.shape_cast %106 : vector<1x8x32xf32> to vector<8x32xf32>
    %108 = arith.truncf %105 : vector<8x8xf32> to vector<8x8xbf16>
    %109 = arith.truncf %107 : vector<8x32xf32> to vector<8x32xbf16>
    %cst_64 = arith.constant dense<0.000000e+00> : vector<8x32xf32>
    %110 = tpu.matmul %108, %109, %cst_64 {dimension_numbers = #tpu.dot_dimension_numbers<[1], [0], [0], [1], [0, 0, 1, 1], [], []>} : vector<8x8xbf16>, vector<8x32xbf16>, vector<8x32xf32> -> vector<8x32xf32>
    %111 = arith.addf %59, %110 : vector<8x32xf32>
    %c2 = arith.constant 2 : index
    %c0_65 = arith.constant 0 : index
    %c0_66 = arith.constant 0 : index
    %112 = vector.load %arg3[%c2, %c0_65, %c0_66] : memref<4x32x8xf32, #tpu.memory_space<vmem>>, vector<1x32x8xf32>
    %113 = vector.shape_cast %112 : vector<1x32x8xf32> to vector<32x8xf32>
    %114 = arith.truncf %0 : vector<8x32xf32> to vector<8x32xbf16>
    %115 = arith.truncf %113 : vector<32x8xf32> to vector<32x8xbf16>
    %cst_67 = arith.constant dense<0.000000e+00> : vector<8x8xf32>
    %116 = tpu.matmul %114, %115, %cst_67 {dimension_numbers = #tpu.dot_dimension_numbers<[1], [0], [0], [1], [0, 0, 1, 1], [], []>} : vector<8x32xbf16>, vector<32x8xbf16>, vector<8x8xf32> -> vector<8x8xf32>
    %c2_68 = arith.constant 2 : index
    %c0_69 = arith.constant 0 : index
    %c0_70 = arith.constant 0 : index
    %117 = vector.load %arg4[%c2_68, %c0_69, %c0_70] : memref<4x1x8xf32, #tpu.memory_space<vmem>>, vector<1x1x8xf32>
    %118 = vector.shape_cast %117 : vector<1x1x8xf32> to vector<1x8xf32>
    %119 = vector.broadcast %118 : vector<1x8xf32> to vector<8x8xf32>
    %120 = arith.addf %116, %119 : vector<8x8xf32>
    %c2_71 = arith.constant 2 : index
    %c0_72 = arith.constant 0 : index
    %c0_73 = arith.constant 0 : index
    %121 = vector.load %arg5[%c2_71, %c0_72, %c0_73] : memref<4x32x8xf32, #tpu.memory_space<vmem>>, vector<1x32x8xf32>
    %122 = vector.shape_cast %121 : vector<1x32x8xf32> to vector<32x8xf32>
    %123 = arith.truncf %0 : vector<8x32xf32> to vector<8x32xbf16>
    %124 = arith.truncf %122 : vector<32x8xf32> to vector<32x8xbf16>
    %cst_74 = arith.constant dense<0.000000e+00> : vector<8x8xf32>
    %125 = tpu.matmul %123, %124, %cst_74 {dimension_numbers = #tpu.dot_dimension_numbers<[1], [0], [0], [1], [0, 0, 1, 1], [], []>} : vector<8x32xbf16>, vector<32x8xbf16>, vector<8x8xf32> -> vector<8x8xf32>
    %c2_75 = arith.constant 2 : index
    %c0_76 = arith.constant 0 : index
    %c0_77 = arith.constant 0 : index
    %126 = vector.load %arg6[%c2_75, %c0_76, %c0_77] : memref<4x1x8xf32, #tpu.memory_space<vmem>>, vector<1x1x8xf32>
    %127 = vector.shape_cast %126 : vector<1x1x8xf32> to vector<1x8xf32>
    %128 = vector.broadcast %127 : vector<1x8xf32> to vector<8x8xf32>
    %129 = arith.addf %125, %128 : vector<8x8xf32>
    %c2_78 = arith.constant 2 : index
    %c0_79 = arith.constant 0 : index
    %c0_80 = arith.constant 0 : index
    %130 = vector.load %arg7[%c2_78, %c0_79, %c0_80] : memref<4x32x8xf32, #tpu.memory_space<vmem>>, vector<1x32x8xf32>
    %131 = vector.shape_cast %130 : vector<1x32x8xf32> to vector<32x8xf32>
    %132 = arith.truncf %0 : vector<8x32xf32> to vector<8x32xbf16>
    %133 = arith.truncf %131 : vector<32x8xf32> to vector<32x8xbf16>
    %cst_81 = arith.constant dense<0.000000e+00> : vector<8x8xf32>
    %134 = tpu.matmul %132, %133, %cst_81 {dimension_numbers = #tpu.dot_dimension_numbers<[1], [0], [0], [1], [0, 0, 1, 1], [], []>} : vector<8x32xbf16>, vector<32x8xbf16>, vector<8x8xf32> -> vector<8x8xf32>
    %c2_82 = arith.constant 2 : index
    %c0_83 = arith.constant 0 : index
    %c0_84 = arith.constant 0 : index
    %135 = vector.load %arg8[%c2_82, %c0_83, %c0_84] : memref<4x1x8xf32, #tpu.memory_space<vmem>>, vector<1x1x8xf32>
    %136 = vector.shape_cast %135 : vector<1x1x8xf32> to vector<1x8xf32>
    %137 = vector.broadcast %136 : vector<1x8xf32> to vector<8x8xf32>
    %138 = arith.addf %134, %137 : vector<8x8xf32>
    %139 = arith.truncf %120 : vector<8x8xf32> to vector<8x8xbf16>
    %140 = arith.truncf %129 : vector<8x8xf32> to vector<8x8xbf16>
    %cst_85 = arith.constant dense<0.000000e+00> : vector<8x8xf32>
    %141 = tpu.matmul %139, %140, %cst_85 {dimension_numbers = #tpu.dot_dimension_numbers<[1], [1], [0], [0], [0, 0, 1, 0], [], []>} : vector<8x8xbf16>, vector<8x8xbf16>, vector<8x8xf32> -> vector<8x8xf32>
    %cst_86 = arith.constant 0.353553385 : f32
    %142 = vector.broadcast %cst_86 : f32 to vector<8x8xf32>
    %143 = arith.mulf %141, %142 : vector<8x8xf32>
    %144 = arith.addf %143, %8 : vector<8x8xf32>
    %cst_87 = arith.constant dense<0xFF800000> : vector<8xf32>
    %145 = vector.multi_reduction <maximumf>, %144, %cst_87 [1] : vector<8x8xf32> to vector<8xf32>
    %146 = vector.shape_cast %145 : vector<8xf32> to vector<8x1xf32>
    %147 = vector.broadcast %146 : vector<8x1xf32> to vector<8x8xf32>
    %148 = arith.subf %144, %147 : vector<8x8xf32>
    %149 = math.exp %148 : vector<8x8xf32>
    %cst_88 = arith.constant dense<0.000000e+00> : vector<8xf32>
    %150 = vector.multi_reduction <add>, %149, %cst_88 [1] : vector<8x8xf32> to vector<8xf32>
    %151 = vector.shape_cast %150 : vector<8xf32> to vector<8x1xf32>
    %152 = tpu.reciprocal %151 {approx = true} : vector<8x1xf32> -> vector<8x1xf32>
    %153 = vector.broadcast %152 : vector<8x1xf32> to vector<8x8xf32>
    %154 = arith.mulf %149, %153 : vector<8x8xf32>
    %155 = arith.truncf %154 : vector<8x8xf32> to vector<8x8xbf16>
    %156 = arith.truncf %138 : vector<8x8xf32> to vector<8x8xbf16>
    %cst_89 = arith.constant dense<0.000000e+00> : vector<8x8xf32>
    %157 = tpu.matmul %155, %156, %cst_89 {dimension_numbers = #tpu.dot_dimension_numbers<[1], [0], [0], [1], [0, 0, 1, 1], [], []>} : vector<8x8xbf16>, vector<8x8xbf16>, vector<8x8xf32> -> vector<8x8xf32>
    %c2_90 = arith.constant 2 : index
    %c0_91 = arith.constant 0 : index
    %c0_92 = arith.constant 0 : index
    %158 = vector.load %arg9[%c2_90, %c0_91, %c0_92] : memref<4x8x32xf32, #tpu.memory_space<vmem>>, vector<1x8x32xf32>
    %159 = vector.shape_cast %158 : vector<1x8x32xf32> to vector<8x32xf32>
    %160 = arith.truncf %157 : vector<8x8xf32> to vector<8x8xbf16>
    %161 = arith.truncf %159 : vector<8x32xf32> to vector<8x32xbf16>
    %cst_93 = arith.constant dense<0.000000e+00> : vector<8x32xf32>
    %162 = tpu.matmul %160, %161, %cst_93 {dimension_numbers = #tpu.dot_dimension_numbers<[1], [0], [0], [1], [0, 0, 1, 1], [], []>} : vector<8x8xbf16>, vector<8x32xbf16>, vector<8x32xf32> -> vector<8x32xf32>
    %163 = arith.addf %111, %162 : vector<8x32xf32>
    %c3 = arith.constant 3 : index
    %c0_94 = arith.constant 0 : index
    %c0_95 = arith.constant 0 : index
    %164 = vector.load %arg3[%c3, %c0_94, %c0_95] : memref<4x32x8xf32, #tpu.memory_space<vmem>>, vector<1x32x8xf32>
    %165 = vector.shape_cast %164 : vector<1x32x8xf32> to vector<32x8xf32>
    %166 = arith.truncf %0 : vector<8x32xf32> to vector<8x32xbf16>
    %167 = arith.truncf %165 : vector<32x8xf32> to vector<32x8xbf16>
    %cst_96 = arith.constant dense<0.000000e+00> : vector<8x8xf32>
    %168 = tpu.matmul %166, %167, %cst_96 {dimension_numbers = #tpu.dot_dimension_numbers<[1], [0], [0], [1], [0, 0, 1, 1], [], []>} : vector<8x32xbf16>, vector<32x8xbf16>, vector<8x8xf32> -> vector<8x8xf32>
    %c3_97 = arith.constant 3 : index
    %c0_98 = arith.constant 0 : index
    %c0_99 = arith.constant 0 : index
    %169 = vector.load %arg4[%c3_97, %c0_98, %c0_99] : memref<4x1x8xf32, #tpu.memory_space<vmem>>, vector<1x1x8xf32>
    %170 = vector.shape_cast %169 : vector<1x1x8xf32> to vector<1x8xf32>
    %171 = vector.broadcast %170 : vector<1x8xf32> to vector<8x8xf32>
    %172 = arith.addf %168, %171 : vector<8x8xf32>
    %c3_100 = arith.constant 3 : index
    %c0_101 = arith.constant 0 : index
    %c0_102 = arith.constant 0 : index
    %173 = vector.load %arg5[%c3_100, %c0_101, %c0_102] : memref<4x32x8xf32, #tpu.memory_space<vmem>>, vector<1x32x8xf32>
    %174 = vector.shape_cast %173 : vector<1x32x8xf32> to vector<32x8xf32>
    %175 = arith.truncf %0 : vector<8x32xf32> to vector<8x32xbf16>
    %176 = arith.truncf %174 : vector<32x8xf32> to vector<32x8xbf16>
    %cst_103 = arith.constant dense<0.000000e+00> : vector<8x8xf32>
    %177 = tpu.matmul %175, %176, %cst_103 {dimension_numbers = #tpu.dot_dimension_numbers<[1], [0], [0], [1], [0, 0, 1, 1], [], []>} : vector<8x32xbf16>, vector<32x8xbf16>, vector<8x8xf32> -> vector<8x8xf32>
    %c3_104 = arith.constant 3 : index
    %c0_105 = arith.constant 0 : index
    %c0_106 = arith.constant 0 : index
    %178 = vector.load %arg6[%c3_104, %c0_105, %c0_106] : memref<4x1x8xf32, #tpu.memory_space<vmem>>, vector<1x1x8xf32>
    %179 = vector.shape_cast %178 : vector<1x1x8xf32> to vector<1x8xf32>
    %180 = vector.broadcast %179 : vector<1x8xf32> to vector<8x8xf32>
    %181 = arith.addf %177, %180 : vector<8x8xf32>
    %c3_107 = arith.constant 3 : index
    %c0_108 = arith.constant 0 : index
    %c0_109 = arith.constant 0 : index
    %182 = vector.load %arg7[%c3_107, %c0_108, %c0_109] : memref<4x32x8xf32, #tpu.memory_space<vmem>>, vector<1x32x8xf32>
    %183 = vector.shape_cast %182 : vector<1x32x8xf32> to vector<32x8xf32>
    %184 = arith.truncf %0 : vector<8x32xf32> to vector<8x32xbf16>
    %185 = arith.truncf %183 : vector<32x8xf32> to vector<32x8xbf16>
    %cst_110 = arith.constant dense<0.000000e+00> : vector<8x8xf32>
    %186 = tpu.matmul %184, %185, %cst_110 {dimension_numbers = #tpu.dot_dimension_numbers<[1], [0], [0], [1], [0, 0, 1, 1], [], []>} : vector<8x32xbf16>, vector<32x8xbf16>, vector<8x8xf32> -> vector<8x8xf32>
    %c3_111 = arith.constant 3 : index
    %c0_112 = arith.constant 0 : index
    %c0_113 = arith.constant 0 : index
    %187 = vector.load %arg8[%c3_111, %c0_112, %c0_113] : memref<4x1x8xf32, #tpu.memory_space<vmem>>, vector<1x1x8xf32>
    %188 = vector.shape_cast %187 : vector<1x1x8xf32> to vector<1x8xf32>
    %189 = vector.broadcast %188 : vector<1x8xf32> to vector<8x8xf32>
    %190 = arith.addf %186, %189 : vector<8x8xf32>
    %191 = arith.truncf %172 : vector<8x8xf32> to vector<8x8xbf16>
    %192 = arith.truncf %181 : vector<8x8xf32> to vector<8x8xbf16>
    %cst_114 = arith.constant dense<0.000000e+00> : vector<8x8xf32>
    %193 = tpu.matmul %191, %192, %cst_114 {dimension_numbers = #tpu.dot_dimension_numbers<[1], [1], [0], [0], [0, 0, 1, 0], [], []>} : vector<8x8xbf16>, vector<8x8xbf16>, vector<8x8xf32> -> vector<8x8xf32>
    %cst_115 = arith.constant 0.353553385 : f32
    %194 = vector.broadcast %cst_115 : f32 to vector<8x8xf32>
    %195 = arith.mulf %193, %194 : vector<8x8xf32>
    %196 = arith.addf %195, %8 : vector<8x8xf32>
    %cst_116 = arith.constant dense<0xFF800000> : vector<8xf32>
    %197 = vector.multi_reduction <maximumf>, %196, %cst_116 [1] : vector<8x8xf32> to vector<8xf32>
    %198 = vector.shape_cast %197 : vector<8xf32> to vector<8x1xf32>
    %199 = vector.broadcast %198 : vector<8x1xf32> to vector<8x8xf32>
    %200 = arith.subf %196, %199 : vector<8x8xf32>
    %201 = math.exp %200 : vector<8x8xf32>
    %cst_117 = arith.constant dense<0.000000e+00> : vector<8xf32>
    %202 = vector.multi_reduction <add>, %201, %cst_117 [1] : vector<8x8xf32> to vector<8xf32>
    %203 = vector.shape_cast %202 : vector<8xf32> to vector<8x1xf32>
    %204 = tpu.reciprocal %203 {approx = true} : vector<8x1xf32> -> vector<8x1xf32>
    %205 = vector.broadcast %204 : vector<8x1xf32> to vector<8x8xf32>
    %206 = arith.mulf %201, %205 : vector<8x8xf32>
    %207 = arith.truncf %206 : vector<8x8xf32> to vector<8x8xbf16>
    %208 = arith.truncf %190 : vector<8x8xf32> to vector<8x8xbf16>
    %cst_118 = arith.constant dense<0.000000e+00> : vector<8x8xf32>
    %209 = tpu.matmul %207, %208, %cst_118 {dimension_numbers = #tpu.dot_dimension_numbers<[1], [0], [0], [1], [0, 0, 1, 1], [], []>} : vector<8x8xbf16>, vector<8x8xbf16>, vector<8x8xf32> -> vector<8x8xf32>
    %c3_119 = arith.constant 3 : index
    %c0_120 = arith.constant 0 : index
    %c0_121 = arith.constant 0 : index
    %210 = vector.load %arg9[%c3_119, %c0_120, %c0_121] : memref<4x8x32xf32, #tpu.memory_space<vmem>>, vector<1x8x32xf32>
    %211 = vector.shape_cast %210 : vector<1x8x32xf32> to vector<8x32xf32>
    %212 = arith.truncf %209 : vector<8x8xf32> to vector<8x8xbf16>
    %213 = arith.truncf %211 : vector<8x32xf32> to vector<8x32xbf16>
    %cst_122 = arith.constant dense<0.000000e+00> : vector<8x32xf32>
    %214 = tpu.matmul %212, %213, %cst_122 {dimension_numbers = #tpu.dot_dimension_numbers<[1], [0], [0], [1], [0, 0, 1, 1], [], []>} : vector<8x8xbf16>, vector<8x32xbf16>, vector<8x32xf32> -> vector<8x32xf32>
    %215 = arith.addf %163, %214 : vector<8x32xf32>
    %c0_123 = arith.constant 0 : index
    %c0_124 = arith.constant 0 : index
    %216 = vector.load %arg10[%c0_123, %c0_124] : memref<1x32xf32, #tpu.memory_space<vmem>>, vector<1x32xf32>
    %217 = vector.broadcast %216 : vector<1x32xf32> to vector<8x32xf32>
    %218 = arith.addf %215, %217 : vector<8x32xf32>
    %219 = arith.addf %0, %218 : vector<8x32xf32>
    %c0_125 = arith.constant 0 : index
    %c0_126 = arith.constant 0 : index
    %220 = vector.load %arg11[%c0_125, %c0_126] : memref<1x32xf32, #tpu.memory_space<vmem>>, vector<1x32xf32>
    %c0_127 = arith.constant 0 : index
    %c0_128 = arith.constant 0 : index
    %221 = vector.load %arg12[%c0_127, %c0_128] : memref<1x32xf32, #tpu.memory_space<vmem>>, vector<1x32xf32>
    %cst_129 = arith.constant dense<0.000000e+00> : vector<8xf32>
    %222 = vector.multi_reduction <add>, %219, %cst_129 [1] : vector<8x32xf32> to vector<8xf32>
    %223 = vector.shape_cast %222 : vector<8xf32> to vector<8x1xf32>
    %224 = arith.mulf %219, %219 : vector<8x32xf32>
    %cst_130 = arith.constant dense<0.000000e+00> : vector<8xf32>
    %225 = vector.multi_reduction <add>, %224, %cst_130 [1] : vector<8x32xf32> to vector<8xf32>
    %226 = vector.shape_cast %225 : vector<8xf32> to vector<8x1xf32>
    %cst_131 = arith.constant 3.125000e-02 : f32
    %227 = vector.broadcast %cst_131 : f32 to vector<8x1xf32>
    %228 = arith.mulf %223, %227 : vector<8x1xf32>
    %cst_132 = arith.constant 3.125000e-02 : f32
    %229 = vector.broadcast %cst_132 : f32 to vector<8x1xf32>
    %230 = arith.mulf %226, %229 : vector<8x1xf32>
    %231 = arith.mulf %228, %228 : vector<8x1xf32>
    %232 = arith.subf %230, %231 : vector<8x1xf32>
    %233 = vector.broadcast %228 : vector<8x1xf32> to vector<8x32xf32>
    %234 = arith.subf %219, %233 : vector<8x32xf32>
    %cst_133 = arith.constant 9.99999974E-6 : f32
    %235 = vector.broadcast %cst_133 : f32 to vector<8x1xf32>
    %236 = arith.addf %232, %235 : vector<8x1xf32>
    %237 = math.rsqrt %236 : vector<8x1xf32>
    %238 = vector.broadcast %237 : vector<8x1xf32> to vector<8x32xf32>
    %239 = arith.mulf %234, %238 : vector<8x32xf32>
    %240 = vector.broadcast %220 : vector<1x32xf32> to vector<8x32xf32>
    %241 = arith.mulf %239, %240 : vector<8x32xf32>
    %242 = vector.broadcast %221 : vector<1x32xf32> to vector<8x32xf32>
    %243 = arith.addf %241, %242 : vector<8x32xf32>
    %c0_134 = arith.constant 0 : index
    %c0_135 = arith.constant 0 : index
    %244 = vector.load %arg13[%c0_134, %c0_135] : memref<32x128xf32, #tpu.memory_space<vmem>>, vector<32x128xf32>
    %245 = arith.truncf %243 : vector<8x32xf32> to vector<8x32xbf16>
    %246 = arith.truncf %244 : vector<32x128xf32> to vector<32x128xbf16>
    %cst_136 = arith.constant dense<0.000000e+00> : vector<8x128xf32>
    %247 = tpu.matmul %245, %246, %cst_136 {dimension_numbers = #tpu.dot_dimension_numbers<[1], [0], [0], [1], [0, 0, 1, 1], [], []>} : vector<8x32xbf16>, vector<32x128xbf16>, vector<8x128xf32> -> vector<8x128xf32>
    %c0_137 = arith.constant 0 : index
    %c0_138 = arith.constant 0 : index
    %248 = vector.load %arg14[%c0_137, %c0_138] : memref<1x128xf32, #tpu.memory_space<vmem>>, vector<1x128xf32>
    %249 = vector.broadcast %248 : vector<1x128xf32> to vector<8x128xf32>
    %250 = arith.addf %247, %249 : vector<8x128xf32>
    %cst_139 = arith.constant 0.000000e+00 : f32
    %251 = vector.broadcast %cst_139 : f32 to vector<8x128xf32>
    %252 = arith.maximumf %250, %251 : vector<8x128xf32>
    %c0_140 = arith.constant 0 : index
    %c0_141 = arith.constant 0 : index
    %253 = vector.load %arg15[%c0_140, %c0_141] : memref<128x32xf32, #tpu.memory_space<vmem>>, vector<128x32xf32>
    %254 = arith.truncf %252 : vector<8x128xf32> to vector<8x128xbf16>
    %255 = arith.truncf %253 : vector<128x32xf32> to vector<128x32xbf16>
    %cst_142 = arith.constant dense<0.000000e+00> : vector<8x32xf32>
    %256 = tpu.matmul %254, %255, %cst_142 {dimension_numbers = #tpu.dot_dimension_numbers<[1], [0], [0], [1], [0, 0, 1, 1], [], []>} : vector<8x128xbf16>, vector<128x32xbf16>, vector<8x32xf32> -> vector<8x32xf32>
    %c0_143 = arith.constant 0 : index
    %c0_144 = arith.constant 0 : index
    %257 = vector.load %arg16[%c0_143, %c0_144] : memref<1x32xf32, #tpu.memory_space<vmem>>, vector<1x32xf32>
    %258 = vector.broadcast %257 : vector<1x32xf32> to vector<8x32xf32>
    %259 = arith.addf %256, %258 : vector<8x32xf32>
    %260 = arith.addf %243, %259 : vector<8x32xf32>
    %c0_145 = arith.constant 0 : index
    %c0_146 = arith.constant 0 : index
    %261 = vector.load %arg17[%c0_145, %c0_146] : memref<1x32xf32, #tpu.memory_space<vmem>>, vector<1x32xf32>
    %c0_147 = arith.constant 0 : index
    %c0_148 = arith.constant 0 : index
    %262 = vector.load %arg18[%c0_147, %c0_148] : memref<1x32xf32, #tpu.memory_space<vmem>>, vector<1x32xf32>
    %cst_149 = arith.constant dense<0.000000e+00> : vector<8xf32>
    %263 = vector.multi_reduction <add>, %260, %cst_149 [1] : vector<8x32xf32> to vector<8xf32>
    %264 = vector.shape_cast %263 : vector<8xf32> to vector<8x1xf32>
    %265 = arith.mulf %260, %260 : vector<8x32xf32>
    %cst_150 = arith.constant dense<0.000000e+00> : vector<8xf32>
    %266 = vector.multi_reduction <add>, %265, %cst_150 [1] : vector<8x32xf32> to vector<8xf32>
    %267 = vector.shape_cast %266 : vector<8xf32> to vector<8x1xf32>
    %cst_151 = arith.constant 3.125000e-02 : f32
    %268 = vector.broadcast %cst_151 : f32 to vector<8x1xf32>
    %269 = arith.mulf %264, %268 : vector<8x1xf32>
    %cst_152 = arith.constant 3.125000e-02 : f32
    %270 = vector.broadcast %cst_152 : f32 to vector<8x1xf32>
    %271 = arith.mulf %267, %270 : vector<8x1xf32>
    %272 = arith.mulf %269, %269 : vector<8x1xf32>
    %273 = arith.subf %271, %272 : vector<8x1xf32>
    %274 = vector.broadcast %269 : vector<8x1xf32> to vector<8x32xf32>
    %275 = arith.subf %260, %274 : vector<8x32xf32>
    %cst_153 = arith.constant 9.99999974E-6 : f32
    %276 = vector.broadcast %cst_153 : f32 to vector<8x1xf32>
    %277 = arith.addf %273, %276 : vector<8x1xf32>
    %278 = math.rsqrt %277 : vector<8x1xf32>
    %279 = vector.broadcast %278 : vector<8x1xf32> to vector<8x32xf32>
    %280 = arith.mulf %275, %279 : vector<8x32xf32>
    %281 = vector.broadcast %261 : vector<1x32xf32> to vector<8x32xf32>
    %282 = arith.mulf %280, %281 : vector<8x32xf32>
    %283 = vector.broadcast %262 : vector<1x32xf32> to vector<8x32xf32>
    %284 = arith.addf %282, %283 : vector<8x32xf32>
    %c0_154 = arith.constant 0 : index
    %c0_155 = arith.constant 0 : index
    %285 = vector.load %arg19[%c0_154, %c0_155] : memref<8x32xf32, #tpu.memory_space<vmem>>, vector<8x32xf32>
    tpu.vector_store %arg19[%c0_154, %c0_155], %284 {strides = array<i32>} : memref<8x32xf32, #tpu.memory_space<vmem>>, vector<8x32xf32>,
    return
  }
}

module attributes {stable_mosaic.version = 11 : i64} {
  func.func @_vocab_proj_kernel(%arg0: i32, %arg1: memref<16x32xf32, #tpu.memory_space<vmem>>, %arg2: memref<32x128xf32, #tpu.memory_space<vmem>>, %arg3: memref<1x128xf32, #tpu.memory_space<vmem>>, %arg4: memref<16x128xf32, #tpu.memory_space<vmem>>) attributes {dimension_semantics = [#tpu.dimension_semantics<parallel>], iteration_bounds = array<i64: 1>, scalar_prefetch = 0 : i64, scratch_operands = 0 : i64, tpu.core_type = #tpu.core_type<tc>, window_params = [{pipeline_mode = #tpu.pipeline_mode<synchronous>, transform_indices = @transform_0, window_bounds = array<i64: 16, 32>}, {transform_indices = @transform_1, window_bounds = array<i64: 32, 128>}, {transform_indices = @transform_2, window_bounds = array<i64: 1, 128>}, {transform_indices = @transform_3, window_bounds = array<i64: 16, 128>}]} {
    %c0 = arith.constant 0 : index
    %c0_0 = arith.constant 0 : index
    %0 = vector.load %arg1[%c0, %c0_0] : memref<16x32xf32, #tpu.memory_space<vmem>>, vector<16x32xf32>
    %c0_1 = arith.constant 0 : index
    %c0_2 = arith.constant 0 : index
    %1 = vector.load %arg2[%c0_1, %c0_2] : memref<32x128xf32, #tpu.memory_space<vmem>>, vector<32x128xf32>
    %2 = arith.truncf %0 : vector<16x32xf32> to vector<16x32xbf16>
    %3 = arith.truncf %1 : vector<32x128xf32> to vector<32x128xbf16>
    %cst = arith.constant dense<0.000000e+00> : vector<16x128xf32>
    %4 = tpu.matmul %2, %3, %cst {dimension_numbers = #tpu.dot_dimension_numbers<[1], [0], [0], [1], [0, 0, 1, 1], [], []>} : vector<16x32xbf16>, vector<32x128xbf16>, vector<16x128xf32> -> vector<16x128xf32>
    %c0_3 = arith.constant 0 : index
    %c0_4 = arith.constant 0 : index
    %5 = vector.load %arg3[%c0_3, %c0_4] : memref<1x128xf32, #tpu.memory_space<vmem>>, vector<1x128xf32>
    %6 = vector.broadcast %5 : vector<1x128xf32> to vector<16x128xf32>
    %7 = arith.addf %4, %6 : vector<16x128xf32>
    %c0_5 = arith.constant 0 : index
    %c0_6 = arith.constant 0 : index
    %8 = vector.load %arg4[%c0_5, %c0_6] : memref<16x128xf32, #tpu.memory_space<vmem>>, vector<16x128xf32>
    tpu.vector_store %arg4[%c0_5, %c0_6], %7 {strides = array<i32>} : memref<16x128xf32, #tpu.memory_space<vmem>>, vector<16x128xf32>,
    return
  }
  func.func @transform_0(%arg0: i32) -> (i32, i32) {
    %c0_i32 = arith.constant 0 : i32
    %c0_i32_0 = arith.constant 0 : i32
    %c0_i32_1 = arith.constant 0 : i32
    return %c0_i32, %c0_i32_0 : i32, i32
  }
  func.func @transform_1(%arg0: i32) -> (i32, i32) {
    %c0_i32 = arith.constant 0 : i32
    %c0_i32_0 = arith.constant 0 : i32
    return %c0_i32, %arg0 : i32, i32
  }
  func.func @transform_2(%arg0: i32) -> (i32, i32) {
    %c0_i32 = arith.constant 0 : i32
    %c0_i32_0 = arith.constant 0 : i32
    return %c0_i32, %arg0 : i32, i32
  }
  func.func @transform_3(%arg0: i32) -> (i32, i32) {
    %c0_i32 = arith.constant 0 : i32
    %c0_i32_0 = arith.constant 0 : i32
    return %c0_i32, %arg0 : i32, i32
  }
}

module attributes {stable_mosaic.version = 11 : i64} {
  func.func @_decoder_layer_kernel(%arg0: memref<16x32xf32, #tpu.memory_space<vmem>>, %arg1: memref<8x32xf32, #tpu.memory_space<vmem>>, %arg2: memref<1x16xf32, #tpu.memory_space<vmem>>, %arg3: memref<16x1xf32, #tpu.memory_space<vmem>>, %arg4: memref<1x16xf32, #tpu.memory_space<vmem>>, %arg5: memref<1x8xf32, #tpu.memory_space<vmem>>, %arg6: memref<4x32x8xf32, #tpu.memory_space<vmem>>, %arg7: memref<4x1x8xf32, #tpu.memory_space<vmem>>, %arg8: memref<4x32x8xf32, #tpu.memory_space<vmem>>, %arg9: memref<4x1x8xf32, #tpu.memory_space<vmem>>, %arg10: memref<4x32x8xf32, #tpu.memory_space<vmem>>, %arg11: memref<4x1x8xf32, #tpu.memory_space<vmem>>, %arg12: memref<4x8x32xf32, #tpu.memory_space<vmem>>, %arg13: memref<1x32xf32, #tpu.memory_space<vmem>>, %arg14: memref<1x32xf32, #tpu.memory_space<vmem>>, %arg15: memref<1x32xf32, #tpu.memory_space<vmem>>, %arg16: memref<4x32x8xf32, #tpu.memory_space<vmem>>, %arg17: memref<4x1x8xf32, #tpu.memory_space<vmem>>, %arg18: memref<4x32x8xf32, #tpu.memory_space<vmem>>, %arg19: memref<4x1x8xf32, #tpu.memory_space<vmem>>, %arg20: memref<4x32x8xf32, #tpu.memory_space<vmem>>, %arg21: memref<4x1x8xf32, #tpu.memory_space<vmem>>, %arg22: memref<4x8x32xf32, #tpu.memory_space<vmem>>, %arg23: memref<1x32xf32, #tpu.memory_space<vmem>>, %arg24: memref<1x32xf32, #tpu.memory_space<vmem>>, %arg25: memref<1x32xf32, #tpu.memory_space<vmem>>, %arg26: memref<32x128xf32, #tpu.memory_space<vmem>>, %arg27: memref<1x128xf32, #tpu.memory_space<vmem>>, %arg28: memref<128x32xf32, #tpu.memory_space<vmem>>, %arg29: memref<1x32xf32, #tpu.memory_space<vmem>>, %arg30: memref<1x32xf32, #tpu.memory_space<vmem>>, %arg31: memref<1x32xf32, #tpu.memory_space<vmem>>, %arg32: memref<16x32xf32, #tpu.memory_space<vmem>>) attributes {dimension_semantics = [], scalar_prefetch = 0 : i64, scratch_operands = 0 : i64, tpu.core_type = #tpu.core_type<tc>} {
    %c0 = arith.constant 0 : index
    %c0_0 = arith.constant 0 : index
    %0 = vector.load %arg0[%c0, %c0_0] : memref<16x32xf32, #tpu.memory_space<vmem>>, vector<16x32xf32>
    %c0_1 = arith.constant 0 : index
    %c0_2 = arith.constant 0 : index
    %1 = vector.load %arg1[%c0_1, %c0_2] : memref<8x32xf32, #tpu.memory_space<vmem>>, vector<8x32xf32>
    %c0_3 = arith.constant 0 : index
    %c0_4 = arith.constant 0 : index
    %2 = vector.load %arg3[%c0_3, %c0_4] : memref<16x1xf32, #tpu.memory_space<vmem>>, vector<16x1xf32>
    %c0_5 = arith.constant 0 : index
    %c0_6 = arith.constant 0 : index
    %3 = vector.load %arg4[%c0_5, %c0_6] : memref<1x16xf32, #tpu.memory_space<vmem>>, vector<1x16xf32>
    %4 = vector.broadcast %2 : vector<16x1xf32> to vector<16x16xf32>
    %5 = vector.broadcast %3 : vector<1x16xf32> to vector<16x16xf32>
    %6 = arith.cmpf oeq, %4, %5 : vector<16x16xf32>
    %c0_7 = arith.constant 0 : index
    %c0_8 = arith.constant 0 : index
    %7 = vector.load %arg2[%c0_7, %c0_8] : memref<1x16xf32, #tpu.memory_space<vmem>>, vector<1x16xf32>
    %cst = arith.constant 5.000000e-01 : f32
    %8 = vector.broadcast %cst : f32 to vector<1x16xf32>
    %9 = arith.cmpf ogt, %7, %8 : vector<1x16xf32>
    %10 = vector.broadcast %9 : vector<1x16xi1> to vector<16x16xi1>
    %11 = arith.andi %6, %10 : vector<16x16xi1>
    %cst_9 = arith.constant 0.000000e+00 : f32
    %cst_10 = arith.constant -1.000000e+09 : f32
    %12 = vector.broadcast %cst_9 : f32 to vector<16x16xf32>
    %13 = vector.broadcast %cst_10 : f32 to vector<16x16xf32>
    %14 = arith.select %11, %12, %13 : vector<16x16xi1>, vector<16x16xf32>
    %c0_11 = arith.constant 0 : index
    %c0_12 = arith.constant 0 : index
    %c0_13 = arith.constant 0 : index
    %15 = vector.load %arg6[%c0_11, %c0_12, %c0_13] : memref<4x32x8xf32, #tpu.memory_space<vmem>>, vector<1x32x8xf32>
    %16 = vector.shape_cast %15 : vector<1x32x8xf32> to vector<32x8xf32>
    %17 = arith.truncf %0 : vector<16x32xf32> to vector<16x32xbf16>
    %18 = arith.truncf %16 : vector<32x8xf32> to vector<32x8xbf16>
    %cst_14 = arith.constant dense<0.000000e+00> : vector<16x8xf32>
    %19 = tpu.matmul %17, %18, %cst_14 {dimension_numbers = #tpu.dot_dimension_numbers<[1], [0], [0], [1], [0, 0, 1, 1], [], []>} : vector<16x32xbf16>, vector<32x8xbf16>, vector<16x8xf32> -> vector<16x8xf32>
    %c0_15 = arith.constant 0 : index
    %c0_16 = arith.constant 0 : index
    %c0_17 = arith.constant 0 : index
    %20 = vector.load %arg7[%c0_15, %c0_16, %c0_17] : memref<4x1x8xf32, #tpu.memory_space<vmem>>, vector<1x1x8xf32>
    %21 = vector.shape_cast %20 : vector<1x1x8xf32> to vector<1x8xf32>
    %22 = vector.broadcast %21 : vector<1x8xf32> to vector<16x8xf32>
    %23 = arith.addf %19, %22 : vector<16x8xf32>
    %c0_18 = arith.constant 0 : index
    %c0_19 = arith.constant 0 : index
    %c0_20 = arith.constant 0 : index
    %24 = vector.load %arg8[%c0_18, %c0_19, %c0_20] : memref<4x32x8xf32, #tpu.memory_space<vmem>>, vector<1x32x8xf32>
    %25 = vector.shape_cast %24 : vector<1x32x8xf32> to vector<32x8xf32>
    %26 = arith.truncf %0 : vector<16x32xf32> to vector<16x32xbf16>
    %27 = arith.truncf %25 : vector<32x8xf32> to vector<32x8xbf16>
    %cst_21 = arith.constant dense<0.000000e+00> : vector<16x8xf32>
    %28 = tpu.matmul %26, %27, %cst_21 {dimension_numbers = #tpu.dot_dimension_numbers<[1], [0], [0], [1], [0, 0, 1, 1], [], []>} : vector<16x32xbf16>, vector<32x8xbf16>, vector<16x8xf32> -> vector<16x8xf32>
    %c0_22 = arith.constant 0 : index
    %c0_23 = arith.constant 0 : index
    %c0_24 = arith.constant 0 : index
    %29 = vector.load %arg9[%c0_22, %c0_23, %c0_24] : memref<4x1x8xf32, #tpu.memory_space<vmem>>, vector<1x1x8xf32>
    %30 = vector.shape_cast %29 : vector<1x1x8xf32> to vector<1x8xf32>
    %31 = vector.broadcast %30 : vector<1x8xf32> to vector<16x8xf32>
    %32 = arith.addf %28, %31 : vector<16x8xf32>
    %c0_25 = arith.constant 0 : index
    %c0_26 = arith.constant 0 : index
    %c0_27 = arith.constant 0 : index
    %33 = vector.load %arg10[%c0_25, %c0_26, %c0_27] : memref<4x32x8xf32, #tpu.memory_space<vmem>>, vector<1x32x8xf32>
    %34 = vector.shape_cast %33 : vector<1x32x8xf32> to vector<32x8xf32>
    %35 = arith.truncf %0 : vector<16x32xf32> to vector<16x32xbf16>
    %36 = arith.truncf %34 : vector<32x8xf32> to vector<32x8xbf16>
    %cst_28 = arith.constant dense<0.000000e+00> : vector<16x8xf32>
    %37 = tpu.matmul %35, %36, %cst_28 {dimension_numbers = #tpu.dot_dimension_numbers<[1], [0], [0], [1], [0, 0, 1, 1], [], []>} : vector<16x32xbf16>, vector<32x8xbf16>, vector<16x8xf32> -> vector<16x8xf32>
    %c0_29 = arith.constant 0 : index
    %c0_30 = arith.constant 0 : index
    %c0_31 = arith.constant 0 : index
    %38 = vector.load %arg11[%c0_29, %c0_30, %c0_31] : memref<4x1x8xf32, #tpu.memory_space<vmem>>, vector<1x1x8xf32>
    %39 = vector.shape_cast %38 : vector<1x1x8xf32> to vector<1x8xf32>
    %40 = vector.broadcast %39 : vector<1x8xf32> to vector<16x8xf32>
    %41 = arith.addf %37, %40 : vector<16x8xf32>
    %42 = arith.truncf %23 : vector<16x8xf32> to vector<16x8xbf16>
    %43 = arith.truncf %32 : vector<16x8xf32> to vector<16x8xbf16>
    %cst_32 = arith.constant dense<0.000000e+00> : vector<16x16xf32>
    %44 = tpu.matmul %42, %43, %cst_32 {dimension_numbers = #tpu.dot_dimension_numbers<[1], [1], [0], [0], [0, 0, 1, 0], [], []>} : vector<16x8xbf16>, vector<16x8xbf16>, vector<16x16xf32> -> vector<16x16xf32>
    %cst_33 = arith.constant 0.353553385 : f32
    %45 = vector.broadcast %cst_33 : f32 to vector<16x16xf32>
    %46 = arith.mulf %44, %45 : vector<16x16xf32>
    %47 = arith.addf %46, %14 : vector<16x16xf32>
    %cst_34 = arith.constant dense<0xFF800000> : vector<16xf32>
    %48 = vector.multi_reduction <maximumf>, %47, %cst_34 [1] : vector<16x16xf32> to vector<16xf32>
    %49 = vector.shape_cast %48 : vector<16xf32> to vector<16x1xf32>
    %50 = vector.broadcast %49 : vector<16x1xf32> to vector<16x16xf32>
    %51 = arith.subf %47, %50 : vector<16x16xf32>
    %52 = math.exp %51 : vector<16x16xf32>
    %cst_35 = arith.constant dense<0.000000e+00> : vector<16xf32>
    %53 = vector.multi_reduction <add>, %52, %cst_35 [1] : vector<16x16xf32> to vector<16xf32>
    %54 = vector.shape_cast %53 : vector<16xf32> to vector<16x1xf32>
    %55 = tpu.reciprocal %54 {approx = true} : vector<16x1xf32> -> vector<16x1xf32>
    %56 = vector.broadcast %55 : vector<16x1xf32> to vector<16x16xf32>
    %57 = arith.mulf %52, %56 : vector<16x16xf32>
    %58 = arith.truncf %57 : vector<16x16xf32> to vector<16x16xbf16>
    %59 = arith.truncf %41 : vector<16x8xf32> to vector<16x8xbf16>
    %cst_36 = arith.constant dense<0.000000e+00> : vector<16x8xf32>
    %60 = tpu.matmul %58, %59, %cst_36 {dimension_numbers = #tpu.dot_dimension_numbers<[1], [0], [0], [1], [0, 0, 1, 1], [], []>} : vector<16x16xbf16>, vector<16x8xbf16>, vector<16x8xf32> -> vector<16x8xf32>
    %c0_37 = arith.constant 0 : index
    %c0_38 = arith.constant 0 : index
    %c0_39 = arith.constant 0 : index
    %61 = vector.load %arg12[%c0_37, %c0_38, %c0_39] : memref<4x8x32xf32, #tpu.memory_space<vmem>>, vector<1x8x32xf32>
    %62 = vector.shape_cast %61 : vector<1x8x32xf32> to vector<8x32xf32>
    %63 = arith.truncf %60 : vector<16x8xf32> to vector<16x8xbf16>
    %64 = arith.truncf %62 : vector<8x32xf32> to vector<8x32xbf16>
    %cst_40 = arith.constant dense<0.000000e+00> : vector<16x32xf32>
    %65 = tpu.matmul %63, %64, %cst_40 {dimension_numbers = #tpu.dot_dimension_numbers<[1], [0], [0], [1], [0, 0, 1, 1], [], []>} : vector<16x8xbf16>, vector<8x32xbf16>, vector<16x32xf32> -> vector<16x32xf32>
    %c1 = arith.constant 1 : index
    %c0_41 = arith.constant 0 : index
    %c0_42 = arith.constant 0 : index
    %66 = vector.load %arg6[%c1, %c0_41, %c0_42] : memref<4x32x8xf32, #tpu.memory_space<vmem>>, vector<1x32x8xf32>
    %67 = vector.shape_cast %66 : vector<1x32x8xf32> to vector<32x8xf32>
    %68 = arith.truncf %0 : vector<16x32xf32> to vector<16x32xbf16>
    %69 = arith.truncf %67 : vector<32x8xf32> to vector<32x8xbf16>
    %cst_43 = arith.constant dense<0.000000e+00> : vector<16x8xf32>
    %70 = tpu.matmul %68, %69, %cst_43 {dimension_numbers = #tpu.dot_dimension_numbers<[1], [0], [0], [1], [0, 0, 1, 1], [], []>} : vector<16x32xbf16>, vector<32x8xbf16>, vector<16x8xf32> -> vector<16x8xf32>
    %c1_44 = arith.constant 1 : index
    %c0_45 = arith.constant 0 : index
    %c0_46 = arith.constant 0 : index
    %71 = vector.load %arg7[%c1_44, %c0_45, %c0_46] : memref<4x1x8xf32, #tpu.memory_space<vmem>>, vector<1x1x8xf32>
    %72 = vector.shape_cast %71 : vector<1x1x8xf32> to vector<1x8xf32>
    %73 = vector.broadcast %72 : vector<1x8xf32> to vector<16x8xf32>
    %74 = arith.addf %70, %73 : vector<16x8xf32>
    %c1_47 = arith.constant 1 : index
    %c0_48 = arith.constant 0 : index
    %c0_49 = arith.constant 0 : index
    %75 = vector.load %arg8[%c1_47, %c0_48, %c0_49] : memref<4x32x8xf32, #tpu.memory_space<vmem>>, vector<1x32x8xf32>
    %76 = vector.shape_cast %75 : vector<1x32x8xf32> to vector<32x8xf32>
    %77 = arith.truncf %0 : vector<16x32xf32> to vector<16x32xbf16>
    %78 = arith.truncf %76 : vector<32x8xf32> to vector<32x8xbf16>
    %cst_50 = arith.constant dense<0.000000e+00> : vector<16x8xf32>
    %79 = tpu.matmul %77, %78, %cst_50 {dimension_numbers = #tpu.dot_dimension_numbers<[1], [0], [0], [1], [0, 0, 1, 1], [], []>} : vector<16x32xbf16>, vector<32x8xbf16>, vector<16x8xf32> -> vector<16x8xf32>
    %c1_51 = arith.constant 1 : index
    %c0_52 = arith.constant 0 : index
    %c0_53 = arith.constant 0 : index
    %80 = vector.load %arg9[%c1_51, %c0_52, %c0_53] : memref<4x1x8xf32, #tpu.memory_space<vmem>>, vector<1x1x8xf32>
    %81 = vector.shape_cast %80 : vector<1x1x8xf32> to vector<1x8xf32>
    %82 = vector.broadcast %81 : vector<1x8xf32> to vector<16x8xf32>
    %83 = arith.addf %79, %82 : vector<16x8xf32>
    %c1_54 = arith.constant 1 : index
    %c0_55 = arith.constant 0 : index
    %c0_56 = arith.constant 0 : index
    %84 = vector.load %arg10[%c1_54, %c0_55, %c0_56] : memref<4x32x8xf32, #tpu.memory_space<vmem>>, vector<1x32x8xf32>
    %85 = vector.shape_cast %84 : vector<1x32x8xf32> to vector<32x8xf32>
    %86 = arith.truncf %0 : vector<16x32xf32> to vector<16x32xbf16>
    %87 = arith.truncf %85 : vector<32x8xf32> to vector<32x8xbf16>
    %cst_57 = arith.constant dense<0.000000e+00> : vector<16x8xf32>
    %88 = tpu.matmul %86, %87, %cst_57 {dimension_numbers = #tpu.dot_dimension_numbers<[1], [0], [0], [1], [0, 0, 1, 1], [], []>} : vector<16x32xbf16>, vector<32x8xbf16>, vector<16x8xf32> -> vector<16x8xf32>
    %c1_58 = arith.constant 1 : index
    %c0_59 = arith.constant 0 : index
    %c0_60 = arith.constant 0 : index
    %89 = vector.load %arg11[%c1_58, %c0_59, %c0_60] : memref<4x1x8xf32, #tpu.memory_space<vmem>>, vector<1x1x8xf32>
    %90 = vector.shape_cast %89 : vector<1x1x8xf32> to vector<1x8xf32>
    %91 = vector.broadcast %90 : vector<1x8xf32> to vector<16x8xf32>
    %92 = arith.addf %88, %91 : vector<16x8xf32>
    %93 = arith.truncf %74 : vector<16x8xf32> to vector<16x8xbf16>
    %94 = arith.truncf %83 : vector<16x8xf32> to vector<16x8xbf16>
    %cst_61 = arith.constant dense<0.000000e+00> : vector<16x16xf32>
    %95 = tpu.matmul %93, %94, %cst_61 {dimension_numbers = #tpu.dot_dimension_numbers<[1], [1], [0], [0], [0, 0, 1, 0], [], []>} : vector<16x8xbf16>, vector<16x8xbf16>, vector<16x16xf32> -> vector<16x16xf32>
    %cst_62 = arith.constant 0.353553385 : f32
    %96 = vector.broadcast %cst_62 : f32 to vector<16x16xf32>
    %97 = arith.mulf %95, %96 : vector<16x16xf32>
    %98 = arith.addf %97, %14 : vector<16x16xf32>
    %cst_63 = arith.constant dense<0xFF800000> : vector<16xf32>
    %99 = vector.multi_reduction <maximumf>, %98, %cst_63 [1] : vector<16x16xf32> to vector<16xf32>
    %100 = vector.shape_cast %99 : vector<16xf32> to vector<16x1xf32>
    %101 = vector.broadcast %100 : vector<16x1xf32> to vector<16x16xf32>
    %102 = arith.subf %98, %101 : vector<16x16xf32>
    %103 = math.exp %102 : vector<16x16xf32>
    %cst_64 = arith.constant dense<0.000000e+00> : vector<16xf32>
    %104 = vector.multi_reduction <add>, %103, %cst_64 [1] : vector<16x16xf32> to vector<16xf32>
    %105 = vector.shape_cast %104 : vector<16xf32> to vector<16x1xf32>
    %106 = tpu.reciprocal %105 {approx = true} : vector<16x1xf32> -> vector<16x1xf32>
    %107 = vector.broadcast %106 : vector<16x1xf32> to vector<16x16xf32>
    %108 = arith.mulf %103, %107 : vector<16x16xf32>
    %109 = arith.truncf %108 : vector<16x16xf32> to vector<16x16xbf16>
    %110 = arith.truncf %92 : vector<16x8xf32> to vector<16x8xbf16>
    %cst_65 = arith.constant dense<0.000000e+00> : vector<16x8xf32>
    %111 = tpu.matmul %109, %110, %cst_65 {dimension_numbers = #tpu.dot_dimension_numbers<[1], [0], [0], [1], [0, 0, 1, 1], [], []>} : vector<16x16xbf16>, vector<16x8xbf16>, vector<16x8xf32> -> vector<16x8xf32>
    %c1_66 = arith.constant 1 : index
    %c0_67 = arith.constant 0 : index
    %c0_68 = arith.constant 0 : index
    %112 = vector.load %arg12[%c1_66, %c0_67, %c0_68] : memref<4x8x32xf32, #tpu.memory_space<vmem>>, vector<1x8x32xf32>
    %113 = vector.shape_cast %112 : vector<1x8x32xf32> to vector<8x32xf32>
    %114 = arith.truncf %111 : vector<16x8xf32> to vector<16x8xbf16>
    %115 = arith.truncf %113 : vector<8x32xf32> to vector<8x32xbf16>
    %cst_69 = arith.constant dense<0.000000e+00> : vector<16x32xf32>
    %116 = tpu.matmul %114, %115, %cst_69 {dimension_numbers = #tpu.dot_dimension_numbers<[1], [0], [0], [1], [0, 0, 1, 1], [], []>} : vector<16x8xbf16>, vector<8x32xbf16>, vector<16x32xf32> -> vector<16x32xf32>
    %117 = arith.addf %65, %116 : vector<16x32xf32>
    %c2 = arith.constant 2 : index
    %c0_70 = arith.constant 0 : index
    %c0_71 = arith.constant 0 : index
    %118 = vector.load %arg6[%c2, %c0_70, %c0_71] : memref<4x32x8xf32, #tpu.memory_space<vmem>>, vector<1x32x8xf32>
    %119 = vector.shape_cast %118 : vector<1x32x8xf32> to vector<32x8xf32>
    %120 = arith.truncf %0 : vector<16x32xf32> to vector<16x32xbf16>
    %121 = arith.truncf %119 : vector<32x8xf32> to vector<32x8xbf16>
    %cst_72 = arith.constant dense<0.000000e+00> : vector<16x8xf32>
    %122 = tpu.matmul %120, %121, %cst_72 {dimension_numbers = #tpu.dot_dimension_numbers<[1], [0], [0], [1], [0, 0, 1, 1], [], []>} : vector<16x32xbf16>, vector<32x8xbf16>, vector<16x8xf32> -> vector<16x8xf32>
    %c2_73 = arith.constant 2 : index
    %c0_74 = arith.constant 0 : index
    %c0_75 = arith.constant 0 : index
    %123 = vector.load %arg7[%c2_73, %c0_74, %c0_75] : memref<4x1x8xf32, #tpu.memory_space<vmem>>, vector<1x1x8xf32>
    %124 = vector.shape_cast %123 : vector<1x1x8xf32> to vector<1x8xf32>
    %125 = vector.broadcast %124 : vector<1x8xf32> to vector<16x8xf32>
    %126 = arith.addf %122, %125 : vector<16x8xf32>
    %c2_76 = arith.constant 2 : index
    %c0_77 = arith.constant 0 : index
    %c0_78 = arith.constant 0 : index
    %127 = vector.load %arg8[%c2_76, %c0_77, %c0_78] : memref<4x32x8xf32, #tpu.memory_space<vmem>>, vector<1x32x8xf32>
    %128 = vector.shape_cast %127 : vector<1x32x8xf32> to vector<32x8xf32>
    %129 = arith.truncf %0 : vector<16x32xf32> to vector<16x32xbf16>
    %130 = arith.truncf %128 : vector<32x8xf32> to vector<32x8xbf16>
    %cst_79 = arith.constant dense<0.000000e+00> : vector<16x8xf32>
    %131 = tpu.matmul %129, %130, %cst_79 {dimension_numbers = #tpu.dot_dimension_numbers<[1], [0], [0], [1], [0, 0, 1, 1], [], []>} : vector<16x32xbf16>, vector<32x8xbf16>, vector<16x8xf32> -> vector<16x8xf32>
    %c2_80 = arith.constant 2 : index
    %c0_81 = arith.constant 0 : index
    %c0_82 = arith.constant 0 : index
    %132 = vector.load %arg9[%c2_80, %c0_81, %c0_82] : memref<4x1x8xf32, #tpu.memory_space<vmem>>, vector<1x1x8xf32>
    %133 = vector.shape_cast %132 : vector<1x1x8xf32> to vector<1x8xf32>
    %134 = vector.broadcast %133 : vector<1x8xf32> to vector<16x8xf32>
    %135 = arith.addf %131, %134 : vector<16x8xf32>
    %c2_83 = arith.constant 2 : index
    %c0_84 = arith.constant 0 : index
    %c0_85 = arith.constant 0 : index
    %136 = vector.load %arg10[%c2_83, %c0_84, %c0_85] : memref<4x32x8xf32, #tpu.memory_space<vmem>>, vector<1x32x8xf32>
    %137 = vector.shape_cast %136 : vector<1x32x8xf32> to vector<32x8xf32>
    %138 = arith.truncf %0 : vector<16x32xf32> to vector<16x32xbf16>
    %139 = arith.truncf %137 : vector<32x8xf32> to vector<32x8xbf16>
    %cst_86 = arith.constant dense<0.000000e+00> : vector<16x8xf32>
    %140 = tpu.matmul %138, %139, %cst_86 {dimension_numbers = #tpu.dot_dimension_numbers<[1], [0], [0], [1], [0, 0, 1, 1], [], []>} : vector<16x32xbf16>, vector<32x8xbf16>, vector<16x8xf32> -> vector<16x8xf32>
    %c2_87 = arith.constant 2 : index
    %c0_88 = arith.constant 0 : index
    %c0_89 = arith.constant 0 : index
    %141 = vector.load %arg11[%c2_87, %c0_88, %c0_89] : memref<4x1x8xf32, #tpu.memory_space<vmem>>, vector<1x1x8xf32>
    %142 = vector.shape_cast %141 : vector<1x1x8xf32> to vector<1x8xf32>
    %143 = vector.broadcast %142 : vector<1x8xf32> to vector<16x8xf32>
    %144 = arith.addf %140, %143 : vector<16x8xf32>
    %145 = arith.truncf %126 : vector<16x8xf32> to vector<16x8xbf16>
    %146 = arith.truncf %135 : vector<16x8xf32> to vector<16x8xbf16>
    %cst_90 = arith.constant dense<0.000000e+00> : vector<16x16xf32>
    %147 = tpu.matmul %145, %146, %cst_90 {dimension_numbers = #tpu.dot_dimension_numbers<[1], [1], [0], [0], [0, 0, 1, 0], [], []>} : vector<16x8xbf16>, vector<16x8xbf16>, vector<16x16xf32> -> vector<16x16xf32>
    %cst_91 = arith.constant 0.353553385 : f32
    %148 = vector.broadcast %cst_91 : f32 to vector<16x16xf32>
    %149 = arith.mulf %147, %148 : vector<16x16xf32>
    %150 = arith.addf %149, %14 : vector<16x16xf32>
    %cst_92 = arith.constant dense<0xFF800000> : vector<16xf32>
    %151 = vector.multi_reduction <maximumf>, %150, %cst_92 [1] : vector<16x16xf32> to vector<16xf32>
    %152 = vector.shape_cast %151 : vector<16xf32> to vector<16x1xf32>
    %153 = vector.broadcast %152 : vector<16x1xf32> to vector<16x16xf32>
    %154 = arith.subf %150, %153 : vector<16x16xf32>
    %155 = math.exp %154 : vector<16x16xf32>
    %cst_93 = arith.constant dense<0.000000e+00> : vector<16xf32>
    %156 = vector.multi_reduction <add>, %155, %cst_93 [1] : vector<16x16xf32> to vector<16xf32>
    %157 = vector.shape_cast %156 : vector<16xf32> to vector<16x1xf32>
    %158 = tpu.reciprocal %157 {approx = true} : vector<16x1xf32> -> vector<16x1xf32>
    %159 = vector.broadcast %158 : vector<16x1xf32> to vector<16x16xf32>
    %160 = arith.mulf %155, %159 : vector<16x16xf32>
    %161 = arith.truncf %160 : vector<16x16xf32> to vector<16x16xbf16>
    %162 = arith.truncf %144 : vector<16x8xf32> to vector<16x8xbf16>
    %cst_94 = arith.constant dense<0.000000e+00> : vector<16x8xf32>
    %163 = tpu.matmul %161, %162, %cst_94 {dimension_numbers = #tpu.dot_dimension_numbers<[1], [0], [0], [1], [0, 0, 1, 1], [], []>} : vector<16x16xbf16>, vector<16x8xbf16>, vector<16x8xf32> -> vector<16x8xf32>
    %c2_95 = arith.constant 2 : index
    %c0_96 = arith.constant 0 : index
    %c0_97 = arith.constant 0 : index
    %164 = vector.load %arg12[%c2_95, %c0_96, %c0_97] : memref<4x8x32xf32, #tpu.memory_space<vmem>>, vector<1x8x32xf32>
    %165 = vector.shape_cast %164 : vector<1x8x32xf32> to vector<8x32xf32>
    %166 = arith.truncf %163 : vector<16x8xf32> to vector<16x8xbf16>
    %167 = arith.truncf %165 : vector<8x32xf32> to vector<8x32xbf16>
    %cst_98 = arith.constant dense<0.000000e+00> : vector<16x32xf32>
    %168 = tpu.matmul %166, %167, %cst_98 {dimension_numbers = #tpu.dot_dimension_numbers<[1], [0], [0], [1], [0, 0, 1, 1], [], []>} : vector<16x8xbf16>, vector<8x32xbf16>, vector<16x32xf32> -> vector<16x32xf32>
    %169 = arith.addf %117, %168 : vector<16x32xf32>
    %c3 = arith.constant 3 : index
    %c0_99 = arith.constant 0 : index
    %c0_100 = arith.constant 0 : index
    %170 = vector.load %arg6[%c3, %c0_99, %c0_100] : memref<4x32x8xf32, #tpu.memory_space<vmem>>, vector<1x32x8xf32>
    %171 = vector.shape_cast %170 : vector<1x32x8xf32> to vector<32x8xf32>
    %172 = arith.truncf %0 : vector<16x32xf32> to vector<16x32xbf16>
    %173 = arith.truncf %171 : vector<32x8xf32> to vector<32x8xbf16>
    %cst_101 = arith.constant dense<0.000000e+00> : vector<16x8xf32>
    %174 = tpu.matmul %172, %173, %cst_101 {dimension_numbers = #tpu.dot_dimension_numbers<[1], [0], [0], [1], [0, 0, 1, 1], [], []>} : vector<16x32xbf16>, vector<32x8xbf16>, vector<16x8xf32> -> vector<16x8xf32>
    %c3_102 = arith.constant 3 : index
    %c0_103 = arith.constant 0 : index
    %c0_104 = arith.constant 0 : index
    %175 = vector.load %arg7[%c3_102, %c0_103, %c0_104] : memref<4x1x8xf32, #tpu.memory_space<vmem>>, vector<1x1x8xf32>
    %176 = vector.shape_cast %175 : vector<1x1x8xf32> to vector<1x8xf32>
    %177 = vector.broadcast %176 : vector<1x8xf32> to vector<16x8xf32>
    %178 = arith.addf %174, %177 : vector<16x8xf32>
    %c3_105 = arith.constant 3 : index
    %c0_106 = arith.constant 0 : index
    %c0_107 = arith.constant 0 : index
    %179 = vector.load %arg8[%c3_105, %c0_106, %c0_107] : memref<4x32x8xf32, #tpu.memory_space<vmem>>, vector<1x32x8xf32>
    %180 = vector.shape_cast %179 : vector<1x32x8xf32> to vector<32x8xf32>
    %181 = arith.truncf %0 : vector<16x32xf32> to vector<16x32xbf16>
    %182 = arith.truncf %180 : vector<32x8xf32> to vector<32x8xbf16>
    %cst_108 = arith.constant dense<0.000000e+00> : vector<16x8xf32>
    %183 = tpu.matmul %181, %182, %cst_108 {dimension_numbers = #tpu.dot_dimension_numbers<[1], [0], [0], [1], [0, 0, 1, 1], [], []>} : vector<16x32xbf16>, vector<32x8xbf16>, vector<16x8xf32> -> vector<16x8xf32>
    %c3_109 = arith.constant 3 : index
    %c0_110 = arith.constant 0 : index
    %c0_111 = arith.constant 0 : index
    %184 = vector.load %arg9[%c3_109, %c0_110, %c0_111] : memref<4x1x8xf32, #tpu.memory_space<vmem>>, vector<1x1x8xf32>
    %185 = vector.shape_cast %184 : vector<1x1x8xf32> to vector<1x8xf32>
    %186 = vector.broadcast %185 : vector<1x8xf32> to vector<16x8xf32>
    %187 = arith.addf %183, %186 : vector<16x8xf32>
    %c3_112 = arith.constant 3 : index
    %c0_113 = arith.constant 0 : index
    %c0_114 = arith.constant 0 : index
    %188 = vector.load %arg10[%c3_112, %c0_113, %c0_114] : memref<4x32x8xf32, #tpu.memory_space<vmem>>, vector<1x32x8xf32>
    %189 = vector.shape_cast %188 : vector<1x32x8xf32> to vector<32x8xf32>
    %190 = arith.truncf %0 : vector<16x32xf32> to vector<16x32xbf16>
    %191 = arith.truncf %189 : vector<32x8xf32> to vector<32x8xbf16>
    %cst_115 = arith.constant dense<0.000000e+00> : vector<16x8xf32>
    %192 = tpu.matmul %190, %191, %cst_115 {dimension_numbers = #tpu.dot_dimension_numbers<[1], [0], [0], [1], [0, 0, 1, 1], [], []>} : vector<16x32xbf16>, vector<32x8xbf16>, vector<16x8xf32> -> vector<16x8xf32>
    %c3_116 = arith.constant 3 : index
    %c0_117 = arith.constant 0 : index
    %c0_118 = arith.constant 0 : index
    %193 = vector.load %arg11[%c3_116, %c0_117, %c0_118] : memref<4x1x8xf32, #tpu.memory_space<vmem>>, vector<1x1x8xf32>
    %194 = vector.shape_cast %193 : vector<1x1x8xf32> to vector<1x8xf32>
    %195 = vector.broadcast %194 : vector<1x8xf32> to vector<16x8xf32>
    %196 = arith.addf %192, %195 : vector<16x8xf32>
    %197 = arith.truncf %178 : vector<16x8xf32> to vector<16x8xbf16>
    %198 = arith.truncf %187 : vector<16x8xf32> to vector<16x8xbf16>
    %cst_119 = arith.constant dense<0.000000e+00> : vector<16x16xf32>
    %199 = tpu.matmul %197, %198, %cst_119 {dimension_numbers = #tpu.dot_dimension_numbers<[1], [1], [0], [0], [0, 0, 1, 0], [], []>} : vector<16x8xbf16>, vector<16x8xbf16>, vector<16x16xf32> -> vector<16x16xf32>
    %cst_120 = arith.constant 0.353553385 : f32
    %200 = vector.broadcast %cst_120 : f32 to vector<16x16xf32>
    %201 = arith.mulf %199, %200 : vector<16x16xf32>
    %202 = arith.addf %201, %14 : vector<16x16xf32>
    %cst_121 = arith.constant dense<0xFF800000> : vector<16xf32>
    %203 = vector.multi_reduction <maximumf>, %202, %cst_121 [1] : vector<16x16xf32> to vector<16xf32>
    %204 = vector.shape_cast %203 : vector<16xf32> to vector<16x1xf32>
    %205 = vector.broadcast %204 : vector<16x1xf32> to vector<16x16xf32>
    %206 = arith.subf %202, %205 : vector<16x16xf32>
    %207 = math.exp %206 : vector<16x16xf32>
    %cst_122 = arith.constant dense<0.000000e+00> : vector<16xf32>
    %208 = vector.multi_reduction <add>, %207, %cst_122 [1] : vector<16x16xf32> to vector<16xf32>
    %209 = vector.shape_cast %208 : vector<16xf32> to vector<16x1xf32>
    %210 = tpu.reciprocal %209 {approx = true} : vector<16x1xf32> -> vector<16x1xf32>
    %211 = vector.broadcast %210 : vector<16x1xf32> to vector<16x16xf32>
    %212 = arith.mulf %207, %211 : vector<16x16xf32>
    %213 = arith.truncf %212 : vector<16x16xf32> to vector<16x16xbf16>
    %214 = arith.truncf %196 : vector<16x8xf32> to vector<16x8xbf16>
    %cst_123 = arith.constant dense<0.000000e+00> : vector<16x8xf32>
    %215 = tpu.matmul %213, %214, %cst_123 {dimension_numbers = #tpu.dot_dimension_numbers<[1], [0], [0], [1], [0, 0, 1, 1], [], []>} : vector<16x16xbf16>, vector<16x8xbf16>, vector<16x8xf32> -> vector<16x8xf32>
    %c3_124 = arith.constant 3 : index
    %c0_125 = arith.constant 0 : index
    %c0_126 = arith.constant 0 : index
    %216 = vector.load %arg12[%c3_124, %c0_125, %c0_126] : memref<4x8x32xf32, #tpu.memory_space<vmem>>, vector<1x8x32xf32>
    %217 = vector.shape_cast %216 : vector<1x8x32xf32> to vector<8x32xf32>
    %218 = arith.truncf %215 : vector<16x8xf32> to vector<16x8xbf16>
    %219 = arith.truncf %217 : vector<8x32xf32> to vector<8x32xbf16>
    %cst_127 = arith.constant dense<0.000000e+00> : vector<16x32xf32>
    %220 = tpu.matmul %218, %219, %cst_127 {dimension_numbers = #tpu.dot_dimension_numbers<[1], [0], [0], [1], [0, 0, 1, 1], [], []>} : vector<16x8xbf16>, vector<8x32xbf16>, vector<16x32xf32> -> vector<16x32xf32>
    %221 = arith.addf %169, %220 : vector<16x32xf32>
    %c0_128 = arith.constant 0 : index
    %c0_129 = arith.constant 0 : index
    %222 = vector.load %arg13[%c0_128, %c0_129] : memref<1x32xf32, #tpu.memory_space<vmem>>, vector<1x32xf32>
    %223 = vector.broadcast %222 : vector<1x32xf32> to vector<16x32xf32>
    %224 = arith.addf %221, %223 : vector<16x32xf32>
    %225 = arith.addf %0, %224 : vector<16x32xf32>
    %c0_130 = arith.constant 0 : index
    %c0_131 = arith.constant 0 : index
    %226 = vector.load %arg14[%c0_130, %c0_131] : memref<1x32xf32, #tpu.memory_space<vmem>>, vector<1x32xf32>
    %c0_132 = arith.constant 0 : index
    %c0_133 = arith.constant 0 : index
    %227 = vector.load %arg15[%c0_132, %c0_133] : memref<1x32xf32, #tpu.memory_space<vmem>>, vector<1x32xf32>
    %cst_134 = arith.constant dense<0.000000e+00> : vector<16xf32>
    %228 = vector.multi_reduction <add>, %225, %cst_134 [1] : vector<16x32xf32> to vector<16xf32>
    %229 = vector.shape_cast %228 : vector<16xf32> to vector<16x1xf32>
    %230 = arith.mulf %225, %225 : vector<16x32xf32>
    %cst_135 = arith.constant dense<0.000000e+00> : vector<16xf32>
    %231 = vector.multi_reduction <add>, %230, %cst_135 [1] : vector<16x32xf32> to vector<16xf32>
    %232 = vector.shape_cast %231 : vector<16xf32> to vector<16x1xf32>
    %cst_136 = arith.constant 3.125000e-02 : f32
    %233 = vector.broadcast %cst_136 : f32 to vector<16x1xf32>
    %234 = arith.mulf %229, %233 : vector<16x1xf32>
    %cst_137 = arith.constant 3.125000e-02 : f32
    %235 = vector.broadcast %cst_137 : f32 to vector<16x1xf32>
    %236 = arith.mulf %232, %235 : vector<16x1xf32>
    %237 = arith.mulf %234, %234 : vector<16x1xf32>
    %238 = arith.subf %236, %237 : vector<16x1xf32>
    %239 = vector.broadcast %234 : vector<16x1xf32> to vector<16x32xf32>
    %240 = arith.subf %225, %239 : vector<16x32xf32>
    %cst_138 = arith.constant 9.99999974E-6 : f32
    %241 = vector.broadcast %cst_138 : f32 to vector<16x1xf32>
    %242 = arith.addf %238, %241 : vector<16x1xf32>
    %243 = math.rsqrt %242 : vector<16x1xf32>
    %244 = vector.broadcast %243 : vector<16x1xf32> to vector<16x32xf32>
    %245 = arith.mulf %240, %244 : vector<16x32xf32>
    %246 = vector.broadcast %226 : vector<1x32xf32> to vector<16x32xf32>
    %247 = arith.mulf %245, %246 : vector<16x32xf32>
    %248 = vector.broadcast %227 : vector<1x32xf32> to vector<16x32xf32>
    %249 = arith.addf %247, %248 : vector<16x32xf32>
    %c0_139 = arith.constant 0 : index
    %c0_140 = arith.constant 0 : index
    %250 = vector.load %arg3[%c0_139, %c0_140] : memref<16x1xf32, #tpu.memory_space<vmem>>, vector<16x1xf32>
    %c0_141 = arith.constant 0 : index
    %c0_142 = arith.constant 0 : index
    %251 = vector.load %arg5[%c0_141, %c0_142] : memref<1x8xf32, #tpu.memory_space<vmem>>, vector<1x8xf32>
    %252 = vector.broadcast %250 : vector<16x1xf32> to vector<16x8xf32>
    %253 = vector.broadcast %251 : vector<1x8xf32> to vector<16x8xf32>
    %254 = arith.cmpf oeq, %252, %253 : vector<16x8xf32>
    %cst_143 = arith.constant 0.000000e+00 : f32
    %cst_144 = arith.constant -1.000000e+09 : f32
    %255 = vector.broadcast %cst_143 : f32 to vector<16x8xf32>
    %256 = vector.broadcast %cst_144 : f32 to vector<16x8xf32>
    %257 = arith.select %254, %255, %256 : vector<16x8xi1>, vector<16x8xf32>
    %c0_145 = arith.constant 0 : index
    %c0_146 = arith.constant 0 : index
    %c0_147 = arith.constant 0 : index
    %258 = vector.load %arg16[%c0_145, %c0_146, %c0_147] : memref<4x32x8xf32, #tpu.memory_space<vmem>>, vector<1x32x8xf32>
    %259 = vector.shape_cast %258 : vector<1x32x8xf32> to vector<32x8xf32>
    %260 = arith.truncf %249 : vector<16x32xf32> to vector<16x32xbf16>
    %261 = arith.truncf %259 : vector<32x8xf32> to vector<32x8xbf16>
    %cst_148 = arith.constant dense<0.000000e+00> : vector<16x8xf32>
    %262 = tpu.matmul %260, %261, %cst_148 {dimension_numbers = #tpu.dot_dimension_numbers<[1], [0], [0], [1], [0, 0, 1, 1], [], []>} : vector<16x32xbf16>, vector<32x8xbf16>, vector<16x8xf32> -> vector<16x8xf32>
    %c0_149 = arith.constant 0 : index
    %c0_150 = arith.constant 0 : index
    %c0_151 = arith.constant 0 : index
    %263 = vector.load %arg17[%c0_149, %c0_150, %c0_151] : memref<4x1x8xf32, #tpu.memory_space<vmem>>, vector<1x1x8xf32>
    %264 = vector.shape_cast %263 : vector<1x1x8xf32> to vector<1x8xf32>
    %265 = vector.broadcast %264 : vector<1x8xf32> to vector<16x8xf32>
    %266 = arith.addf %262, %265 : vector<16x8xf32>
    %c0_152 = arith.constant 0 : index
    %c0_153 = arith.constant 0 : index
    %c0_154 = arith.constant 0 : index
    %267 = vector.load %arg18[%c0_152, %c0_153, %c0_154] : memref<4x32x8xf32, #tpu.memory_space<vmem>>, vector<1x32x8xf32>
    %268 = vector.shape_cast %267 : vector<1x32x8xf32> to vector<32x8xf32>
    %269 = arith.truncf %1 : vector<8x32xf32> to vector<8x32xbf16>
    %270 = arith.truncf %268 : vector<32x8xf32> to vector<32x8xbf16>
    %cst_155 = arith.constant dense<0.000000e+00> : vector<8x8xf32>
    %271 = tpu.matmul %269, %270, %cst_155 {dimension_numbers = #tpu.dot_dimension_numbers<[1], [0], [0], [1], [0, 0, 1, 1], [], []>} : vector<8x32xbf16>, vector<32x8xbf16>, vector<8x8xf32> -> vector<8x8xf32>
    %c0_156 = arith.constant 0 : index
    %c0_157 = arith.constant 0 : index
    %c0_158 = arith.constant 0 : index
    %272 = vector.load %arg19[%c0_156, %c0_157, %c0_158] : memref<4x1x8xf32, #tpu.memory_space<vmem>>, vector<1x1x8xf32>
    %273 = vector.shape_cast %272 : vector<1x1x8xf32> to vector<1x8xf32>
    %274 = vector.broadcast %273 : vector<1x8xf32> to vector<8x8xf32>
    %275 = arith.addf %271, %274 : vector<8x8xf32>
    %c0_159 = arith.constant 0 : index
    %c0_160 = arith.constant 0 : index
    %c0_161 = arith.constant 0 : index
    %276 = vector.load %arg20[%c0_159, %c0_160, %c0_161] : memref<4x32x8xf32, #tpu.memory_space<vmem>>, vector<1x32x8xf32>
    %277 = vector.shape_cast %276 : vector<1x32x8xf32> to vector<32x8xf32>
    %278 = arith.truncf %1 : vector<8x32xf32> to vector<8x32xbf16>
    %279 = arith.truncf %277 : vector<32x8xf32> to vector<32x8xbf16>
    %cst_162 = arith.constant dense<0.000000e+00> : vector<8x8xf32>
    %280 = tpu.matmul %278, %279, %cst_162 {dimension_numbers = #tpu.dot_dimension_numbers<[1], [0], [0], [1], [0, 0, 1, 1], [], []>} : vector<8x32xbf16>, vector<32x8xbf16>, vector<8x8xf32> -> vector<8x8xf32>
    %c0_163 = arith.constant 0 : index
    %c0_164 = arith.constant 0 : index
    %c0_165 = arith.constant 0 : index
    %281 = vector.load %arg21[%c0_163, %c0_164, %c0_165] : memref<4x1x8xf32, #tpu.memory_space<vmem>>, vector<1x1x8xf32>
    %282 = vector.shape_cast %281 : vector<1x1x8xf32> to vector<1x8xf32>
    %283 = vector.broadcast %282 : vector<1x8xf32> to vector<8x8xf32>
    %284 = arith.addf %280, %283 : vector<8x8xf32>
    %285 = arith.truncf %266 : vector<16x8xf32> to vector<16x8xbf16>
    %286 = arith.truncf %275 : vector<8x8xf32> to vector<8x8xbf16>
    %cst_166 = arith.constant dense<0.000000e+00> : vector<16x8xf32>
    %287 = tpu.matmul %285, %286, %cst_166 {dimension_numbers = #tpu.dot_dimension_numbers<[1], [1], [0], [0], [0, 0, 1, 0], [], []>} : vector<16x8xbf16>, vector<8x8xbf16>, vector<16x8xf32> -> vector<16x8xf32>
    %cst_167 = arith.constant 0.353553385 : f32
    %288 = vector.broadcast %cst_167 : f32 to vector<16x8xf32>
    %289 = arith.mulf %287, %288 : vector<16x8xf32>
    %290 = arith.addf %289, %257 : vector<16x8xf32>
    %cst_168 = arith.constant dense<0xFF800000> : vector<16xf32>
    %291 = vector.multi_reduction <maximumf>, %290, %cst_168 [1] : vector<16x8xf32> to vector<16xf32>
    %292 = vector.shape_cast %291 : vector<16xf32> to vector<16x1xf32>
    %293 = vector.broadcast %292 : vector<16x1xf32> to vector<16x8xf32>
    %294 = arith.subf %290, %293 : vector<16x8xf32>
    %295 = math.exp %294 : vector<16x8xf32>
    %cst_169 = arith.constant dense<0.000000e+00> : vector<16xf32>
    %296 = vector.multi_reduction <add>, %295, %cst_169 [1] : vector<16x8xf32> to vector<16xf32>
    %297 = vector.shape_cast %296 : vector<16xf32> to vector<16x1xf32>
    %298 = tpu.reciprocal %297 {approx = true} : vector<16x1xf32> -> vector<16x1xf32>
    %299 = vector.broadcast %298 : vector<16x1xf32> to vector<16x8xf32>
    %300 = arith.mulf %295, %299 : vector<16x8xf32>
    %301 = arith.truncf %300 : vector<16x8xf32> to vector<16x8xbf16>
    %302 = arith.truncf %284 : vector<8x8xf32> to vector<8x8xbf16>
    %cst_170 = arith.constant dense<0.000000e+00> : vector<16x8xf32>
    %303 = tpu.matmul %301, %302, %cst_170 {dimension_numbers = #tpu.dot_dimension_numbers<[1], [0], [0], [1], [0, 0, 1, 1], [], []>} : vector<16x8xbf16>, vector<8x8xbf16>, vector<16x8xf32> -> vector<16x8xf32>
    %c0_171 = arith.constant 0 : index
    %c0_172 = arith.constant 0 : index
    %c0_173 = arith.constant 0 : index
    %304 = vector.load %arg22[%c0_171, %c0_172, %c0_173] : memref<4x8x32xf32, #tpu.memory_space<vmem>>, vector<1x8x32xf32>
    %305 = vector.shape_cast %304 : vector<1x8x32xf32> to vector<8x32xf32>
    %306 = arith.truncf %303 : vector<16x8xf32> to vector<16x8xbf16>
    %307 = arith.truncf %305 : vector<8x32xf32> to vector<8x32xbf16>
    %cst_174 = arith.constant dense<0.000000e+00> : vector<16x32xf32>
    %308 = tpu.matmul %306, %307, %cst_174 {dimension_numbers = #tpu.dot_dimension_numbers<[1], [0], [0], [1], [0, 0, 1, 1], [], []>} : vector<16x8xbf16>, vector<8x32xbf16>, vector<16x32xf32> -> vector<16x32xf32>
    %c1_175 = arith.constant 1 : index
    %c0_176 = arith.constant 0 : index
    %c0_177 = arith.constant 0 : index
    %309 = vector.load %arg16[%c1_175, %c0_176, %c0_177] : memref<4x32x8xf32, #tpu.memory_space<vmem>>, vector<1x32x8xf32>
    %310 = vector.shape_cast %309 : vector<1x32x8xf32> to vector<32x8xf32>
    %311 = arith.truncf %249 : vector<16x32xf32> to vector<16x32xbf16>
    %312 = arith.truncf %310 : vector<32x8xf32> to vector<32x8xbf16>
    %cst_178 = arith.constant dense<0.000000e+00> : vector<16x8xf32>
    %313 = tpu.matmul %311, %312, %cst_178 {dimension_numbers = #tpu.dot_dimension_numbers<[1], [0], [0], [1], [0, 0, 1, 1], [], []>} : vector<16x32xbf16>, vector<32x8xbf16>, vector<16x8xf32> -> vector<16x8xf32>
    %c1_179 = arith.constant 1 : index
    %c0_180 = arith.constant 0 : index
    %c0_181 = arith.constant 0 : index
    %314 = vector.load %arg17[%c1_179, %c0_180, %c0_181] : memref<4x1x8xf32, #tpu.memory_space<vmem>>, vector<1x1x8xf32>
    %315 = vector.shape_cast %314 : vector<1x1x8xf32> to vector<1x8xf32>
    %316 = vector.broadcast %315 : vector<1x8xf32> to vector<16x8xf32>
    %317 = arith.addf %313, %316 : vector<16x8xf32>
    %c1_182 = arith.constant 1 : index
    %c0_183 = arith.constant 0 : index
    %c0_184 = arith.constant 0 : index
    %318 = vector.load %arg18[%c1_182, %c0_183, %c0_184] : memref<4x32x8xf32, #tpu.memory_space<vmem>>, vector<1x32x8xf32>
    %319 = vector.shape_cast %318 : vector<1x32x8xf32> to vector<32x8xf32>
    %320 = arith.truncf %1 : vector<8x32xf32> to vector<8x32xbf16>
    %321 = arith.truncf %319 : vector<32x8xf32> to vector<32x8xbf16>
    %cst_185 = arith.constant dense<0.000000e+00> : vector<8x8xf32>
    %322 = tpu.matmul %320, %321, %cst_185 {dimension_numbers = #tpu.dot_dimension_numbers<[1], [0], [0], [1], [0, 0, 1, 1], [], []>} : vector<8x32xbf16>, vector<32x8xbf16>, vector<8x8xf32> -> vector<8x8xf32>
    %c1_186 = arith.constant 1 : index
    %c0_187 = arith.constant 0 : index
    %c0_188 = arith.constant 0 : index
    %323 = vector.load %arg19[%c1_186, %c0_187, %c0_188] : memref<4x1x8xf32, #tpu.memory_space<vmem>>, vector<1x1x8xf32>
    %324 = vector.shape_cast %323 : vector<1x1x8xf32> to vector<1x8xf32>
    %325 = vector.broadcast %324 : vector<1x8xf32> to vector<8x8xf32>
    %326 = arith.addf %322, %325 : vector<8x8xf32>
    %c1_189 = arith.constant 1 : index
    %c0_190 = arith.constant 0 : index
    %c0_191 = arith.constant 0 : index
    %327 = vector.load %arg20[%c1_189, %c0_190, %c0_191] : memref<4x32x8xf32, #tpu.memory_space<vmem>>, vector<1x32x8xf32>
    %328 = vector.shape_cast %327 : vector<1x32x8xf32> to vector<32x8xf32>
    %329 = arith.truncf %1 : vector<8x32xf32> to vector<8x32xbf16>
    %330 = arith.truncf %328 : vector<32x8xf32> to vector<32x8xbf16>
    %cst_192 = arith.constant dense<0.000000e+00> : vector<8x8xf32>
    %331 = tpu.matmul %329, %330, %cst_192 {dimension_numbers = #tpu.dot_dimension_numbers<[1], [0], [0], [1], [0, 0, 1, 1], [], []>} : vector<8x32xbf16>, vector<32x8xbf16>, vector<8x8xf32> -> vector<8x8xf32>
    %c1_193 = arith.constant 1 : index
    %c0_194 = arith.constant 0 : index
    %c0_195 = arith.constant 0 : index
    %332 = vector.load %arg21[%c1_193, %c0_194, %c0_195] : memref<4x1x8xf32, #tpu.memory_space<vmem>>, vector<1x1x8xf32>
    %333 = vector.shape_cast %332 : vector<1x1x8xf32> to vector<1x8xf32>
    %334 = vector.broadcast %333 : vector<1x8xf32> to vector<8x8xf32>
    %335 = arith.addf %331, %334 : vector<8x8xf32>
    %336 = arith.truncf %317 : vector<16x8xf32> to vector<16x8xbf16>
    %337 = arith.truncf %326 : vector<8x8xf32> to vector<8x8xbf16>
    %cst_196 = arith.constant dense<0.000000e+00> : vector<16x8xf32>
    %338 = tpu.matmul %336, %337, %cst_196 {dimension_numbers = #tpu.dot_dimension_numbers<[1], [1], [0], [0], [0, 0, 1, 0], [], []>} : vector<16x8xbf16>, vector<8x8xbf16>, vector<16x8xf32> -> vector<16x8xf32>
    %cst_197 = arith.constant 0.353553385 : f32
    %339 = vector.broadcast %cst_197 : f32 to vector<16x8xf32>
    %340 = arith.mulf %338, %339 : vector<16x8xf32>
    %341 = arith.addf %340, %257 : vector<16x8xf32>
    %cst_198 = arith.constant dense<0xFF800000> : vector<16xf32>
    %342 = vector.multi_reduction <maximumf>, %341, %cst_198 [1] : vector<16x8xf32> to vector<16xf32>
    %343 = vector.shape_cast %342 : vector<16xf32> to vector<16x1xf32>
    %344 = vector.broadcast %343 : vector<16x1xf32> to vector<16x8xf32>
    %345 = arith.subf %341, %344 : vector<16x8xf32>
    %346 = math.exp %345 : vector<16x8xf32>
    %cst_199 = arith.constant dense<0.000000e+00> : vector<16xf32>
    %347 = vector.multi_reduction <add>, %346, %cst_199 [1] : vector<16x8xf32> to vector<16xf32>
    %348 = vector.shape_cast %347 : vector<16xf32> to vector<16x1xf32>
    %349 = tpu.reciprocal %348 {approx = true} : vector<16x1xf32> -> vector<16x1xf32>
    %350 = vector.broadcast %349 : vector<16x1xf32> to vector<16x8xf32>
    %351 = arith.mulf %346, %350 : vector<16x8xf32>
    %352 = arith.truncf %351 : vector<16x8xf32> to vector<16x8xbf16>
    %353 = arith.truncf %335 : vector<8x8xf32> to vector<8x8xbf16>
    %cst_200 = arith.constant dense<0.000000e+00> : vector<16x8xf32>
    %354 = tpu.matmul %352, %353, %cst_200 {dimension_numbers = #tpu.dot_dimension_numbers<[1], [0], [0], [1], [0, 0, 1, 1], [], []>} : vector<16x8xbf16>, vector<8x8xbf16>, vector<16x8xf32> -> vector<16x8xf32>
    %c1_201 = arith.constant 1 : index
    %c0_202 = arith.constant 0 : index
    %c0_203 = arith.constant 0 : index
    %355 = vector.load %arg22[%c1_201, %c0_202, %c0_203] : memref<4x8x32xf32, #tpu.memory_space<vmem>>, vector<1x8x32xf32>
    %356 = vector.shape_cast %355 : vector<1x8x32xf32> to vector<8x32xf32>
    %357 = arith.truncf %354 : vector<16x8xf32> to vector<16x8xbf16>
    %358 = arith.truncf %356 : vector<8x32xf32> to vector<8x32xbf16>
    %cst_204 = arith.constant dense<0.000000e+00> : vector<16x32xf32>
    %359 = tpu.matmul %357, %358, %cst_204 {dimension_numbers = #tpu.dot_dimension_numbers<[1], [0], [0], [1], [0, 0, 1, 1], [], []>} : vector<16x8xbf16>, vector<8x32xbf16>, vector<16x32xf32> -> vector<16x32xf32>
    %360 = arith.addf %308, %359 : vector<16x32xf32>
    %c2_205 = arith.constant 2 : index
    %c0_206 = arith.constant 0 : index
    %c0_207 = arith.constant 0 : index
    %361 = vector.load %arg16[%c2_205, %c0_206, %c0_207] : memref<4x32x8xf32, #tpu.memory_space<vmem>>, vector<1x32x8xf32>
    %362 = vector.shape_cast %361 : vector<1x32x8xf32> to vector<32x8xf32>
    %363 = arith.truncf %249 : vector<16x32xf32> to vector<16x32xbf16>
    %364 = arith.truncf %362 : vector<32x8xf32> to vector<32x8xbf16>
    %cst_208 = arith.constant dense<0.000000e+00> : vector<16x8xf32>
    %365 = tpu.matmul %363, %364, %cst_208 {dimension_numbers = #tpu.dot_dimension_numbers<[1], [0], [0], [1], [0, 0, 1, 1], [], []>} : vector<16x32xbf16>, vector<32x8xbf16>, vector<16x8xf32> -> vector<16x8xf32>
    %c2_209 = arith.constant 2 : index
    %c0_210 = arith.constant 0 : index
    %c0_211 = arith.constant 0 : index
    %366 = vector.load %arg17[%c2_209, %c0_210, %c0_211] : memref<4x1x8xf32, #tpu.memory_space<vmem>>, vector<1x1x8xf32>
    %367 = vector.shape_cast %366 : vector<1x1x8xf32> to vector<1x8xf32>
    %368 = vector.broadcast %367 : vector<1x8xf32> to vector<16x8xf32>
    %369 = arith.addf %365, %368 : vector<16x8xf32>
    %c2_212 = arith.constant 2 : index
    %c0_213 = arith.constant 0 : index
    %c0_214 = arith.constant 0 : index
    %370 = vector.load %arg18[%c2_212, %c0_213, %c0_214] : memref<4x32x8xf32, #tpu.memory_space<vmem>>, vector<1x32x8xf32>
    %371 = vector.shape_cast %370 : vector<1x32x8xf32> to vector<32x8xf32>
    %372 = arith.truncf %1 : vector<8x32xf32> to vector<8x32xbf16>
    %373 = arith.truncf %371 : vector<32x8xf32> to vector<32x8xbf16>
    %cst_215 = arith.constant dense<0.000000e+00> : vector<8x8xf32>
    %374 = tpu.matmul %372, %373, %cst_215 {dimension_numbers = #tpu.dot_dimension_numbers<[1], [0], [0], [1], [0, 0, 1, 1], [], []>} : vector<8x32xbf16>, vector<32x8xbf16>, vector<8x8xf32> -> vector<8x8xf32>
    %c2_216 = arith.constant 2 : index
    %c0_217 = arith.constant 0 : index
    %c0_218 = arith.constant 0 : index
    %375 = vector.load %arg19[%c2_216, %c0_217, %c0_218] : memref<4x1x8xf32, #tpu.memory_space<vmem>>, vector<1x1x8xf32>
    %376 = vector.shape_cast %375 : vector<1x1x8xf32> to vector<1x8xf32>
    %377 = vector.broadcast %376 : vector<1x8xf32> to vector<8x8xf32>
    %378 = arith.addf %374, %377 : vector<8x8xf32>
    %c2_219 = arith.constant 2 : index
    %c0_220 = arith.constant 0 : index
    %c0_221 = arith.constant 0 : index
    %379 = vector.load %arg20[%c2_219, %c0_220, %c0_221] : memref<4x32x8xf32, #tpu.memory_space<vmem>>, vector<1x32x8xf32>
    %380 = vector.shape_cast %379 : vector<1x32x8xf32> to vector<32x8xf32>
    %381 = arith.truncf %1 : vector<8x32xf32> to vector<8x32xbf16>
    %382 = arith.truncf %380 : vector<32x8xf32> to vector<32x8xbf16>
    %cst_222 = arith.constant dense<0.000000e+00> : vector<8x8xf32>
    %383 = tpu.matmul %381, %382, %cst_222 {dimension_numbers = #tpu.dot_dimension_numbers<[1], [0], [0], [1], [0, 0, 1, 1], [], []>} : vector<8x32xbf16>, vector<32x8xbf16>, vector<8x8xf32> -> vector<8x8xf32>
    %c2_223 = arith.constant 2 : index
    %c0_224 = arith.constant 0 : index
    %c0_225 = arith.constant 0 : index
    %384 = vector.load %arg21[%c2_223, %c0_224, %c0_225] : memref<4x1x8xf32, #tpu.memory_space<vmem>>, vector<1x1x8xf32>
    %385 = vector.shape_cast %384 : vector<1x1x8xf32> to vector<1x8xf32>
    %386 = vector.broadcast %385 : vector<1x8xf32> to vector<8x8xf32>
    %387 = arith.addf %383, %386 : vector<8x8xf32>
    %388 = arith.truncf %369 : vector<16x8xf32> to vector<16x8xbf16>
    %389 = arith.truncf %378 : vector<8x8xf32> to vector<8x8xbf16>
    %cst_226 = arith.constant dense<0.000000e+00> : vector<16x8xf32>
    %390 = tpu.matmul %388, %389, %cst_226 {dimension_numbers = #tpu.dot_dimension_numbers<[1], [1], [0], [0], [0, 0, 1, 0], [], []>} : vector<16x8xbf16>, vector<8x8xbf16>, vector<16x8xf32> -> vector<16x8xf32>
    %cst_227 = arith.constant 0.353553385 : f32
    %391 = vector.broadcast %cst_227 : f32 to vector<16x8xf32>
    %392 = arith.mulf %390, %391 : vector<16x8xf32>
    %393 = arith.addf %392, %257 : vector<16x8xf32>
    %cst_228 = arith.constant dense<0xFF800000> : vector<16xf32>
    %394 = vector.multi_reduction <maximumf>, %393, %cst_228 [1] : vector<16x8xf32> to vector<16xf32>
    %395 = vector.shape_cast %394 : vector<16xf32> to vector<16x1xf32>
    %396 = vector.broadcast %395 : vector<16x1xf32> to vector<16x8xf32>
    %397 = arith.subf %393, %396 : vector<16x8xf32>
    %398 = math.exp %397 : vector<16x8xf32>
    %cst_229 = arith.constant dense<0.000000e+00> : vector<16xf32>
    %399 = vector.multi_reduction <add>, %398, %cst_229 [1] : vector<16x8xf32> to vector<16xf32>
    %400 = vector.shape_cast %399 : vector<16xf32> to vector<16x1xf32>
    %401 = tpu.reciprocal %400 {approx = true} : vector<16x1xf32> -> vector<16x1xf32>
    %402 = vector.broadcast %401 : vector<16x1xf32> to vector<16x8xf32>
    %403 = arith.mulf %398, %402 : vector<16x8xf32>
    %404 = arith.truncf %403 : vector<16x8xf32> to vector<16x8xbf16>
    %405 = arith.truncf %387 : vector<8x8xf32> to vector<8x8xbf16>
    %cst_230 = arith.constant dense<0.000000e+00> : vector<16x8xf32>
    %406 = tpu.matmul %404, %405, %cst_230 {dimension_numbers = #tpu.dot_dimension_numbers<[1], [0], [0], [1], [0, 0, 1, 1], [], []>} : vector<16x8xbf16>, vector<8x8xbf16>, vector<16x8xf32> -> vector<16x8xf32>
    %c2_231 = arith.constant 2 : index
    %c0_232 = arith.constant 0 : index
    %c0_233 = arith.constant 0 : index
    %407 = vector.load %arg22[%c2_231, %c0_232, %c0_233] : memref<4x8x32xf32, #tpu.memory_space<vmem>>, vector<1x8x32xf32>
    %408 = vector.shape_cast %407 : vector<1x8x32xf32> to vector<8x32xf32>
    %409 = arith.truncf %406 : vector<16x8xf32> to vector<16x8xbf16>
    %410 = arith.truncf %408 : vector<8x32xf32> to vector<8x32xbf16>
    %cst_234 = arith.constant dense<0.000000e+00> : vector<16x32xf32>
    %411 = tpu.matmul %409, %410, %cst_234 {dimension_numbers = #tpu.dot_dimension_numbers<[1], [0], [0], [1], [0, 0, 1, 1], [], []>} : vector<16x8xbf16>, vector<8x32xbf16>, vector<16x32xf32> -> vector<16x32xf32>
    %412 = arith.addf %360, %411 : vector<16x32xf32>
    %c3_235 = arith.constant 3 : index
    %c0_236 = arith.constant 0 : index
    %c0_237 = arith.constant 0 : index
    %413 = vector.load %arg16[%c3_235, %c0_236, %c0_237] : memref<4x32x8xf32, #tpu.memory_space<vmem>>, vector<1x32x8xf32>
    %414 = vector.shape_cast %413 : vector<1x32x8xf32> to vector<32x8xf32>
    %415 = arith.truncf %249 : vector<16x32xf32> to vector<16x32xbf16>
    %416 = arith.truncf %414 : vector<32x8xf32> to vector<32x8xbf16>
    %cst_238 = arith.constant dense<0.000000e+00> : vector<16x8xf32>
    %417 = tpu.matmul %415, %416, %cst_238 {dimension_numbers = #tpu.dot_dimension_numbers<[1], [0], [0], [1], [0, 0, 1, 1], [], []>} : vector<16x32xbf16>, vector<32x8xbf16>, vector<16x8xf32> -> vector<16x8xf32>
    %c3_239 = arith.constant 3 : index
    %c0_240 = arith.constant 0 : index
    %c0_241 = arith.constant 0 : index
    %418 = vector.load %arg17[%c3_239, %c0_240, %c0_241] : memref<4x1x8xf32, #tpu.memory_space<vmem>>, vector<1x1x8xf32>
    %419 = vector.shape_cast %418 : vector<1x1x8xf32> to vector<1x8xf32>
    %420 = vector.broadcast %419 : vector<1x8xf32> to vector<16x8xf32>
    %421 = arith.addf %417, %420 : vector<16x8xf32>
    %c3_242 = arith.constant 3 : index
    %c0_243 = arith.constant 0 : index
    %c0_244 = arith.constant 0 : index
    %422 = vector.load %arg18[%c3_242, %c0_243, %c0_244] : memref<4x32x8xf32, #tpu.memory_space<vmem>>, vector<1x32x8xf32>
    %423 = vector.shape_cast %422 : vector<1x32x8xf32> to vector<32x8xf32>
    %424 = arith.truncf %1 : vector<8x32xf32> to vector<8x32xbf16>
    %425 = arith.truncf %423 : vector<32x8xf32> to vector<32x8xbf16>
    %cst_245 = arith.constant dense<0.000000e+00> : vector<8x8xf32>
    %426 = tpu.matmul %424, %425, %cst_245 {dimension_numbers = #tpu.dot_dimension_numbers<[1], [0], [0], [1], [0, 0, 1, 1], [], []>} : vector<8x32xbf16>, vector<32x8xbf16>, vector<8x8xf32> -> vector<8x8xf32>
    %c3_246 = arith.constant 3 : index
    %c0_247 = arith.constant 0 : index
    %c0_248 = arith.constant 0 : index
    %427 = vector.load %arg19[%c3_246, %c0_247, %c0_248] : memref<4x1x8xf32, #tpu.memory_space<vmem>>, vector<1x1x8xf32>
    %428 = vector.shape_cast %427 : vector<1x1x8xf32> to vector<1x8xf32>
    %429 = vector.broadcast %428 : vector<1x8xf32> to vector<8x8xf32>
    %430 = arith.addf %426, %429 : vector<8x8xf32>
    %c3_249 = arith.constant 3 : index
    %c0_250 = arith.constant 0 : index
    %c0_251 = arith.constant 0 : index
    %431 = vector.load %arg20[%c3_249, %c0_250, %c0_251] : memref<4x32x8xf32, #tpu.memory_space<vmem>>, vector<1x32x8xf32>
    %432 = vector.shape_cast %431 : vector<1x32x8xf32> to vector<32x8xf32>
    %433 = arith.truncf %1 : vector<8x32xf32> to vector<8x32xbf16>
    %434 = arith.truncf %432 : vector<32x8xf32> to vector<32x8xbf16>
    %cst_252 = arith.constant dense<0.000000e+00> : vector<8x8xf32>
    %435 = tpu.matmul %433, %434, %cst_252 {dimension_numbers = #tpu.dot_dimension_numbers<[1], [0], [0], [1], [0, 0, 1, 1], [], []>} : vector<8x32xbf16>, vector<32x8xbf16>, vector<8x8xf32> -> vector<8x8xf32>
    %c3_253 = arith.constant 3 : index
    %c0_254 = arith.constant 0 : index
    %c0_255 = arith.constant 0 : index
    %436 = vector.load %arg21[%c3_253, %c0_254, %c0_255] : memref<4x1x8xf32, #tpu.memory_space<vmem>>, vector<1x1x8xf32>
    %437 = vector.shape_cast %436 : vector<1x1x8xf32> to vector<1x8xf32>
    %438 = vector.broadcast %437 : vector<1x8xf32> to vector<8x8xf32>
    %439 = arith.addf %435, %438 : vector<8x8xf32>
    %440 = arith.truncf %421 : vector<16x8xf32> to vector<16x8xbf16>
    %441 = arith.truncf %430 : vector<8x8xf32> to vector<8x8xbf16>
    %cst_256 = arith.constant dense<0.000000e+00> : vector<16x8xf32>
    %442 = tpu.matmul %440, %441, %cst_256 {dimension_numbers = #tpu.dot_dimension_numbers<[1], [1], [0], [0], [0, 0, 1, 0], [], []>} : vector<16x8xbf16>, vector<8x8xbf16>, vector<16x8xf32> -> vector<16x8xf32>
    %cst_257 = arith.constant 0.353553385 : f32
    %443 = vector.broadcast %cst_257 : f32 to vector<16x8xf32>
    %444 = arith.mulf %442, %443 : vector<16x8xf32>
    %445 = arith.addf %444, %257 : vector<16x8xf32>
    %cst_258 = arith.constant dense<0xFF800000> : vector<16xf32>
    %446 = vector.multi_reduction <maximumf>, %445, %cst_258 [1] : vector<16x8xf32> to vector<16xf32>
    %447 = vector.shape_cast %446 : vector<16xf32> to vector<16x1xf32>
    %448 = vector.broadcast %447 : vector<16x1xf32> to vector<16x8xf32>
    %449 = arith.subf %445, %448 : vector<16x8xf32>
    %450 = math.exp %449 : vector<16x8xf32>
    %cst_259 = arith.constant dense<0.000000e+00> : vector<16xf32>
    %451 = vector.multi_reduction <add>, %450, %cst_259 [1] : vector<16x8xf32> to vector<16xf32>
    %452 = vector.shape_cast %451 : vector<16xf32> to vector<16x1xf32>
    %453 = tpu.reciprocal %452 {approx = true} : vector<16x1xf32> -> vector<16x1xf32>
    %454 = vector.broadcast %453 : vector<16x1xf32> to vector<16x8xf32>
    %455 = arith.mulf %450, %454 : vector<16x8xf32>
    %456 = arith.truncf %455 : vector<16x8xf32> to vector<16x8xbf16>
    %457 = arith.truncf %439 : vector<8x8xf32> to vector<8x8xbf16>
    %cst_260 = arith.constant dense<0.000000e+00> : vector<16x8xf32>
    %458 = tpu.matmul %456, %457, %cst_260 {dimension_numbers = #tpu.dot_dimension_numbers<[1], [0], [0], [1], [0, 0, 1, 1], [], []>} : vector<16x8xbf16>, vector<8x8xbf16>, vector<16x8xf32> -> vector<16x8xf32>
    %c3_261 = arith.constant 3 : index
    %c0_262 = arith.constant 0 : index
    %c0_263 = arith.constant 0 : index
    %459 = vector.load %arg22[%c3_261, %c0_262, %c0_263] : memref<4x8x32xf32, #tpu.memory_space<vmem>>, vector<1x8x32xf32>
    %460 = vector.shape_cast %459 : vector<1x8x32xf32> to vector<8x32xf32>
    %461 = arith.truncf %458 : vector<16x8xf32> to vector<16x8xbf16>
    %462 = arith.truncf %460 : vector<8x32xf32> to vector<8x32xbf16>
    %cst_264 = arith.constant dense<0.000000e+00> : vector<16x32xf32>
    %463 = tpu.matmul %461, %462, %cst_264 {dimension_numbers = #tpu.dot_dimension_numbers<[1], [0], [0], [1], [0, 0, 1, 1], [], []>} : vector<16x8xbf16>, vector<8x32xbf16>, vector<16x32xf32> -> vector<16x32xf32>
    %464 = arith.addf %412, %463 : vector<16x32xf32>
    %c0_265 = arith.constant 0 : index
    %c0_266 = arith.constant 0 : index
    %465 = vector.load %arg23[%c0_265, %c0_266] : memref<1x32xf32, #tpu.memory_space<vmem>>, vector<1x32xf32>
    %466 = vector.broadcast %465 : vector<1x32xf32> to vector<16x32xf32>
    %467 = arith.addf %464, %466 : vector<16x32xf32>
    %468 = arith.addf %249, %467 : vector<16x32xf32>
    %c0_267 = arith.constant 0 : index
    %c0_268 = arith.constant 0 : index
    %469 = vector.load %arg24[%c0_267, %c0_268] : memref<1x32xf32, #tpu.memory_space<vmem>>, vector<1x32xf32>
    %c0_269 = arith.constant 0 : index
    %c0_270 = arith.constant 0 : index
    %470 = vector.load %arg25[%c0_269, %c0_270] : memref<1x32xf32, #tpu.memory_space<vmem>>, vector<1x32xf32>
    %cst_271 = arith.constant dense<0.000000e+00> : vector<16xf32>
    %471 = vector.multi_reduction <add>, %468, %cst_271 [1] : vector<16x32xf32> to vector<16xf32>
    %472 = vector.shape_cast %471 : vector<16xf32> to vector<16x1xf32>
    %473 = arith.mulf %468, %468 : vector<16x32xf32>
    %cst_272 = arith.constant dense<0.000000e+00> : vector<16xf32>
    %474 = vector.multi_reduction <add>, %473, %cst_272 [1] : vector<16x32xf32> to vector<16xf32>
    %475 = vector.shape_cast %474 : vector<16xf32> to vector<16x1xf32>
    %cst_273 = arith.constant 3.125000e-02 : f32
    %476 = vector.broadcast %cst_273 : f32 to vector<16x1xf32>
    %477 = arith.mulf %472, %476 : vector<16x1xf32>
    %cst_274 = arith.constant 3.125000e-02 : f32
    %478 = vector.broadcast %cst_274 : f32 to vector<16x1xf32>
    %479 = arith.mulf %475, %478 : vector<16x1xf32>
    %480 = arith.mulf %477, %477 : vector<16x1xf32>
    %481 = arith.subf %479, %480 : vector<16x1xf32>
    %482 = vector.broadcast %477 : vector<16x1xf32> to vector<16x32xf32>
    %483 = arith.subf %468, %482 : vector<16x32xf32>
    %cst_275 = arith.constant 9.99999974E-6 : f32
    %484 = vector.broadcast %cst_275 : f32 to vector<16x1xf32>
    %485 = arith.addf %481, %484 : vector<16x1xf32>
    %486 = math.rsqrt %485 : vector<16x1xf32>
    %487 = vector.broadcast %486 : vector<16x1xf32> to vector<16x32xf32>
    %488 = arith.mulf %483, %487 : vector<16x32xf32>
    %489 = vector.broadcast %469 : vector<1x32xf32> to vector<16x32xf32>
    %490 = arith.mulf %488, %489 : vector<16x32xf32>
    %491 = vector.broadcast %470 : vector<1x32xf32> to vector<16x32xf32>
    %492 = arith.addf %490, %491 : vector<16x32xf32>
    %c0_276 = arith.constant 0 : index
    %c0_277 = arith.constant 0 : index
    %493 = vector.load %arg26[%c0_276, %c0_277] : memref<32x128xf32, #tpu.memory_space<vmem>>, vector<32x128xf32>
    %494 = arith.truncf %492 : vector<16x32xf32> to vector<16x32xbf16>
    %495 = arith.truncf %493 : vector<32x128xf32> to vector<32x128xbf16>
    %cst_278 = arith.constant dense<0.000000e+00> : vector<16x128xf32>
    %496 = tpu.matmul %494, %495, %cst_278 {dimension_numbers = #tpu.dot_dimension_numbers<[1], [0], [0], [1], [0, 0, 1, 1], [], []>} : vector<16x32xbf16>, vector<32x128xbf16>, vector<16x128xf32> -> vector<16x128xf32>
    %c0_279 = arith.constant 0 : index
    %c0_280 = arith.constant 0 : index
    %497 = vector.load %arg27[%c0_279, %c0_280] : memref<1x128xf32, #tpu.memory_space<vmem>>, vector<1x128xf32>
    %498 = vector.broadcast %497 : vector<1x128xf32> to vector<16x128xf32>
    %499 = arith.addf %496, %498 : vector<16x128xf32>
    %cst_281 = arith.constant 0.000000e+00 : f32
    %500 = vector.broadcast %cst_281 : f32 to vector<16x128xf32>
    %501 = arith.maximumf %499, %500 : vector<16x128xf32>
    %c0_282 = arith.constant 0 : index
    %c0_283 = arith.constant 0 : index
    %502 = vector.load %arg28[%c0_282, %c0_283] : memref<128x32xf32, #tpu.memory_space<vmem>>, vector<128x32xf32>
    %503 = arith.truncf %501 : vector<16x128xf32> to vector<16x128xbf16>
    %504 = arith.truncf %502 : vector<128x32xf32> to vector<128x32xbf16>
    %cst_284 = arith.constant dense<0.000000e+00> : vector<16x32xf32>
    %505 = tpu.matmul %503, %504, %cst_284 {dimension_numbers = #tpu.dot_dimension_numbers<[1], [0], [0], [1], [0, 0, 1, 1], [], []>} : vector<16x128xbf16>, vector<128x32xbf16>, vector<16x32xf32> -> vector<16x32xf32>
    %c0_285 = arith.constant 0 : index
    %c0_286 = arith.constant 0 : index
    %506 = vector.load %arg29[%c0_285, %c0_286] : memref<1x32xf32, #tpu.memory_space<vmem>>, vector<1x32xf32>
    %507 = vector.broadcast %506 : vector<1x32xf32> to vector<16x32xf32>
    %508 = arith.addf %505, %507 : vector<16x32xf32>
    %509 = arith.addf %492, %508 : vector<16x32xf32>
    %c0_287 = arith.constant 0 : index
    %c0_288 = arith.constant 0 : index
    %510 = vector.load %arg30[%c0_287, %c0_288] : memref<1x32xf32, #tpu.memory_space<vmem>>, vector<1x32xf32>
    %c0_289 = arith.constant 0 : index
    %c0_290 = arith.constant 0 : index
    %511 = vector.load %arg31[%c0_289, %c0_290] : memref<1x32xf32, #tpu.memory_space<vmem>>, vector<1x32xf32>
    %cst_291 = arith.constant dense<0.000000e+00> : vector<16xf32>
    %512 = vector.multi_reduction <add>, %509, %cst_291 [1] : vector<16x32xf32> to vector<16xf32>
    %513 = vector.shape_cast %512 : vector<16xf32> to vector<16x1xf32>
    %514 = arith.mulf %509, %509 : vector<16x32xf32>
    %cst_292 = arith.constant dense<0.000000e+00> : vector<16xf32>
    %515 = vector.multi_reduction <add>, %514, %cst_292 [1] : vector<16x32xf32> to vector<16xf32>
    %516 = vector.shape_cast %515 : vector<16xf32> to vector<16x1xf32>
    %cst_293 = arith.constant 3.125000e-02 : f32
    %517 = vector.broadcast %cst_293 : f32 to vector<16x1xf32>
    %518 = arith.mulf %513, %517 : vector<16x1xf32>
    %cst_294 = arith.constant 3.125000e-02 : f32
    %519 = vector.broadcast %cst_294 : f32 to vector<16x1xf32>
    %520 = arith.mulf %516, %519 : vector<16x1xf32>
    %521 = arith.mulf %518, %518 : vector<16x1xf32>
    %522 = arith.subf %520, %521 : vector<16x1xf32>
    %523 = vector.broadcast %518 : vector<16x1xf32> to vector<16x32xf32>
    %524 = arith.subf %509, %523 : vector<16x32xf32>
    %cst_295 = arith.constant 9.99999974E-6 : f32
    %525 = vector.broadcast %cst_295 : f32 to vector<16x1xf32>
    %526 = arith.addf %522, %525 : vector<16x1xf32>
    %527 = math.rsqrt %526 : vector<16x1xf32>
    %528 = vector.broadcast %527 : vector<16x1xf32> to vector<16x32xf32>
    %529 = arith.mulf %524, %528 : vector<16x32xf32>
    %530 = vector.broadcast %510 : vector<1x32xf32> to vector<16x32xf32>
    %531 = arith.mulf %529, %530 : vector<16x32xf32>
    %532 = vector.broadcast %511 : vector<1x32xf32> to vector<16x32xf32>
    %533 = arith.addf %531, %532 : vector<16x32xf32>
    %c0_296 = arith.constant 0 : index
    %c0_297 = arith.constant 0 : index
    %534 = vector.load %arg32[%c0_296, %c0_297] : memref<16x32xf32, #tpu.memory_space<vmem>>, vector<16x32xf32>
    tpu.vector_store %arg32[%c0_296, %c0_297], %533 {strides = array<i32>} : memref<16x32xf32, #tpu.memory_space<vmem>>, vector<16x32xf32>,
    return
  }
}

</mosaic_0001>

<bundles_post_ra>
// kernel: image_caption_forward.5
= control target key start
LH: loop header
LB: loop body
LE: loop exit
PB: predicated region body
PF: predicated region fallthrough
CT: control target
= control target key end

     0   :  { %vm305_vm0 = vcmask 1043456   ;;  %vm308_vm1 = vcmask 261120   ;;  %s721_s1 = inlined_call_operand.vmem [shape: f32[768,32], index: 1, kind: input, shape index: {}]   ;;  %s722_s0 = inlined_call_operand.vmem [shape: f32[8,768], index: 0, kind: input, shape index: {}]   ;;  %s723_s2 = inlined_call_operand.vmem [shape: f32[1,32], index: 2, kind: input, shape index: {}]   ;;  %s724_s3 = inlined_call_operand.vmem [shape: f32[4,32], index: 3, kind: input, shape index: {}]   ;;  %s725_s4 = inlined_call_operand.vmem [shape: f32[8,32], index: 4, kind: output, shape index: {}]  }
   0x1   :  { %v40_v0 = vld [vmem:[%s721_s1 + $0x80] sm:$0xff]  ;;  %v41_v1 = vld [vmem:[%s721_s1 + $0x88] sm:$0xff]  ;;  %v42_v11 = vld [vmem:[%s721_s1 + $0x90] sm:$0xff] }
   0x2   :  { %v24_v2 = vld [vmem:[%s721_s1] sm:$0xff]  ;;  %v134_v3 = vpack.c.bf16 %v41_v1, %v40_v0  ;;  %v25_v4 = vld [vmem:[%s721_s1 + $0x8] sm:$0xff]  ;;  %v43_v13 = vld [vmem:[%s721_s1 + $0x98] sm:$0xff] }
   0x3   :  { %v72_v5 = vld [vmem:[%s721_s1 + $0x180] sm:$0xff]  ;;  %v73_v6 = vld [vmem:[%s721_s1 + $0x188] sm:$0xff]  ;;  %v126_v7 = vpack.c.bf16 %v25_v4, %v24_v2  ;;  %v26_v14 = vld [vmem:[%s721_s1 + $0x10] sm:$0xff]  ;;  %v135_v16 = vpack.c.bf16 %v43_v13, %v42_v11 }
   0x4   :  { %v150_v8 = vpack.c.bf16 %v73_v6, %v72_v5  ;;  %v56_v9 = vld [vmem:[%s721_s1 + $0x100] sm:$0xff]  ;;  %v57_v10 = vld [vmem:[%s721_s1 + $0x108] sm:$0xff]  ;;  %315 = vmatprep.subr.bf16.mxu0 %v134_v3  ;;  %v27_v15 = vld [vmem:[%s721_s1 + $0x18] sm:$0xff] }
   0x5   :  { %v142_v12 = vpack.c.bf16 %v57_v10, %v56_v9  ;;  %316 = vmatpush3.bf16.msra.mxu0 %v126_v7  ;;  %v127_v17 = vpack.c.bf16 %v27_v15, %v26_v14  ;;  %v74_v18 = vld [vmem:[%s721_s1 + $0x190] sm:$0xff]  ;;  %v75_v19 = vld [vmem:[%s721_s1 + $0x198] sm:$0xff]  ;;  %v44_v23 = vld [vmem:[%s721_s1 + $0xa0] sm:$0xff] }
   0x6   :  { %337 = vmatprep.subr.bf16.mxu1 %v150_v8  ;;  %v58_v20 = vld [vmem:[%s721_s1 + $0x110] sm:$0xff]  ;;  %v151_v21 = vpack.c.bf16 %v75_v19, %v74_v18  ;;  %v59_v22 = vld [vmem:[%s721_s1 + $0x118] sm:$0xff]  ;;  %v45_v24 = vld [vmem:[%s721_s1 + $0xa8] sm:$0xff]  ;;  %317 = vmatprep.subr.bf16.mxu0 %v135_v16 }
   0x7   :  { %338 = vmatpush3.bf16.msra.mxu1 %v142_v12  ;;  %v143_v25 = vpack.c.bf16 %v59_v22, %v58_v20  ;;  %v136_v26 = vpack.c.bf16 %v45_v24, %v44_v23  ;;  %v28_v27 = vld [vmem:[%s721_s1 + $0x20] sm:$0xff]  ;;  %v29_v28 = vld [vmem:[%s721_s1 + $0x28] sm:$0xff]  ;;  %v46_v35 = vld [vmem:[%s721_s1 + $0xb0] sm:$0xff] }
   0x8   :  { %v76_v29 = vld [vmem:[%s721_s1 + $0x1a0] sm:$0xff]  ;;  %339 = vmatprep.subr.bf16.mxu1 %v151_v21  ;;  %v77_v30 = vld [vmem:[%s721_s1 + $0x1a8] sm:$0xff]  ;;  %v128_v33 = vpack.c.bf16 %v29_v28, %v28_v27  ;;  %v47_v36 = vld [vmem:[%s721_s1 + $0xb8] sm:$0xff] }
   0x9   :  { %v60_v31 = vld [vmem:[%s721_s1 + $0x120] sm:$0xff]  ;;  %v61_v32 = vld [vmem:[%s721_s1 + $0x128] sm:$0xff]  ;;  %318 = vmatpush3.bf16.msra.mxu0 %v127_v17  ;;  %v152_v34 = vpack.c.bf16 %v77_v30, %v76_v29  ;;  %v30_v37 = vld [vmem:[%s721_s1 + $0x30] sm:$0xff]  ;;  %v137_v39 = vpack.c.bf16 %v47_v36, %v46_v35 }
   0xa   :  { %319 = vmatprep.subr.bf16.mxu0 %v136_v26  ;;  %v144_v38 = vpack.c.bf16 %v61_v32, %v60_v31  ;;  %v31_v40 = vld [vmem:[%s721_s1 + $0x38] sm:$0xff]  ;;  %v78_v41 = vld [vmem:[%s721_s1 + $0x1b0] sm:$0xff]  ;;  %v48_v46 = vld [vmem:[%s721_s1 + $0xc0] sm:$0xff] }
   0xb   :  { %340 = vmatpush3.bf16.msra.mxu1 %v143_v25  ;;  %v79_v42 = vld [vmem:[%s721_s1 + $0x1b8] sm:$0xff]  ;;  %v62_v44 = vld [vmem:[%s721_s1 + $0x130] sm:$0xff]  ;;  %v49_v47 = vld [vmem:[%s721_s1 + $0xc8] sm:$0xff]  ;;  %v129_v48 = vpack.c.bf16 %v31_v40, %v30_v37 }
   0xc   :  { %341 = vmatprep.subr.bf16.mxu1 %v152_v34  ;;  %v153_v43 = vpack.c.bf16 %v79_v42, %v78_v41  ;;  %v63_v45 = vld [vmem:[%s721_s1 + $0x138] sm:$0xff]  ;;  %v80_v49 = vld [vmem:[%s721_s1 + $0x1c0] sm:$0xff]  ;;  %v81_v50 = vld [vmem:[%s721_s1 + $0x1c8] sm:$0xff]  ;;  %v138_v52 = vpack.c.bf16 %v49_v47, %v48_v46 }
   0xd   :  { %320 = vmatpush3.bf16.msra.mxu0 %v128_v33  ;;  %v145_v51 = vpack.c.bf16 %v63_v45, %v62_v44  ;;  %v32_v53 = vld [vmem:[%s721_s1 + $0x40] sm:$0xff]  ;;  %v33_v54 = vld [vmem:[%s721_s1 + $0x48] sm:$0xff]  ;;  %v154_v56 = vpack.c.bf16 %v81_v50, %v80_v49  ;;  %v50_v58 = vld [vmem:[%s721_s1 + $0xd0] sm:$0xff] }
   0xe   :  { %321 = vmatprep.subr.bf16.mxu0 %v137_v39  ;;  %v64_v55 = vld [vmem:[%s721_s1 + $0x140] sm:$0xff]  ;;  %v65_v57 = vld [vmem:[%s721_s1 + $0x148] sm:$0xff]  ;;  %v51_v59 = vld [vmem:[%s721_s1 + $0xd8] sm:$0xff]  ;;  %v130_v62 = vpack.c.bf16 %v33_v54, %v32_v53 }
   0xf   :  { %342 = vmatpush3.bf16.msra.mxu1 %v144_v38  ;;  %v82_v60 = vld [vmem:[%s721_s1 + $0x1d0] sm:$0xff]  ;;  %v83_v61 = vld [vmem:[%s721_s1 + $0x1d8] sm:$0xff]  ;;  %v146_v63 = vpack.c.bf16 %v65_v57, %v64_v55  ;;  %v139_v0 = vpack.c.bf16 %v51_v59, %v50_v58  ;;  %v52_v6 = vld [vmem:[%s721_s1 + $0xe0] sm:$0xff] }
  0x10   :  { %343 = vmatprep.subr.bf16.mxu1 %v153_v43  ;;  %v34_v1 = vld [vmem:[%s721_s1 + $0x50] sm:$0xff]  ;;  %v35_v2 = vld [vmem:[%s721_s1 + $0x58] sm:$0xff]  ;;  %v155_v4 = vpack.c.bf16 %v83_v61, %v82_v60  ;;  %v53_v7 = vld [vmem:[%s721_s1 + $0xe8] sm:$0xff] }
  0x11   :  { %322 = vmatpush3.bf16.msra.mxu0 %v129_v48  ;;  %v66_v3 = vld [vmem:[%s721_s1 + $0x150] sm:$0xff]  ;;  %v67_v5 = vld [vmem:[%s721_s1 + $0x158] sm:$0xff]  ;;  %v84_v8 = vld [vmem:[%s721_s1 + $0x1e0] sm:$0xff]  ;;  %v131_v10 = vpack.c.bf16 %v35_v2, %v34_v1  ;;  %v140_v14 = vpack.c.bf16 %v53_v7, %v52_v6 }
  0x12   :  { %323 = vmatprep.subr.bf16.mxu0 %v138_v52  ;;  %v85_v9 = vld [vmem:[%s721_s1 + $0x1e8] sm:$0xff]  ;;  %v36_v11 = vld [vmem:[%s721_s1 + $0x60] sm:$0xff]  ;;  %v147_v13 = vpack.c.bf16 %v67_v5, %v66_v3  ;;  %v54_v20 = vld [vmem:[%s721_s1 + $0xf0] sm:$0xff] }
  0x13   :  { %344 = vmatpush3.bf16.msra.mxu1 %v145_v51  ;;  %v19_v12 = vld [vmem:[%s722_s0 + $0x8] sm:$0xff]  ;;  %v68_v16 = vld [vmem:[%s721_s1 + $0x160] sm:$0xff]  ;;  %v156_v19 = vpack.c.bf16 %v85_v9, %v84_v8  ;;  %v55_v21 = vld [vmem:[%s721_s1 + $0xf8] sm:$0xff] }
  0x14   :  { %345 = vmatprep.subr.bf16.mxu1 %v154_v56  ;;  %v37_v15 = vld [vmem:[%s721_s1 + $0x68] sm:$0xff]  ;;  %v121_v18 = vpack.c.bf16 %v19_v12, %v19_v12  ;;  %v21_v22 = vld [vmem:[%s722_s0 + $0x18] sm:$0xff]  ;;  %v86_v23 = vld [vmem:[%s721_s1 + $0x1f0] sm:$0xff]  ;;  %v141_v28 = vpack.c.bf16 %v55_v21, %v54_v20 }
  0x15   :  { %324 = vmatpush3.bf16.msra.mxu0 %v130_v62  ;;  %v69_v17 = vld [vmem:[%s721_s1 + $0x168] sm:$0xff]  ;;  %v87_v24 = vld [vmem:[%s721_s1 + $0x1f8] sm:$0xff]  ;;  %v123_v25 = vpack.c.bf16 %v21_v22, %v21_v22  ;;  %v132_v26 = vpack.c.bf16 %v37_v15, %v36_v11  ;;  %v38_v29 = vld [vmem:[%s721_s1 + $0x70] sm:$0xff] }
  0x16   :  { %325 = vmatprep.subr.bf16.mxu0 %v139_v0  ;;  %213 = vmatprep.mubr.bf16.mxu0 %v121_v18  ;;  %v148_v27 = vpack.c.bf16 %v69_v17, %v68_v16  ;;  %v39_v30 = vld [vmem:[%s721_s1 + $0x78] sm:$0xff]  ;;  %v70_v31 = vld [vmem:[%s721_s1 + $0x170] sm:$0xff]  ;;  %v157_v32 = vpack.c.bf16 %v87_v24, %v86_v23  ;;  %v104_v34 = vld [vmem:[%s721_s1 + $0x280] sm:$0xff] }
  0x17   :  { %346 = vmatpush3.bf16.msra.mxu1 %v146_v63  ;;  %v71_v33 = vld [vmem:[%s721_s1 + $0x178] sm:$0xff]  ;;  %v105_v35 = vld [vmem:[%s721_s1 + $0x288] sm:$0xff]  ;;  %253 = vmatprep.mubr.bf16.mxu1 %v123_v25  ;;  %v133_v36 = vpack.c.bf16 %v39_v30, %v38_v29  ;;  %v18_v37 = vld [vmem:[%s722_s0] sm:$0xff] }
  0x18   :  { %347 = vmatprep.subr.bf16.mxu1 %v155_v4  ;;  %v149_v38 = vpack.c.bf16 %v71_v33, %v70_v31  ;;  %v166_v39 = vpack.c.bf16 %v105_v35, %v104_v34  ;;  %v88_v40 = vld [vmem:[%s721_s1 + $0x200] sm:$0xff]  ;;  %v89_v41 = vld [vmem:[%s721_s1 + $0x208] sm:$0xff]  ;;  %v20_v42 = vld [vmem:[%s722_s0 + $0x10] sm:$0xff]  ;;  %v120_v45 = vpack.c.bf16 %v18_v37, %v18_v37 }
  0x19   :  { %326 = vmatpush3.bf16.msra.mxu0 %v131_v10  ;;  %v106_v43 = vld [vmem:[%s721_s1 + $0x290] sm:$0xff]  ;;  %v107_v44 = vld [vmem:[%s721_s1 + $0x298] sm:$0xff]  ;;  %v158_v46 = vpack.c.bf16 %v89_v41, %v88_v40  ;;  %v122_v47 = vpack.c.bf16 %v20_v42, %v20_v42  ;;  %v23_v51 = vld [vmem:[%s722_s0 + $0x28] sm:$0xff] }
  0x1a   :  { %327 = vmatprep.subr.bf16.mxu0 %v140_v14  ;;  %v167_v48 = vpack.c.bf16 %v107_v44, %v106_v43  ;;  %v90_v49 = vld [vmem:[%s721_s1 + $0x210] sm:$0xff]  ;;  %v91_v50 = vld [vmem:[%s721_s1 + $0x218] sm:$0xff]  ;;  %v108_v52 = vld [vmem:[%s721_s1 + $0x2a0] sm:$0xff]  ;;  %v125_v54 = vpack.c.bf16 %v23_v51, %v23_v51 }
  0x1b   :  { %348 = vmatpush3.bf16.msra.mxu1 %v147_v13  ;;  %v109_v53 = vld [vmem:[%s721_s1 + $0x2a8] sm:$0xff]  ;;  %v159_v55 = vpack.c.bf16 %v91_v50, %v90_v49  ;;  %v92_v57 = vld [vmem:[%s721_s1 + $0x220] sm:$0xff]  ;;  %v110_v59 = vld [vmem:[%s721_s1 + $0x2b0] sm:$0xff] }
  0x1c   :  { %349 = vmatprep.subr.bf16.mxu1 %v156_v19  ;;  %v168_v56 = vpack.c.bf16 %v109_v53, %v108_v52  ;;  %v93_v58 = vld [vmem:[%s721_s1 + $0x228] sm:$0xff]  ;;  %v111_v60 = vld [vmem:[%s721_s1 + $0x2b8] sm:$0xff]  ;;  %v94_v63 = vld [vmem:[%s721_s1 + $0x230] sm:$0xff] }
  0x1d   :  { %328 = vmatpush3.bf16.msra.mxu0 %v132_v26  ;;  %v160_v61 = vpack.c.bf16 %v93_v58, %v92_v57  ;;  %v169_v62 = vpack.c.bf16 %v111_v60, %v110_v59  ;;  %v95_v0 = vld [vmem:[%s721_s1 + $0x238] sm:$0xff]  ;;  %v112_v1 = vld [vmem:[%s721_s1 + $0x2c0] sm:$0xff]  ;;  %v113_v2 = vld [vmem:[%s721_s1 + $0x2c8] sm:$0xff] }
  0x1e   :  { %329 = vmatprep.subr.bf16.mxu0 %v141_v28  ;;  %v161_v3 = vpack.c.bf16 %v95_v0, %v94_v63  ;;  %v170_v4 = vpack.c.bf16 %v113_v2, %v112_v1  ;;  %v96_v5 = vld [vmem:[%s721_s1 + $0x240] sm:$0xff]  ;;  %v97_v6 = vld [vmem:[%s721_s1 + $0x248] sm:$0xff]  ;;  %v114_v7 = vld [vmem:[%s721_s1 + $0x2d0] sm:$0xff] }
  0x1f   :  { %350 = vmatpush3.bf16.msra.mxu1 %v148_v27  ;;  %v115_v8 = vld [vmem:[%s721_s1 + $0x2d8] sm:$0xff]  ;;  %v162_v9 = vpack.c.bf16 %v97_v6, %v96_v5  ;;  %v98_v11 = vld [vmem:[%s721_s1 + $0x250] sm:$0xff]  ;;  %v116_v13 = vld [vmem:[%s721_s1 + $0x2e0] sm:$0xff] }
  0x20   :  { %351 = vmatprep.subr.bf16.mxu1 %v157_v32  ;;  %v171_v10 = vpack.c.bf16 %v115_v8, %v114_v7  ;;  %v99_v12 = vld [vmem:[%s721_s1 + $0x258] sm:$0xff]  ;;  %v117_v14 = vld [vmem:[%s721_s1 + $0x2e8] sm:$0xff]  ;;  %v100_v17 = vld [vmem:[%s721_s1 + $0x260] sm:$0xff] }
  0x21   :  { %330 = vmatpush3.bf16.msra.mxu0 %v133_v36  ;;  %v163_v15 = vpack.c.bf16 %v99_v12, %v98_v11  ;;  %v172_v16 = vpack.c.bf16 %v117_v14, %v116_v13  ;;  %v101_v18 = vld [vmem:[%s721_s1 + $0x268] sm:$0xff]  ;;  %v118_v19 = vld [vmem:[%s721_s1 + $0x2f0] sm:$0xff]  ;;  %v119_v20 = vld [vmem:[%s721_s1 + $0x2f8] sm:$0xff] }
  0x22   :  { %359 = vmatprep.subr.bf16.mxu0 %v166_v39  ;;  %v164_v21 = vpack.c.bf16 %v101_v18, %v100_v17  ;;  %v173_v22 = vpack.c.bf16 %v119_v20, %v118_v19  ;;  %v102_v23 = vld [vmem:[%s721_s1 + $0x270] sm:$0xff]  ;;  %v103_v24 = vld [vmem:[%s721_s1 + $0x278] sm:$0xff]  ;;  %v22_v26 = vld [vmem:[%s722_s0 + $0x20] sm:$0xff] }
  0x23   :  { %352 = vmatpush3.bf16.msra.mxu1 %v149_v38  ;;  %v165_v25 = vpack.c.bf16 %v103_v24, %v102_v23  ;;  %v124_v27 = vpack.c.bf16 %v22_v26, %v22_v26  ;;  %v314_v29 = vld [vmem:[%s723_s2] ss:$0 sm:$0xff] }
  0x24   :  { %214 = vmatmul.mubr.bf16.vlgmr.msra.gmra.mrb[0].mxu0 %v120_v45  ;;  %v301_v41 = vld [vmem:[%s724_s3] sm:$0xf] }
  0x25   :  { %360 = vmatpush3.bf16.msra.mxu0 %v158_v46  ;;  %293 = vmatprep.mubr.bf16.mxu0 %v125_v54  ;;  %v303_v42 = vrot.slane %v301_v41, 4 }
  0x26   :  { %254 = vmatmul.mubr.bf16.vlgmr.msra.gmra.mrb[0].mxu1 %v122_v47  ;;  %361 = vmatprep.subr.bf16.mxu0 %v167_v48 }
  0x27   :  { %v306_v47 = vsel %vm305_vm0, %v301_v41, %v303_v42 }
  0x29   :  { %362 = vmatpush3.bf16.msra.mxu0 %v159_v55 }
  0x2a   :  { %363 = vmatprep.subr.bf16.mxu0 %v168_v56 }
  0x2d   :  { %364 = vmatpush3.bf16.msra.mxu0 %v160_v61 }
  0x2e   :  { %365 = vmatprep.subr.bf16.mxu0 %v169_v62 }
  0x31   :  { %366 = vmatpush3.bf16.msra.mxu0 %v161_v3 }
  0x32   :  { %367 = vmatprep.subr.bf16.mxu0 %v170_v4 }
  0x35   :  { %368 = vmatpush3.bf16.msra.mxu0 %v162_v9 }
  0x36   :  { %369 = vmatprep.subr.bf16.mxu0 %v171_v10 }
  0x39   :  { %370 = vmatpush3.bf16.msra.mxu0 %v163_v15 }
  0x3a   :  { %371 = vmatprep.subr.bf16.mxu0 %v172_v16 }
  0x3d   :  { %372 = vmatpush3.bf16.msra.mxu0 %v164_v21 }
  0x3e   :  { %373 = vmatprep.subr.bf16.mxu0 %v173_v22 }
  0x41   :  { %374 = vmatpush3.bf16.msra.mxu0 %v165_v25 }
  0x44   :  { %294 = vmatmul.mubr.bf16.vlgmr.msra.gmra.mrb[4].mxu0 %v124_v27 }
  0xf7   :  { %v331_v28 = vpop.f32.mrb[0].mxu0 }
  0xf8   :  { %v332_v30 = vpop.f32.mrb[1].mxu0 }
  0xf9   :  { %v353_v31 = vpop.f32.mrb[0].mxu1  ;;  %v333_v32 = vadd.f32 %v332_v30, %v331_v28  ;;  %v334_v33 = vpop.f32.mrb[2].mxu0 }
  0xfa   :  { %v354_v34 = vpop.f32.mrb[1].mxu1  ;;  %v335_v35 = vpop.f32.mrb[3].mxu0 }
  0xfb   :  { %v355_v36 = vadd.f32 %v354_v34, %v353_v31  ;;  %v356_v37 = vpop.f32.mrb[2].mxu1  ;;  %v216_v38 = vadd.f32 %v333_v32, %v314_v29 }
  0xfc   :  { %v357_v39 = vpop.f32.mrb[3].mxu1 }
  0xfd   :  { %v256_v40 = vadd.f32 %v355_v36, %v216_v38 }
 0x117   :  { %v375_v43 = vpop.f32.mrb[4].mxu0 }
 0x118   :  { %v376_v44 = vpop.f32.mrb[5].mxu0 }
 0x119   :  { %v377_v45 = vadd.f32 %v376_v44, %v375_v43  ;;  %v378_v46 = vpop.f32.mrb[6].mxu0 }
 0x11a   :  { %v379_v48 = vpop.f32.mrb[7].mxu0 }
 0x11b   :  { %v296_v49 = vadd.f32 %v377_v45, %v256_v40 }
 0x11d   :  { %v307_v50 = vadd.f32 %v306_v47, %v296_v49 }
 0x11f   :  { %309 = vst.msk [vmem:[%s725_s4] sm:$0xff] %vm308_vm1, %v307_v50 }

// kernel: image_caption_forward.6
= control target key start
LH: loop header
LB: loop body
LE: loop exit
PB: predicated region body
PF: predicated region fallthrough
CT: control target
= control target key end

     0   :  { %v1970_v0 = vmov 0.0   ;;  %vm1971_vm0 = vmmov 0   ;;  %vm93_vm1 = vcmask 261120   ;;  %v1972_v15 = vmov 0   ;;  %s2542_s3 = inlined_call_operand.vmem [shape: f32[4,32,8], index: 3, kind: input, shape index: {}]   ;;  %s2543_s0 = inlined_call_operand.vmem [shape: f32[8,32], index: 0, kind: input, shape index: {}]   ;;  %s2544_s5 = inlined_call_operand.vmem [shape: f32[4,32,8], index: 5, kind: input, shape index: {}]   ;;  %s2545_s1 = inlined_call_operand.vmem [shape: f32[8,1], index: 1, kind: input, shape index: {}]   ;;  %s2546_s6 = inlined_call_operand.vmem [shape: f32[4,1,8], index: 6, kind: input, shape index: {}]   ;;  %s2547_s4 = inlined_call_operand.vmem [shape: f32[4,1,8], index: 4, kind: input, shape index: {}]   ;;  %s2548_s7 = inlined_call_operand.vmem [shape: f32[4,32,8], index: 7, kind: input, shape index: {}]   ;;  %s2549_s2 = inlined_call_operand.vmem [shape: f32[1,8], index: 2, kind: input, shape index: {}]   ;;  %s2550_s8 = inlined_call_operand.vmem [shape: f32[4,1,8], index: 8, kind: input, shape index: {}]   ;;  %s2551_s9 = inlined_call_operand.vmem [shape: f32[4,8,32], index: 9, kind: input, shape index: {}]   ;;  %s2552_s10 = inlined_call_operand.vmem [shape: f32[1,32], index: 10, kind: input, shape index: {}]   ;;  %s2553_s13 = inlined_call_operand.vmem [shape: f32[32,128], index: 13, kind: input, shape index: {}]   ;;  %s2554_s15 = inlined_call_operand.vmem [shape: f32[128,32], index: 15, kind: input, shape index: {}]   ;;  %s2555_s11 = inlined_call_operand.vmem [shape: f32[1,32], index: 11, kind: input, shape index: {}]   ;;  %s2556_s12 = inlined_call_operand.vmem [shape: f32[1,32], index: 12, kind: input, shape index: {}]   ;;  %s2557_s14 = inlined_call_operand.vmem [shape: f32[1,128], index: 14, kind: input, shape index: {}]   ;;  %s2558_s16 = inlined_call_operand.vmem [shape: f32[1,32], index: 16, kind: input, shape index: {}]   ;;  %s2559_s17 = inlined_call_operand.vmem [shape: f32[1,32], index: 17, kind: input, shape index: {}]   ;;  %s2560_s18 = inlined_call_operand.vmem [shape: f32[1,32], index: 18, kind: input, shape index: {}]   ;;  %s2561_s19 = inlined_call_operand.vmem [shape: f32[8,32], index: 19, kind: output, shape index: {}]  }
   0x1   :  { %2564 = sst [smem:[#allocation2_spill]] %s2542_s3  ;;  %1749 = vmatprep.subr.bf16.mxu0 %v1970_v0  ;;  %1753 = vmatprep.mubr.msk.bf16.mxu0 %vm1971_vm0, %v1970_v0  ;;  %v1587_v21 = vld [vmem:[%s2546_s6] ss:$0 sm:$0xff]  ;;  %vm245_vm2 = vcmask 64512   ;;  %v191_v33 = vld [vmem:[%s2548_s7 + $0x8] sm:$0xff]  ;;  %v192_v34 = vld [vmem:[%s2548_s7 + $0x10] sm:$0xff] }
   0x2   :  { %2565 = sst [smem:[#allocation3_spill]] %s2543_s0  ;;  %s2568_s20 = sld [smem:[#allocation2_spill]]  ;;  %1773 = vmatprep.subr.bf16.mxu1 %v1970_v0  ;;  %1775 = vmatprep.mubr.msk.bf16.mxu1 %vm1971_vm0, %v1970_v0  ;;  %v1585_v28 = vld [vmem:[%s2547_s4] ss:$0 sm:$0xff]  ;;  %v193_v36 = vld [vmem:[%s2548_s7 + $0x18] sm:$0xff]  ;;  %vm310_vm4 = vcmask 1043456  }
   0x3   :  { %2566 = sst [smem:[#allocation4_spill]] %s2544_s5  ;;  %s2569_s26 = sld [smem:[#allocation3_spill]]  ;;  %1949 = vset.pattern.permute.xlu0 %v1972_v15  ;;  %v190_v32 = vld [vmem:[%s2548_s7] sm:$0xff]  ;;  %v195_v37 = vpack.c.bf16 %v193_v36, %v192_v34  ;;  %v1973_v40 = vmov -1e+09  }
   0x4   :  { %2567 = sst [smem:[#allocation5_spill]] %s2545_s1  ;;  %s2570_s29 = sld [smem:[#allocation4_spill]]  ;;  %v194_v35 = vpack.c.bf16 %v191_v33, %v190_v32  ;;  %v1584_v38 = vld [vmem:[%s2549_s2] ss:$0 sm:$0xff] }
   0x5   :  { %s2571_s25 = sld [smem:[#allocation5_spill]]  ;;  %v1589_v57 = vld [vmem:[%s2550_s8] ss:$0 sm:$0xff] }
   0x6   :  { %v1607_v36 = vld [vmem:[%s2548_s7 + $0x20] sm:$0xff] }
   0x8   :  { %v79_v1 = vld [vmem:[%s2568_s20] sm:$0xff]  ;;  %v80_v2 = vld [vmem:[%s2568_s20 + $0x8] sm:$0xff]  ;;  %v81_v3 = vld [vmem:[%s2568_s20 + $0x10] sm:$0xff] }
   0x9   :  { %v84_v4 = vpack.c.bf16 %v80_v2, %v79_v1  ;;  %v82_v5 = vld [vmem:[%s2568_s20 + $0x18] sm:$0xff]  ;;  %v2095_v7 = vld [vmem:[%s2569_s26] sm:$0xff]  ;;  %v1594_v63 = vld [vmem:[%s2568_s20 + $0x28] sm:$0xff] }
   0xa   :  { %v85_v6 = vpack.c.bf16 %v82_v5, %v81_v3  ;;  %v137_v8 = vld [vmem:[%s2570_s29] sm:$0xff]  ;;  %v138_v9 = vld [vmem:[%s2570_s29 + $0x8] sm:$0xff]  ;;  %v2106_v10 = vpack.c.bf16 %v2095_v7, %v2095_v7  ;;  %v139_v12 = vld [vmem:[%s2570_s29 + $0x10] sm:$0xff] }
   0xb   :  { %1750 = vmatpush3.bf16.msra.mxu0 %v84_v4  ;;  %v141_v11 = vpack.c.bf16 %v138_v9, %v137_v8  ;;  %v140_v13 = vld [vmem:[%s2570_s29 + $0x18] sm:$0xff]  ;;  %v64_v16 = vld [vmem:[%s2571_s25] sm:$0xff]  ;;  %v1595_v2 = vld [vmem:[%s2568_s20 + $0x30] sm:$0xff] }
   0xc   :  { %1751 = vmatprep.subr.bf16.mxu0 %v1970_v0  ;;  %v142_v14 = vpack.c.bf16 %v140_v13, %v139_v12  ;;  %68 = vperm.xlu0 %1949, %v64_v16   ;;  %v1593_v62 = vld [vmem:[%s2568_s20 + $0x20] sm:$0xff]  ;;  %v1596_v3 = vld [vmem:[%s2568_s20 + $0x38] sm:$0xff]  ;;  %v1601_v8 = vld [vmem:[%s2570_s29 + $0x28] sm:$0xff] }
   0xd   :  { %v362_v1 = vpack.c.bf16 %v1594_v63, %v1593_v62  ;;  %v363_v4 = vpack.c.bf16 %v1596_v3, %v1595_v2  ;;  %v1603_v15 = vld [vmem:[%s2570_s29 + $0x38] sm:$0xff]  ;;  %v1616_v63 = vld [vmem:[%s2551_s9 + $0x8] sm:$0xff] }
   0xf   :  { %1752 = vmatpush3.bf16.msra.mxu0 %v85_v6  ;;  %v1600_v6 = vld [vmem:[%s2570_s29 + $0x20] sm:$0xff] }
  0x10   :  { %1757 = vmatprep.subr.bf16.mxu0 %v1970_v0  ;;  %v417_v12 = vpack.c.bf16 %v1601_v8, %v1600_v6 }
  0x12   :  { %1754 = vmatmul.mubr.msk.bf16.vlgmr.msra.gmra.mrb[0].mxu0 %vm93_vm1, %v2106_v10 }
  0x13   :  { %1758 = vmatpush3.bf16.msra.mxu0 %v141_v11  ;;  %1761 = vmatprep.mubr.msk.bf16.mxu0 %vm1971_vm0, %v1970_v0 }
  0x14   :  { %1759 = vmatprep.subr.bf16.mxu0 %v1970_v0 }
  0x17   :  { %1760 = vmatpush3.bf16.msra.mxu0 %v142_v14  ;;  %v1602_v14 = vld [vmem:[%s2570_s29 + $0x30] sm:$0xff] }
  0x18   :  { %1765 = vmatprep.subr.bf16.mxu0 %v1970_v0  ;;  %v418_v16 = vpack.c.bf16 %v1603_v15, %v1602_v14 }
  0x1a   :  { %1762 = vmatmul.mubr.msk.bf16.vlgmr.msra.gmra.mrb[4].mxu0 %vm93_vm1, %v2106_v10 }
  0x1b   :  { %1769 = vmatprep.mubr.msk.bf16.mxu0 %vm1971_vm0, %v1970_v0  ;;  %1766 = vmatpush3.bf16.msra.mxu0 %v194_v35 }
  0x1c   :  { %1767 = vmatprep.subr.bf16.mxu0 %v1970_v0 }
  0x1f   :  { %1768 = vmatpush3.bf16.msra.mxu0 %v195_v37  ;;  %v1608_v37 = vld [vmem:[%s2548_s7 + $0x28] sm:$0xff] }
  0x20   :  { %1779 = vmatprep.subr.bf16.mxu0 %v1970_v0 }
  0x22   :  { %1770 = vmatmul.mubr.msk.bf16.vlgmr.msra.gmra.mrb[8].mxu0 %vm93_vm1, %v2106_v10 }
  0x23   :  { %1781 = vmatprep.mubr.msk.bf16.mxu0 %vm1971_vm0, %v1970_v0 }
  0x8b   :  { %v69_v39 = vpop.permute.xlu0 %68 }
  0x8c   :  { %vm77_vm3 = vcmp.eq.f32.partialorder %v69_v39, %v1584_v38  ;;  %v1609_v38 = vld [vmem:[%s2548_s7 + $0x30] sm:$0xff]  ;;  %v472_v39 = vpack.c.bf16 %v1608_v37, %v1607_v36 }
  0x8d   :  { %v2160_v41 = vsel %vm77_vm3, 0.0, %v1973_v40  ;;  %v1610_v40 = vld [vmem:[%s2548_s7 + $0x38] sm:$0xff] }
  0xe5   :  { %v131_v17 = vpop.f32.mrb[0].mxu0 }
  0xe6   :  { %v1755_v18 = vpop.f32.mrb[1].mxu0  ;;  %v132_v30 = vadd.f32 %v1585_v28, %v131_v17 }
  0xe7   :  { %v134_v19 = vpop.f32.mrb[2].mxu0 }
  0xe8   :  { %v1756_v20 = vpop.f32.mrb[3].mxu0  ;;  %v243_v31 = vpack.c.bf16 %v132_v30, %v132_v30  ;;  %v1598_v30 = vld [vmem:[%s2547_s4 + $0x1] ss:$0 sm:$0xff] }
  0xed   :  { %v184_v22 = vpop.f32.mrb[4].mxu0 }
  0xee   :  { %v185_v23 = vadd.f32 %v1587_v21, %v184_v22  ;;  %v1763_v24 = vpop.f32.mrb[5].mxu0 }
  0xef   :  { %v187_v25 = vpop.f32.mrb[6].mxu0 }
  0xf0   :  { %v244_v26 = vpack.c.bf16 %v185_v23, %v185_v23  ;;  %v1764_v27 = vpop.f32.mrb[7].mxu0  ;;  %v1605_v25 = vld [vmem:[%s2546_s6 + $0x1] ss:$0 sm:$0xff] }
  0xf2   :  { %v250_v29 = vsel %vm245_vm2, %v244_v26, 0 }
  0xf3   :  { %1774 = vmatpush3.bf16.xpose.msra.mxu1 %v250_v29 }
  0xf4   :  { %1785 = vmatprep.subr.bf16.mxu1 %v1970_v0 }
  0xf5   :  { %v237_v54 = vpop.f32.mrb[8].mxu0 }
  0xf6   :  { %v1771_v55 = vpop.f32.mrb[9].mxu0  ;;  %v238_v59 = vadd.f32 %v1589_v57, %v237_v54 }
  0xf7   :  { %v240_v56 = vpop.f32.mrb[10].mxu0 }
  0xf8   :  { %v1772_v58 = vpop.f32.mrb[11].mxu0  ;;  %v306_v60 = vpack.c.bf16 %v238_v59, %v238_v59 }
  0xfa   :  { %1776 = vmatmul.mubr.msk.bf16.vlgmr.msra.gmra.mrb[0].mxu1 %vm245_vm2, %v243_v31  ;;  %v312_v61 = vsel %vm310_vm4, %v306_v60, 0 }
  0xfb   :  { %1789 = vmatprep.mubr.msk.bf16.mxu1 %vm1971_vm0, %v1970_v0  ;;  %1780 = vmatpush3.bf16.msra.mxu0 %v312_v61 }
  0xfc   :  { %1793 = vmatprep.subr.bf16.mxu0 %v1970_v0  ;;  %1786 = vmatpush3.bf16.msra.mxu1 %v362_v1  ;;  %v634_v1 = vpack.c.bf16 %v1616_v63, %v1616_v63 }
  0xfd   :  { %1787 = vmatprep.subr.bf16.mxu1 %v1970_v0 }
  0xfe   :  { %v639_v2 = vsel %vm310_vm4, %v634_v1, 0 }
 0x100   :  { %1788 = vmatpush3.bf16.msra.mxu1 %v363_v4  ;;  %v354_v4 = vld [vmem:[%s2551_s9] sm:$0xff] }
 0x101   :  { %1801 = vmatprep.subr.bf16.mxu1 %v1970_v0 }
 0x103   :  { %1790 = vmatmul.mubr.msk.bf16.vlgmr.msra.gmra.mrb[4].mxu1 %vm93_vm1, %v2106_v10 }
 0x104   :  { %1805 = vmatprep.mubr.msk.bf16.mxu1 %vm1971_vm0, %v1970_v0  ;;  %1802 = vmatpush3.bf16.msra.mxu1 %v472_v39 }
 0x105   :  { %1803 = vmatprep.subr.bf16.mxu1 %v1970_v0 }
 0x1cd   :  { %v286_v42 = vpop.f32.mrb[0].mxu1 }
 0x1ce   :  { %v292_v43 = vmul.f32 0.35355338, %v286_v42  ;;  %v1777_v44 = vpop.f32.mrb[1].mxu1  ;;  %v473_v42 = vpack.c.bf16 %v1610_v40, %v1609_v38 }
 0x1cf   :  { %v289_v45 = vpop.f32.mrb[2].mxu1 }
 0x1d0   :  { %v1778_v46 = vpop.f32.mrb[3].mxu1  ;;  %v293_v47 = vadd.f32 %v292_v43, %v2160_v41  ;;  %1804 = vmatpush3.bf16.msra.mxu1 %v473_v42 }
 0x1d1   :  { %1815 = vmatprep.subr.bf16.mxu1 %v1970_v0 }
 0x1d2   :  { %v294_v48 = vsel %vm245_vm2, %v293_v47, -inf }
 0x1d3   :  { %295 = vmax.xlane.f32.xlu0 %v294_v48  ;;  %1806 = vmatmul.mubr.msk.bf16.vlgmr.msra.gmra.mrb[8].mxu1 %vm93_vm1, %v2106_v10 }
 0x1d4   :  { %1817 = vmatprep.mubr.msk.bf16.mxu1 %vm1971_vm0, %v1970_v0 }
 0x1d6   :  { %v406_v17 = vpop.f32.mrb[4].mxu1 }
 0x1d7   :  { %v1791_v18 = vpop.f32.mrb[5].mxu1  ;;  %v407_v34 = vadd.f32 %v1598_v30, %v406_v17  ;;  %v1629_v17 = vld [vmem:[%s2570_s29 + $0x58] sm:$0xff] }
 0x1d8   :  { %v409_v19 = vpop.f32.mrb[6].mxu1 }
 0x1d9   :  { %v1792_v20 = vpop.f32.mrb[7].mxu1  ;;  %v522_v35 = vpack.c.bf16 %v407_v34, %v407_v34  ;;  %v1619_v19 = vld [vmem:[%s2568_s20 + $0x40] sm:$0xff] }
 0x1da   :  { %v1620_v20 = vld [vmem:[%s2568_s20 + $0x48] sm:$0xff]  ;;  %v1631_v34 = vld [vmem:[%s2546_s6 + $0x2] ss:$0 sm:$0xff] }
 0x260   :  { %v296_v49 = vpop.xlane.xlu0 %295 }
 0x261   :  { %v297_v50 = vsub.f32 %v293_v47, %v296_v49 }
 0x263   :  { %v298_v51 = vmul.f32 1.442695, %v297_v50  ;;  %v1612_v50 = vld [vmem:[%s2550_s8 + $0x1] ss:$0 sm:$0xff] }
 0x265   :  { %1950 = vpow2.f32 %v298_v51 }
 0x26f   :  { %v1951_v52 = vpop.eup %1950 }
 0x270   :  { %v300_v53 = vsel %vm245_vm2, %v1951_v52, 0.0 }
 0x271   :  { %301 = vadd.xlane.f32.xlu1 %v300_v53 }
 0x2a6   :  { %v516_v51 = vpop.f32.mrb[8].mxu1 }
 0x2a7   :  { %v1807_v53 = vpop.f32.mrb[9].mxu1 }
 0x2a8   :  { %v519_v54 = vpop.f32.mrb[10].mxu1 }
 0x2a9   :  { %v1808_v56 = vpop.f32.mrb[11].mxu1 }
 0x2aa   :  { %v1634_v56 = vld [vmem:[%s2548_s7 + $0x48] sm:$0xff] }
 0x2fe   :  { %v302_v5 = vpop.xlane.xlu1 %301 }
 0x2ff   :  { %1952 = vrcp.f32 %v302_v5  ;;  %v356_v5 = vpack.c.bf16 %v354_v4, %v354_v4 }
 0x309   :  { %v1953_v9 = vpop.eup %1952 }
 0x30a   :  { %v304_v11 = vmul.f32 %v1953_v9, %v1951_v52  ;;  %v517_v52 = vadd.f32 %v1612_v50, %v516_v51 }
 0x30c   :  { %v305_v13 = vpack.c.bf16 %v304_v11, %v304_v11  ;;  %v584_v55 = vpack.c.bf16 %v517_v52, %v517_v52  ;;  %v685_v11 = vsel %vm310_vm4, %v356_v5, 0 }
 0x30e   :  { %1782 = vmatmul.mubr.msk.bf16.vlgmr.msra.gmra.mrb[12].mxu0 %vm245_vm2, %v305_v13  ;;  %v589_v57 = vsel %vm310_vm4, %v584_v55, 0  ;;  %v1627_v13 = vld [vmem:[%s2570_s29 + $0x48] sm:$0xff]  ;;  %v1633_v55 = vld [vmem:[%s2548_s7 + $0x40] sm:$0xff] }
 0x30f   :  { %1794 = vmatpush3.bf16.msra.mxu0 %v417_v12  ;;  %1797 = vmatprep.mubr.msk.bf16.mxu0 %vm1971_vm0, %v1970_v0  ;;  %v1626_v12 = vld [vmem:[%s2570_s29 + $0x40] sm:$0xff] }
 0x310   :  { %1795 = vmatprep.subr.bf16.mxu0 %v1970_v0  ;;  %1816 = vmatpush3.bf16.msra.mxu1 %v589_v57  ;;  %v787_v14 = vpack.c.bf16 %v1627_v13, %v1626_v12  ;;  %v1635_v57 = vld [vmem:[%s2548_s7 + $0x50] sm:$0xff] }
 0x311   :  { %1827 = vmatprep.subr.bf16.mxu1 %v1970_v0 }
 0x313   :  { %1796 = vmatpush3.bf16.msra.mxu0 %v418_v16  ;;  %v1628_v16 = vld [vmem:[%s2570_s29 + $0x50] sm:$0xff] }
 0x314   :  { %1809 = vmatprep.subr.bf16.mxu0 %v1970_v0  ;;  %v788_v18 = vpack.c.bf16 %v1629_v17, %v1628_v16 }
 0x316   :  { %1798 = vmatmul.mubr.msk.bf16.vlgmr.msra.gmra.mrb[16].mxu0 %vm93_vm1, %v2106_v10 }
 0x317   :  { %1811 = vmatprep.mubr.msk.bf16.mxu0 %vm1971_vm0, %v1970_v0 }
 0x3e1   :  { %v2209_v21 = vpop.f32.mrb[12].mxu0 }
 0x3e2   :  { %v1783_v22 = vpop.f32.mrb[13].mxu0  ;;  %v355_v15 = vpack.c.bf16 %v2209_v21, %v2209_v21 }
 0x3e3   :  { %v351_v23 = vpop.f32.mrb[14].mxu0  ;;  %v732_v22 = vpack.c.bf16 %v1620_v20, %v1619_v19  ;;  %v1642_v20 = vld [vmem:[%s2551_s9 + $0x10] sm:$0xff] }
 0x3e4   :  { %v1784_v24 = vpop.f32.mrb[15].mxu0 }
 0x3e9   :  { %v461_v26 = vpop.f32.mrb[16].mxu0 }
 0x3ea   :  { %v462_v27 = vadd.f32 %v1605_v25, %v461_v26  ;;  %v1799_v28 = vpop.f32.mrb[17].mxu0  ;;  %v1621_v25 = vld [vmem:[%s2568_s20 + $0x50] sm:$0xff]  ;;  %v1622_v26 = vld [vmem:[%s2568_s20 + $0x58] sm:$0xff] }
 0x3eb   :  { %v464_v29 = vpop.f32.mrb[18].mxu0 }
 0x3ec   :  { %v523_v31 = vpack.c.bf16 %v462_v27, %v462_v27  ;;  %v1800_v32 = vpop.f32.mrb[19].mxu0  ;;  %v733_v29 = vpack.c.bf16 %v1622_v26, %v1621_v25 }
 0x3ee   :  { %v528_v33 = vsel %vm245_vm2, %v523_v31, 0 }
 0x3ef   :  { %1810 = vmatpush3.bf16.xpose.msra.mxu0 %v528_v33 }
 0x3f0   :  { %1821 = vmatprep.subr.bf16.mxu0 %v1970_v0 }
 0x3f6   :  { %1812 = vmatmul.mubr.msk.bf16.vlgmr.msra.gmra.mrb[20].mxu0 %vm245_vm2, %v522_v35 }
 0x3f7   :  { %1823 = vmatprep.mubr.msk.bf16.mxu0 %vm1971_vm0, %v1970_v0  ;;  %1822 = vmatpush3.bf16.msra.mxu0 %v639_v2 }
 0x3f8   :  { %1833 = vmatprep.subr.bf16.mxu0 %v1970_v0 }
 0x4c9   :  { %v564_v43 = vpop.f32.mrb[20].mxu0 }
 0x4ca   :  { %v570_v44 = vmul.f32 0.35355338, %v564_v43  ;;  %v1813_v45 = vpop.f32.mrb[21].mxu0 }
 0x4cb   :  { %v567_v46 = vpop.f32.mrb[22].mxu0 }
 0x4cc   :  { %v1814_v47 = vpop.f32.mrb[23].mxu0  ;;  %v571_v48 = vadd.f32 %v570_v44, %v2160_v41 }
 0x4ce   :  { %v572_v49 = vsel %vm245_vm2, %v571_v48, -inf }
 0x4cf   :  { %573 = vmax.xlane.f32.xlu1 %v572_v49 }
 0x55c   :  { %v574_v58 = vpop.xlane.xlu1 %573 }
 0x55d   :  { %v575_v59 = vsub.f32 %v571_v48, %v574_v58  ;;  %v1624_v48 = vld [vmem:[%s2547_s4 + $0x2] ss:$0 sm:$0xff]  ;;  %v842_v58 = vpack.c.bf16 %v1634_v56, %v1633_v55  ;;  %v1656_v55 = vld [vmem:[%s2546_s6 + $0x3] ss:$0 sm:$0xff] }
 0x55f   :  { %v576_v60 = vmul.f32 1.442695, %v575_v59  ;;  %v1636_v59 = vld [vmem:[%s2548_s7 + $0x58] sm:$0xff] }
 0x561   :  { %1954 = vpow2.f32 %v576_v60  ;;  %v843_v60 = vpack.c.bf16 %v1636_v59, %v1635_v57 }
 0x56b   :  { %v1955_v61 = vpop.eup %1954 }
 0x56c   :  { %v578_v62 = vsel %vm245_vm2, %v1955_v61, 0.0 }
 0x56d   :  { %579 = vadd.xlane.f32.xlu1 %v578_v62 }
 0x5fa   :  { %v580_v3 = vpop.xlane.xlu1 %579 }
 0x5fb   :  { %1956 = vrcp.f32 %v580_v3 }
 0x605   :  { %v1957_v6 = vpop.eup %1956 }
 0x606   :  { %v582_v8 = vmul.f32 %v1957_v6, %v1955_v61 }
 0x608   :  { %v583_v9 = vpack.c.bf16 %v582_v8, %v582_v8 }
 0x60a   :  { %1818 = vmatmul.mubr.msk.bf16.vlgmr.msra.gmra.mrb[12].mxu1 %vm245_vm2, %v583_v9 }
 0x60b   :  { %1828 = vmatpush3.bf16.msra.mxu1 %v685_v11  ;;  %1829 = vmatprep.mubr.msk.bf16.mxu1 %vm1971_vm0, %v1970_v0 }
 0x60c   :  { %1841 = vmatprep.subr.bf16.mxu1 %v1970_v0 }
 0x612   :  { %1830 = vmatmul.mubr.msk.bf16.vlgmr.msra.gmra.mrb[16].mxu1 %vm245_vm2, %v355_v15  ;;  %v1638_v15 = vld [vmem:[%s2550_s8 + $0x2] ss:$0 sm:$0xff] }
 0x613   :  { %1842 = vmatpush3.bf16.msra.mxu1 %v787_v14  ;;  %1845 = vmatprep.mubr.msk.bf16.mxu1 %vm1971_vm0, %v1970_v0 }
 0x614   :  { %1843 = vmatprep.subr.bf16.mxu1 %v1970_v0 }
 0x617   :  { %1844 = vmatpush3.bf16.msra.mxu1 %v788_v18 }
 0x618   :  { %1857 = vmatprep.subr.bf16.mxu1 %v1970_v0 }
 0x61a   :  { %1846 = vmatmul.mubr.msk.bf16.vlgmr.msra.gmra.mrb[20].mxu1 %vm93_vm1, %v2106_v10 }
 0x61b   :  { %1859 = vmatprep.mubr.msk.bf16.mxu1 %vm1971_vm0, %v1970_v0 }
 0x6dd   :  { %v625_v21 = vpop.f32.mrb[12].mxu1 }
 0x6de   :  { %v633_v23 = vpack.c.bf16 %v625_v21, %v625_v21  ;;  %v1819_v24 = vpop.f32.mrb[13].mxu1  ;;  %v1004_v21 = vpack.c.bf16 %v1642_v20, %v1642_v20 }
 0x6df   :  { %v628_v27 = vpop.f32.mrb[14].mxu1 }
 0x6e0   :  { %v1820_v28 = vpop.f32.mrb[15].mxu1  ;;  %1824 = vmatmul.mubr.msk.bf16.vlgmr.msra.gmra.mrb[24].mxu0 %vm245_vm2, %v633_v23  ;;  %v1644_v27 = vld [vmem:[%s2568_s20 + $0x60] sm:$0xff] }
 0x6e1   :  { %1834 = vmatpush3.bf16.msra.mxu0 %v732_v22  ;;  %1837 = vmatprep.mubr.msk.bf16.mxu0 %vm1971_vm0, %v1970_v0  ;;  %v1009_v22 = vsel %vm310_vm4, %v1004_v21, 0  ;;  %v1645_v28 = vld [vmem:[%s2568_s20 + $0x68] sm:$0xff] }
 0x6e2   :  { %1835 = vmatprep.subr.bf16.mxu0 %v1970_v0 }
 0x6e5   :  { %v721_v30 = vpop.f32.mrb[16].mxu1  ;;  %1836 = vmatpush3.bf16.msra.mxu0 %v733_v29  ;;  %v1057_v29 = vpack.c.bf16 %v1645_v28, %v1644_v27  ;;  %v1667_v28 = vld [vmem:[%s2551_s9 + $0x18] sm:$0xff] }
 0x6e6   :  { %v1831_v31 = vpop.f32.mrb[17].mxu1  ;;  %1849 = vmatprep.subr.bf16.mxu0 %v1970_v0 }
 0x6e7   :  { %v724_v32 = vpop.f32.mrb[18].mxu1  ;;  %v1647_v31 = vld [vmem:[%s2568_s20 + $0x78] sm:$0xff] }
 0x6e8   :  { %v1832_v33 = vpop.f32.mrb[19].mxu1  ;;  %1838 = vmatmul.mubr.msk.bf16.vlgmr.msra.gmra.mrb[28].mxu0 %vm93_vm1, %v2106_v10 }
 0x6e9   :  { %1853 = vmatprep.mubr.msk.bf16.mxu0 %vm1971_vm0, %v1970_v0  ;;  %1850 = vmatpush3.bf16.msra.mxu0 %v842_v58  ;;  %v1651_v33 = vld [vmem:[%s2570_s29 + $0x60] sm:$0xff] }
 0x6ea   :  { %1851 = vmatprep.subr.bf16.mxu0 %v1970_v0 }
 0x6ed   :  { %v831_v35 = vpop.f32.mrb[20].mxu1  ;;  %1852 = vmatpush3.bf16.msra.mxu0 %v843_v60  ;;  %v1649_v60 = vld [vmem:[%s2547_s4 + $0x3] ss:$0 sm:$0xff] }
 0x6ee   :  { %v832_v36 = vadd.f32 %v1631_v34, %v831_v35  ;;  %v1847_v37 = vpop.f32.mrb[21].mxu1  ;;  %1863 = vmatprep.subr.bf16.mxu0 %v1970_v0  ;;  %v1652_v34 = vld [vmem:[%s2570_s29 + $0x68] sm:$0xff] }
 0x6ef   :  { %v834_v38 = vpop.f32.mrb[22].mxu1 }
 0x6f0   :  { %v893_v39 = vpack.c.bf16 %v832_v36, %v832_v36  ;;  %v1848_v40 = vpop.f32.mrb[23].mxu1  ;;  %1854 = vmatmul.mubr.msk.bf16.vlgmr.msra.gmra.mrb[32].mxu0 %vm93_vm1, %v2106_v10  ;;  %v1112_v36 = vpack.c.bf16 %v1652_v34, %v1651_v33 }
 0x6f1   :  { %1865 = vmatprep.mubr.msk.bf16.mxu0 %vm1971_vm0, %v1970_v0  ;;  %v1654_v40 = vld [vmem:[%s2570_s29 + $0x78] sm:$0xff] }
 0x6f2   :  { %v898_v42 = vsel %vm245_vm2, %v893_v39, 0  ;;  %v1653_v39 = vld [vmem:[%s2570_s29 + $0x70] sm:$0xff] }
 0x6f3   :  { %1858 = vmatpush3.bf16.xpose.msra.mxu1 %v898_v42 }
 0x6f4   :  { %1869 = vmatprep.subr.bf16.mxu1 %v1970_v0 }
 0x7b3   :  { %v675_v43 = vpop.f32.mrb[24].mxu0 }
 0x7b4   :  { %v2310_v44 = vadd.f32 %v721_v30, %v675_v43  ;;  %v1825_v45 = vpop.f32.mrb[25].mxu0  ;;  %v1646_v30 = vld [vmem:[%s2568_s20 + $0x70] sm:$0xff] }
 0x7b5   :  { %v678_v46 = vpop.f32.mrb[26].mxu0  ;;  %v1058_v32 = vpack.c.bf16 %v1647_v31, %v1646_v30  ;;  %v1113_v45 = vpack.c.bf16 %v1654_v40, %v1653_v39 }
 0x7b6   :  { %v1826_v47 = vpop.f32.mrb[27].mxu0 }
 0x7bb   :  { %v776_v49 = vpop.f32.mrb[28].mxu0 }
 0x7bc   :  { %v777_v50 = vadd.f32 %v1624_v48, %v776_v49  ;;  %v1839_v51 = vpop.f32.mrb[29].mxu0 }
 0x7bd   :  { %v779_v52 = vpop.f32.mrb[30].mxu0 }
 0x7be   :  { %v892_v53 = vpack.c.bf16 %v777_v50, %v777_v50  ;;  %v1840_v54 = vpop.f32.mrb[31].mxu0 }
 0x7c0   :  { %1860 = vmatmul.mubr.msk.bf16.vlgmr.msra.gmra.mrb[24].mxu1 %vm245_vm2, %v892_v53 }
 0x7c1   :  { %1871 = vmatprep.mubr.msk.bf16.mxu1 %vm1971_vm0, %v1970_v0  ;;  %1870 = vmatpush3.bf16.msra.mxu1 %v1009_v22 }
 0x7c2   :  { %1883 = vmatprep.subr.bf16.mxu1 %v1970_v0 }
 0x7c3   :  { %v886_v12 = vpop.f32.mrb[32].mxu0 }
 0x7c4   :  { %v1855_v13 = vpop.f32.mrb[33].mxu0  ;;  %v887_v17 = vadd.f32 %v1638_v15, %v886_v12 }
 0x7c5   :  { %v889_v14 = vpop.f32.mrb[34].mxu0 }
 0x7c6   :  { %v1856_v16 = vpop.f32.mrb[35].mxu0  ;;  %v954_v18 = vpack.c.bf16 %v887_v17, %v887_v17 }
 0x7c8   :  { %v959_v19 = vsel %vm310_vm4, %v954_v18, 0 }
 0x7c9   :  { %1864 = vmatpush3.bf16.msra.mxu0 %v959_v19 }
 0x7ca   :  { %1875 = vmatprep.subr.bf16.mxu0 %v1970_v0 }
 0x893   :  { %v934_v61 = vpop.f32.mrb[24].mxu1 }
 0x894   :  { %v940_v62 = vmul.f32 0.35355338, %v934_v61  ;;  %v1861_v63 = vpop.f32.mrb[25].mxu1 }
 0x895   :  { %v937_v1 = vpop.f32.mrb[26].mxu1 }
 0x896   :  { %v1862_v2 = vpop.f32.mrb[27].mxu1  ;;  %v941_v3 = vadd.f32 %v940_v62, %v2160_v41 }
 0x897   :  { %v1658_v2 = vld [vmem:[%s2548_s7 + $0x60] sm:$0xff] }
 0x898   :  { %v942_v4 = vsel %vm245_vm2, %v941_v3, -inf }
 0x899   :  { %943 = vmax.xlane.f32.xlu1 %v942_v4  ;;  %v1660_v4 = vld [vmem:[%s2548_s7 + $0x70] sm:$0xff] }
 0x926   :  { %v944_v5 = vpop.xlane.xlu1 %943 }
 0x927   :  { %v945_v6 = vsub.f32 %v941_v3, %v944_v5  ;;  %v1659_v3 = vld [vmem:[%s2548_s7 + $0x68] sm:$0xff] }
 0x928   :  { %v1167_v5 = vpack.c.bf16 %v1659_v3, %v1658_v2  ;;  %v1481_v3 = vld [vmem:[%s2554_s15 + $0x30] sm:$0xff] }
 0x929   :  { %v946_v8 = vmul.f32 1.442695, %v945_v6  ;;  %v1661_v6 = vld [vmem:[%s2548_s7 + $0x78] sm:$0xff] }
 0x92b   :  { %1958 = vpow2.f32 %v946_v8  ;;  %v1168_v8 = vpack.c.bf16 %v1661_v6, %v1660_v4  ;;  %v1482_v4 = vld [vmem:[%s2554_s15 + $0x38] sm:$0xff]  ;;  %v1483_v6 = vld [vmem:[%s2554_s15 + $0x40] sm:$0xff] }
 0x935   :  { %v1959_v9 = vpop.eup %1958 }
 0x936   :  { %v948_v11 = vsel %vm245_vm2, %v1959_v9, 0.0 }
 0x937   :  { %949 = vadd.xlane.f32.xlu1 %v948_v11 }
 0x9c4   :  { %v950_v23 = vpop.xlane.xlu1 %949 }
 0x9c5   :  { %1960 = vrcp.f32 %v950_v23 }
 0x9cf   :  { %v1961_v24 = vpop.eup %1960 }
 0x9d0   :  { %v952_v25 = vmul.f32 %v1961_v24, %v1959_v9  ;;  %v1663_v24 = vld [vmem:[%s2550_s8 + $0x3] ss:$0 sm:$0xff] }
 0x9d2   :  { %v953_v26 = vpack.c.bf16 %v952_v25, %v952_v25 }
 0x9d4   :  { %1866 = vmatmul.mubr.msk.bf16.vlgmr.msra.gmra.mrb[36].mxu0 %vm245_vm2, %v953_v26 }
 0x9d5   :  { %1879 = vmatprep.mubr.msk.bf16.mxu0 %vm1971_vm0, %v1970_v0  ;;  %1876 = vmatpush3.bf16.msra.mxu0 %v1057_v29  ;;  %v1329_v29 = vpack.c.bf16 %v1667_v28, %v1667_v28  ;;  %v1488_v28 = vld [vmem:[%s2554_s15 + $0x68] sm:$0xff] }
 0x9d6   :  { %1877 = vmatprep.subr.bf16.mxu0 %v1970_v0 }
 0x9d7   :  { %v1334_v30 = vsel %vm310_vm4, %v1329_v29, 0 }
 0x9d9   :  { %1878 = vmatpush3.bf16.msra.mxu0 %v1058_v32 }
 0x9da   :  { %1891 = vmatprep.subr.bf16.mxu0 %v1970_v0 }
 0x9dc   :  { %1880 = vmatmul.mubr.msk.bf16.vlgmr.msra.gmra.mrb[40].mxu0 %vm93_vm1, %v2106_v10 }
 0x9dd   :  { %1895 = vmatprep.mubr.msk.bf16.mxu0 %vm1971_vm0, %v1970_v0  ;;  %1892 = vmatpush3.bf16.msra.mxu0 %v1167_v5  ;;  %v1495_v5 = vpack.c.bf16 %v1482_v4, %v1481_v3 }
 0x9de   :  { %1893 = vmatprep.subr.bf16.mxu0 %v1970_v0 }
 0x9e1   :  { %1894 = vmatpush3.bf16.msra.mxu0 %v1168_v8  ;;  %v1484_v8 = vld [vmem:[%s2554_s15 + $0x48] sm:$0xff] }
 0x9e2   :  { %1905 = vmatprep.subr.bf16.mxu0 %v1970_v0 }
 0x9e4   :  { %1896 = vmatmul.mubr.msk.bf16.vlgmr.msra.gmra.mrb[44].mxu0 %vm93_vm1, %v2106_v10 }
 0x9e5   :  { %1907 = vmatprep.mubr.msk.bf16.mxu0 %vm1971_vm0, %v1970_v0 }
 0xaa7   :  { %v995_v35 = vpop.f32.mrb[36].mxu0 }
 0xaa8   :  { %v1003_v37 = vpack.c.bf16 %v995_v35, %v995_v35  ;;  %v1867_v38 = vpop.f32.mrb[37].mxu0 }
 0xaa9   :  { %v998_v42 = vpop.f32.mrb[38].mxu0 }
 0xaaa   :  { %v1868_v43 = vpop.f32.mrb[39].mxu0  ;;  %1872 = vmatmul.mubr.msk.bf16.vlgmr.msra.gmra.mrb[28].mxu1 %vm245_vm2, %v1003_v37  ;;  %v1669_v42 = vld [vmem:[%s2552_s10] ss:$0 sm:$0xff] }
 0xaab   :  { %1884 = vmatpush3.bf16.msra.mxu1 %v1112_v36  ;;  %1887 = vmatprep.mubr.msk.bf16.mxu1 %vm1971_vm0, %v1970_v0 }
 0xaac   :  { %1885 = vmatprep.subr.bf16.mxu1 %v1970_v0 }
 0xaaf   :  { %1886 = vmatpush3.bf16.msra.mxu1 %v1113_v45  ;;  %v1101_v46 = vpop.f32.mrb[40].mxu0 }
 0xab0   :  { %1899 = vmatprep.subr.bf16.mxu1 %v1970_v0  ;;  %v1881_v47 = vpop.f32.mrb[41].mxu0  ;;  %v1102_v63 = vadd.f32 %v1649_v60, %v1101_v46  ;;  %v1477_v60 = vld [vmem:[%s2554_s15 + $0x10] sm:$0xff] }
 0xab1   :  { %v1104_v48 = vpop.f32.mrb[42].mxu0 }
 0xab2   :  { %1888 = vmatmul.mubr.msk.bf16.vlgmr.msra.gmra.mrb[32].mxu1 %vm93_vm1, %v2106_v10  ;;  %v1882_v49 = vpop.f32.mrb[43].mxu0  ;;  %v1217_v1 = vpack.c.bf16 %v1102_v63, %v1102_v63  ;;  %v1479_v63 = vld [vmem:[%s2554_s15 + $0x20] sm:$0xff] }
 0xab3   :  { %1901 = vmatprep.mubr.msk.bf16.mxu1 %vm1971_vm0, %v1970_v0 }
 0xab7   :  { %v1211_v21 = vpop.f32.mrb[44].mxu0 }
 0xab8   :  { %v1897_v22 = vpop.f32.mrb[45].mxu0 }
 0xab9   :  { %v1214_v23 = vpop.f32.mrb[46].mxu0  ;;  %v1670_v22 = vld [vmem:[%s2555_s11] ss:$0 sm:$0xff] }
 0xaba   :  { %v1898_v25 = vpop.f32.mrb[47].mxu0 }
 0xb7d   :  { %v1045_v50 = vpop.f32.mrb[28].mxu1 }
 0xb7e   :  { %v2392_v51 = vadd.f32 %v1045_v50, %v2310_v44  ;;  %v1873_v52 = vpop.f32.mrb[29].mxu1 }
 0xb7f   :  { %v1048_v53 = vpop.f32.mrb[30].mxu1 }
 0xb80   :  { %v1874_v54 = vpop.f32.mrb[31].mxu1 }
 0xb81   :  { %v1417_v54 = vld [vmem:[%s2553_s13] sm:$0xff] }
 0xb85   :  { %v1156_v56 = vpop.f32.mrb[32].mxu1 }
 0xb86   :  { %v1157_v57 = vadd.f32 %v1656_v55, %v1156_v56  ;;  %v1889_v58 = vpop.f32.mrb[33].mxu1  ;;  %v1420_v56 = vld [vmem:[%s2553_s13 + $0x18] sm:$0xff] }
 0xb87   :  { %v1159_v59 = vpop.f32.mrb[34].mxu1  ;;  %v1475_v58 = vld [vmem:[%s2554_s15] sm:$0xff] }
 0xb88   :  { %v1218_v61 = vpack.c.bf16 %v1157_v57, %v1157_v57  ;;  %v1890_v62 = vpop.f32.mrb[35].mxu1  ;;  %v1476_v59 = vld [vmem:[%s2554_s15 + $0x8] sm:$0xff] }
 0xb89   :  { %v1478_v62 = vld [vmem:[%s2554_s15 + $0x18] sm:$0xff] }
 0xb8a   :  { %v1223_v44 = vsel %vm245_vm2, %v1218_v61, 0  ;;  %v1492_v61 = vpack.c.bf16 %v1476_v59, %v1475_v58 }
 0xb8b   :  { %1900 = vmatpush3.bf16.xpose.msra.mxu1 %v1223_v44  ;;  %v1493_v44 = vpack.c.bf16 %v1478_v62, %v1477_v60  ;;  %v1675_v60 = vld [vmem:[%s2559_s17] ss:$0 sm:$0xff] }
 0xb8c   :  { %1911 = vmatprep.subr.bf16.mxu1 %v1970_v0  ;;  %v1676_v62 = vld [vmem:[%s2560_s18] ss:$0 sm:$0xff] }
 0xb92   :  { %1902 = vmatmul.mubr.msk.bf16.vlgmr.msra.gmra.mrb[36].mxu1 %vm245_vm2, %v1217_v1  ;;  %v1480_v1 = vld [vmem:[%s2554_s15 + $0x28] sm:$0xff] }
 0xb93   :  { %1913 = vmatprep.mubr.msk.bf16.mxu1 %vm1971_vm0, %v1970_v0  ;;  %1912 = vmatpush3.bf16.msra.mxu1 %v1334_v30  ;;  %v1494_v2 = vpack.c.bf16 %v1480_v1, %v1479_v63  ;;  %v1489_v30 = vld [vmem:[%s2554_s15 + $0x70] sm:$0xff] }
 0xb94   :  { %1925 = vmatprep.subr.bf16.mxu1 %v1970_v0 }
 0xc65   :  { %v1259_v9 = vpop.f32.mrb[36].mxu1 }
 0xc66   :  { %v1265_v11 = vmul.f32 0.35355338, %v1259_v9  ;;  %v1903_v12 = vpop.f32.mrb[37].mxu1  ;;  %v1496_v9 = vpack.c.bf16 %v1484_v8, %v1483_v6 }
 0xc67   :  { %v1262_v13 = vpop.f32.mrb[38].mxu1  ;;  %v1486_v12 = vld [vmem:[%s2554_s15 + $0x58] sm:$0xff] }
 0xc68   :  { %v1904_v14 = vpop.f32.mrb[39].mxu1  ;;  %v1266_v15 = vadd.f32 %v1265_v11, %v2160_v41  ;;  %v1212_v41 = vadd.f32 %v1663_v24, %v1211_v21  ;;  %v1485_v11 = vld [vmem:[%s2554_s15 + $0x50] sm:$0xff]  ;;  %v1671_v24 = vld [vmem:[%s2556_s12] ss:$0 sm:$0xff] }
 0xc69   :  { %v1497_v13 = vpack.c.bf16 %v1486_v12, %v1485_v11 }
 0xc6a   :  { %v1267_v16 = vsel %vm245_vm2, %v1266_v15, -inf  ;;  %v1279_v26 = vpack.c.bf16 %v1212_v41, %v1212_v41 }
 0xc6b   :  { %1268 = vmax.xlane.f32.xlu1 %v1267_v16 }
 0xc6c   :  { %v1284_v27 = vsel %vm310_vm4, %v1279_v26, 0 }
 0xc6d   :  { %1906 = vmatpush3.bf16.msra.mxu0 %v1284_v27  ;;  %v1487_v27 = vld [vmem:[%s2554_s15 + $0x60] sm:$0xff] }
 0xc6e   :  { %1917 = vmatprep.subr.bf16.mxu0 %v1970_v0  ;;  %v1498_v29 = vpack.c.bf16 %v1488_v28, %v1487_v27 }
 0xcf8   :  { %v1269_v17 = vpop.xlane.xlu1 %1268 }
 0xcf9   :  { %v1270_v18 = vsub.f32 %v1266_v15, %v1269_v17 }
 0xcfb   :  { %v1271_v19 = vmul.f32 1.442695, %v1270_v18 }
 0xcfd   :  { %1962 = vpow2.f32 %v1271_v19 }
 0xd07   :  { %v1963_v20 = vpop.eup %1962 }
 0xd08   :  { %v1273_v10 = vsel %vm245_vm2, %v1963_v20, 0.0 }
 0xd09   :  { %1274 = vadd.xlane.f32.xlu1 %v1273_v10 }
 0xd96   :  { %v1275_v31 = vpop.xlane.xlu1 %1274 }
 0xd97   :  { %1964 = vrcp.f32 %v1275_v31  ;;  %v1490_v31 = vld [vmem:[%s2554_s15 + $0x78] sm:$0xff] }
 0xda1   :  { %v1965_v32 = vpop.eup %1964 }
 0xda2   :  { %v1277_v33 = vmul.f32 %v1965_v32, %v1963_v20  ;;  %v1499_v32 = vpack.c.bf16 %v1490_v31, %v1489_v30 }
 0xda4   :  { %v1278_v34 = vpack.c.bf16 %v1277_v33, %v1277_v33  ;;  %v1672_v33 = vld [vmem:[%s2557_s14] ss:$0 sm:$0xff] }
 0xda6   :  { %1908 = vmatmul.mubr.msk.bf16.vlgmr.msra.gmra.mrb[48].mxu0 %vm245_vm2, %v1278_v34 }
 0xda7   :  { %1921 = vmatprep.mubr.msk.bf16.mxu0 %vm1971_vm0, %v1970_v0 }
 0xe79   :  { %v1320_v35 = vpop.f32.mrb[48].mxu0 }
 0xe7a   :  { %v1328_v36 = vpack.c.bf16 %v1320_v35, %v1320_v35  ;;  %v1909_v37 = vpop.f32.mrb[49].mxu0 }
 0xe7b   :  { %v1323_v38 = vpop.f32.mrb[50].mxu0 }
 0xe7c   :  { %v1910_v39 = vpop.f32.mrb[51].mxu0  ;;  %1914 = vmatmul.mubr.msk.bf16.vlgmr.msra.gmra.mrb[40].mxu1 %vm245_vm2, %v1328_v36 }
 0xe7d   :  { %1941 = vmatprep.mubr.msk.bf16.mxu1 %vm1971_vm0, %v1970_v0  ;;  %1926 = vmatpush3.bf16.msra.mxu1 %v1492_v61 }
 0xe7e   :  { %1927 = vmatprep.subr.bf16.mxu1 %v1970_v0 }
 0xe81   :  { %1928 = vmatpush3.bf16.msra.mxu1 %v1493_v44 }
 0xe82   :  { %1929 = vmatprep.subr.bf16.mxu1 %v1970_v0 }
 0xe85   :  { %1930 = vmatpush3.bf16.msra.mxu1 %v1494_v2 }
 0xe86   :  { %1931 = vmatprep.subr.bf16.mxu1 %v1970_v0 }
 0xe89   :  { %1932 = vmatpush3.bf16.msra.mxu1 %v1495_v5 }
 0xe8a   :  { %1933 = vmatprep.subr.bf16.mxu1 %v1970_v0 }
 0xe8d   :  { %1934 = vmatpush3.bf16.msra.mxu1 %v1496_v9 }
 0xe8e   :  { %1935 = vmatprep.subr.bf16.mxu1 %v1970_v0 }
 0xe91   :  { %1936 = vmatpush3.bf16.msra.mxu1 %v1497_v13 }
 0xe92   :  { %1937 = vmatprep.subr.bf16.mxu1 %v1970_v0 }
 0xe95   :  { %1938 = vmatpush3.bf16.msra.mxu1 %v1498_v29 }
 0xe96   :  { %1939 = vmatprep.subr.bf16.mxu1 %v1970_v0 }
 0xe99   :  { %1940 = vmatpush3.bf16.msra.mxu1 %v1499_v32 }
 0xf4f   :  { %v1370_v40 = vpop.f32.mrb[40].mxu1 }
 0xf50   :  { %v1376_v43 = vadd.f32 %v1370_v40, %v2392_v51  ;;  %v1915_v45 = vpop.f32.mrb[41].mxu1  ;;  %v1418_v51 = vld [vmem:[%s2553_s13 + $0x8] sm:$0xff]  ;;  %v1674_v40 = vld [vmem:[%s2558_s16] ss:$0 sm:$0xff] }
 0xf51   :  { %v1373_v46 = vpop.f32.mrb[42].mxu1  ;;  %v1422_v55 = vpack.c.bf16 %v1418_v51, %v1417_v54 }
 0xf52   :  { %v1384_v47 = vadd.f32 %v1669_v42, %v1376_v43  ;;  %v1916_v48 = vpop.f32.mrb[43].mxu1 }
 0xf53   :  { %1918 = vmatpush3.bf16.msra.mxu0 %v1422_v55 }
 0xf54   :  { %v1385_v49 = vadd.f32 %v1384_v47, %v2095_v7  ;;  %v1419_v7 = vld [vmem:[%s2553_s13 + $0x10] sm:$0xff]  ;;  %1919 = vmatprep.subr.bf16.mxu0 %v1970_v0 }
 0xf55   :  { %v1423_v57 = vpack.c.bf16 %v1420_v56, %v1419_v7 }
 0xf56   :  { %v1388_v50 = vsel %vm93_vm1, %v1385_v49, 0.0  ;;  %v1391_v52 = vmul.f32 %v1385_v49, %v1385_v49 }
 0xf57   :  { %1389 = vadd.xlane.f32.xlu1 %v1388_v50  ;;  %1920 = vmatpush3.bf16.msra.mxu0 %v1423_v57 }
 0xf58   :  { %v1392_v53 = vsel %vm93_vm1, %v1391_v52, 0.0 }
 0xf5b   :  { %1393 = vadd.xlane.f32.xlu1 %v1392_v53 }
 0xfe4   :  { %v1390_v14 = vpop.xlane.xlu1 %1389 }
 0xfe5   :  { %v1395_v15 = vmul.f32 0.03125, %v1390_v14 }
 0xfe7   :  { %v1397_v17 = vmul.f32 %v1395_v15, %v1395_v15  ;;  %v1399_v10 = vsub.f32 %v1385_v49, %v1395_v15 }
 0xfe8   :  { %v1394_v16 = vpop.xlane.xlu1 %1393 }
 0xfe9   :  { %v1396_v18 = vmul.f32 0.03125, %v1394_v16 }
 0xfeb   :  { %v1398_v19 = vsub.f32 %v1396_v18, %v1397_v17 }
 0xfed   :  { %v1400_v20 = vadd.f32 1e-05, %v1398_v19 }
 0xfef   :  { %1966 = vrsqrt.f32 %v1400_v20 }
 0xff9   :  { %v1967_v21 = vpop.eup %1966 }
 0xffa   :  { %v1402_v23 = vmul.f32 %v1967_v21, %v1399_v10 }
 0xffc   :  { %v1409_v25 = vmul.f32 %v1670_v22, %v1402_v23 }
 0xffe   :  { %v1416_v41 = vadd.f32 %v1671_v24, %v1409_v25 }
0x1000   :  { %v1421_v26 = vpack.c.bf16 %v1416_v41, %v1416_v41 }
0x1002   :  { %1922 = vmatmul.mubr.msk.bf16.vlgmr.msra.gmra.mrb[52].mxu0 %vm93_vm1, %v1421_v26 }
0x10d5   :  { %v1468_v34 = vpop.f32.mrb[52].mxu0 }
0x10d6   :  { %v1469_v35 = vadd.f32 %v1672_v33, %v1468_v34  ;;  %v1923_v36 = vpop.f32.mrb[53].mxu0 }
0x10d7   :  { %v1471_v37 = vpop.f32.mrb[54].mxu0 }
0x10d8   :  { %v1474_v38 = vmax.f32 %v1469_v35, 0.0  ;;  %v1924_v0 = vpop.f32.mrb[55].mxu0 }
0x10da   :  { %v1491_v39 = vpack.c.bf16 %v1474_v38, %v1474_v38 }
0x10dc   :  { %1942 = vmatmul.mubr.bf16.vlgmr.msra.gmra.mrb[44].mxu1 %v1491_v39 }
0x11af   :  { %v1541_v42 = vpop.f32.mrb[44].mxu1 }
0x11b0   :  { %v1542_v43 = vadd.f32 %v1674_v40, %v1541_v42  ;;  %v1943_v45 = vpop.f32.mrb[45].mxu1 }
0x11b1   :  { %v1544_v46 = vpop.f32.mrb[46].mxu1 }
0x11b2   :  { %v1547_v47 = vadd.f32 %v1542_v43, %v1416_v41  ;;  %v1944_v48 = vpop.f32.mrb[47].mxu1 }
0x11b4   :  { %v1550_v49 = vsel %vm93_vm1, %v1547_v47, 0.0  ;;  %v1553_v50 = vmul.f32 %v1547_v47, %v1547_v47 }
0x11b5   :  { %1551 = vadd.xlane.f32.xlu0 %v1550_v49 }
0x11b6   :  { %v1554_v52 = vsel %vm93_vm1, %v1553_v50, 0.0 }
0x11b7   :  { %1555 = vadd.xlane.f32.xlu1 %v1554_v52 }
0x1242   :  { %v1552_v53 = vpop.xlane.xlu0 %1551 }
0x1243   :  { %v1557_v54 = vmul.f32 0.03125, %v1552_v53 }
0x1244   :  { %v1556_v51 = vpop.xlane.xlu1 %1555 }
0x1245   :  { %v1559_v55 = vmul.f32 %v1557_v54, %v1557_v54  ;;  %v1558_v7 = vmul.f32 0.03125, %v1556_v51  ;;  %v1561_v58 = vsub.f32 %v1547_v47, %v1557_v54 }
0x1247   :  { %v1560_v56 = vsub.f32 %v1558_v7, %v1559_v55 }
0x1249   :  { %v1562_v57 = vadd.f32 1e-05, %v1560_v56 }
0x124b   :  { %1968 = vrsqrt.f32 %v1562_v57 }
0x1255   :  { %v1969_v59 = vpop.eup %1968 }
0x1256   :  { %v1564_v61 = vmul.f32 %v1969_v59, %v1561_v58 }
0x1258   :  { %v1571_v44 = vmul.f32 %v1675_v60, %v1564_v61 }
0x125a   :  { %v1578_v63 = vadd.f32 %v1676_v62, %v1571_v44 }
0x125c   :  { %1579 = vst.msk [vmem:[%s2561_s19] sm:$0xff] %vm93_vm1, %v1578_v63 }

// kernel: image_caption_forward.9
= control target key start
LH: loop header
LB: loop body
LE: loop exit
PB: predicated region body
PF: predicated region fallthrough
CT: control target
= control target key end

     0   :  { %v137_v3 = vmov 0.0   ;;  %vm138_vm0 = vmmov 0   ;;  %s195_s0 = inlined_call_operand.vmem [shape: f32[16,32], index: 0, kind: input, shape index: {}]   ;;  %s196_s1 = inlined_call_operand.vmem [shape: f32[32,128], index: 1, kind: input, shape index: {}]   ;;  %s197_s2 = inlined_call_operand.vmem [shape: f32[1,128], index: 2, kind: input, shape index: {}]   ;;  %s198_s3 = inlined_call_operand.hbm [shape: f32[16,128], index: 3, kind: output, shape index: {}]  }
   0x1   :  { %v18_v0 = vld [vmem:[%s196_s1] sm:$0xff]  ;;  %v19_v1 = vld [vmem:[%s196_s1 + $0x8] sm:$0xff]  ;;  %v20_v2 = vld [vmem:[%s196_s1 + $0x10] sm:$0xff]  ;;  %100 = vmatprep.subr.bf16.mxu0 %v137_v3  ;;  %104 = vmatprep.mubr.msk.bf16.mxu0 %vm138_vm0, %v137_v3 }
   0x2   :  { %v23_v4 = vpack.c.bf16 %v19_v1, %v18_v0  ;;  %v21_v5 = vld [vmem:[%s196_s1 + $0x18] sm:$0xff] }
   0x3   :  { %8 = vsyncpa [#allocation3], 0  ;;  %v24_v6 = vpack.c.bf16 %v21_v5, %v20_v2  ;;  %v16_v7 = vld [vmem:[%s195_s0] sm:$0xff]  ;;  %v17_v8 = vld [vmem:[%s195_s0 + $0x8] sm:$0xff]  ;;  %vm32_vm1 = vcmask 261120   ;;  %s139_s25 = smov [#allocation2]  }
   0x4   :  { %101 = vmatpush3.bf16.msra.mxu0 %v23_v4  ;;  %v22_v9 = vpack.c.bf16 %v17_v8, %v16_v7  ;;  %v95_v10 = vld [vmem:[%s197_s2] ss:$0 sm:$0xff]  ;;  %s84_s26 = sshll.u32 %s139_s25, 4  ;;  %s85_s26 = int_to_ptr.vmem [resolvable:$true] %s84_s26 }
   0x5   :  { %102 = vmatprep.subr.bf16.mxu0 %v137_v3  ;;  %s113_s0 = scalar_lea.vmem %s85_s26, 256  ;;  %p118_p1 = scmp.lt.s32.totalorder %s85_s26, %s85_s26 }
   0x6   :  { %p114_p0 = scmp.ne.s32.totalorder %s85_s26, %s113_s0  ;;  %p119_p2 = scmp.lt.s32.totalorder %s113_s0, %s113_s0 }
   0x8   :  { %103 = vmatpush3.bf16.msra.mxu0 %v24_v6  ;;  %p120_p3 = por %p119_p2, %p118_p1 }
   0xa   :  { %p121_p4 = pnand %p120_p3, %p114_p0 }
   0xb   :  { %105 = vmatmul.mubr.msk.bf16.vlgmr.msra.gmra.mrb[0].mxu0 %vm32_vm1, %v22_v9 }
  0xde   :  { %v70_v11 = vpop.f32.mrb[0].mxu0 }
  0xdf   :  { %v71_v12 = vadd.f32 %v95_v10, %v70_v11  ;;  %v106_v13 = vpop.f32.mrb[1].mxu0 }
  0xe0   :  { %v73_v14 = vpop.f32.mrb[2].mxu0 }
  0xe1   :  { %77 = vst [vmem:[#allocation2] sm:$0xff] %v71_v12  ;;  %v74_v15 = vadd.f32 %v95_v10, %v73_v14  ;;  %v107_v16 = vpop.f32.mrb[3].mxu0 }
  0xe3   :  { %78 = vst [vmem:[#allocation2 + $0x8] sm:$0xff] %v74_v15 }
  0xe4   :  { %124 = shalt.err (!%p121_p4)
}
  0xe5   :  { %s125_s28 = scalar_lea.hbm %s198_s3, 256 }
  0xe6   :  { %p126_p5 = scmp.ne.s32.totalorder %s198_s3, %s125_s28  ;;  %p129_p6 = scmp.lt.u32.totalorder %s125_s28, %s198_s3 }
  0xe8   :  { %p131_p7 = pnand %p129_p6, %p126_p5 }
  0xea   :  { %134 = shalt.err (!%p131_p7)
}
  0xeb   :  { %s140_s6 = smov 128   ;;  %s141_s7 = smov 8  }
  0xec   :  { %90 = dma.vmem_to_hbm [thread:$0]  %s85_s26, 256, %s198_s3, [#allocation3], %s140_s6, %s140_s6, %s141_s7  }
  0xed   :  { %135 = dma.done.wait [#allocation3], 256  }
  0xee   :  { %136 = vsyncadd [#allocation3], 4294967040 }
  0xef   :  { %94 = vsyncpa [#allocation3], 1 }

// kernel: image_caption_forward.8
= control target key start
LH: loop header
LB: loop body
LE: loop exit
PB: predicated region body
PF: predicated region fallthrough
CT: control target
= control target key end

     0   :  { %v4048_v0 = vmov 0.0   ;;  %s4049_s3 = smov 6   ;;  %vm4050_vm0 = vmmov 0   ;;  %s4051_s10 = smov 8   ;;  %vm185_vm1 = vcmask 261120   ;;  %v4052_v16 = vmov 0   ;;  %s4816_s0 = inlined_call_operand.smem [shape: u32[33], index: -1, kind: input, shape index: {}] }
   0x1   :  { %3568 = vmatprep.subr.bf16.mxu0 %v4048_v0  ;;  %s4093_s6 = sld [smem:[%s4816_s0 + %s4049_s3]]   ;;  %3572 = vmatprep.mubr.msk.bf16.mxu0 %vm4050_vm0, %v4048_v0  ;;  %s4053_s14 = smov 3   ;;  %vm340_vm2 = vcmask 64512   ;;  %v4057_v38 = vmov -1e+09   ;;  %v162_v46 = vlaneseq  ;;  %vm392_vm10 = vcmask 130048  }
   0x2   :  { %s4100_s9 = sld [smem:[%s4816_s0]]   ;;  %3592 = vmatprep.subr.bf16.mxu1 %v4048_v0  ;;  %3594 = vmatprep.mubr.msk.bf16.mxu1 %vm4050_vm0, %v4048_v0  ;;  %s4054_s18 = smov 7   ;;  %vm760_vm11 = vcmask 1043456  }
   0x3   :  { %s4108_s13 = sld [smem:[%s4816_s0 + %s4051_s10]]   ;;  %3968 = vset.pattern.permute.xlu0 %v4052_v16  ;;  %s4055_s22 = smov 9   ;;  %v163_v48 = vshrl.u32 %v162_v46, 7 }
   0x4   :  { %s3225_s17 = sld [smem:[%s4816_s0 + %s4053_s14]]   ;;  %s4056_s26 = smov 5  }
   0x5   :  { %s4141_s21 = sld [smem:[%s4816_s0 + %s4054_s18]]   ;;  %s4058_s30 = smov 10   ;;  %v164_v49 = vsub.s32 0, %v163_v48 }
   0x6   :  { %s4147_s25 = sld [smem:[%s4816_s0 + %s4055_s22]]   ;;  %s4059_s4 = smov 2  }
   0x7   :  { %v171_v1 = vld [vmem:[%s4093_s6] sm:$0xff]  ;;  %v172_v2 = vld [vmem:[%s4093_s6 + $0x8] sm:$0xff]  ;;  %v173_v3 = vld [vmem:[%s4093_s6 + $0x10] sm:$0xff]  ;;  %s4155_s29 = sld [smem:[%s4816_s0 + %s4056_s26]]   ;;  %s4060_s10 = smov 4  }
   0x8   :  { %v176_v4 = vpack.c.bf16 %v172_v2, %v171_v1  ;;  %v174_v5 = vld [vmem:[%s4093_s6 + $0x18] sm:$0xff]  ;;  %v135_v7 = vld [vmem:[%s4100_s9] sm:$0xff]  ;;  %v136_v8 = vld [vmem:[%s4100_s9 + $0x8] sm:$0xff]  ;;  %s4167_s3 = sld [smem:[%s4816_s0 + %s4058_s30]]   ;;  %s4061_s15 = smov 11  }
   0x9   :  { %v177_v6 = vpack.c.bf16 %v174_v5, %v173_v3  ;;  %v230_v9 = vld [vmem:[%s4108_s13] sm:$0xff]  ;;  %v231_v10 = vld [vmem:[%s4108_s13 + $0x8] sm:$0xff]  ;;  %v4119_v11 = vpack.c.bf16 %v136_v8, %v135_v7  ;;  %v232_v13 = vld [vmem:[%s4108_s13 + $0x10] sm:$0xff]  ;;  %s3224_s8 = sld [smem:[%s4816_s0 + %s4059_s4]]   ;;  %s4062_s19 = smov 12  }
   0xa   :  { %3569 = vmatpush3.bf16.msra.mxu0 %v176_v4  ;;  %v234_v12 = vpack.c.bf16 %v231_v10, %v230_v9  ;;  %v233_v14 = vld [vmem:[%s4108_s13 + $0x18] sm:$0xff]  ;;  %v138_v17 = vld [vmem:[%s3225_s17] sm:$0xff]  ;;  %v139_v18 = vld [vmem:[%s3225_s17 + $0x8] sm:$0xff]  ;;  %s3226_s14 = sld [smem:[%s4816_s0 + %s4060_s10]]   ;;  %s4065_s28 = smov 1  }
   0xb   :  { %3570 = vmatprep.subr.bf16.mxu0 %v4048_v0  ;;  %v235_v15 = vpack.c.bf16 %v233_v14, %v232_v13  ;;  %143 = vperm.xlu0 %3968, %v138_v17   ;;  %v3256_v19 = vld [vmem:[%s4141_s21] ss:$0 sm:$0xff]  ;;  %s4204_s18 = sld [smem:[%s4816_s0 + %s4061_s15]]   ;;  %s4075_s11 = smov 26  }
   0xc   :  { %v3258_v27 = vld [vmem:[%s4147_s25] ss:$0 sm:$0xff]  ;;  %s4265_s23 = sld [smem:[%s4816_s0 + %s4062_s19]]   ;;  %s4076_s16 = smov 28  }
   0xd   :  { %v3343_v36 = vld [vmem:[%s4155_s29] ss:$0 sm:$0xff]  ;;  %s3223_s2 = sld [smem:[%s4816_s0 + %s4065_s28]]   ;;  %s4077_s20 = smov 24  }
   0xe   :  { %3571 = vmatpush3.bf16.msra.mxu0 %v177_v6  ;;  %v284_v40 = vld [vmem:[%s4167_s3] sm:$0xff]  ;;  %v285_v41 = vld [vmem:[%s4167_s3 + $0x8] sm:$0xff]  ;;  %v286_v42 = vld [vmem:[%s4167_s3 + $0x10] sm:$0xff]  ;;  %s3248_s15 = sld [smem:[%s4816_s0 + %s4075_s11]]   ;;  %s4080_s30 = smov 29  }
   0xf   :  { %3576 = vmatprep.subr.bf16.mxu0 %v4048_v0  ;;  %148 = vperm.xlu0 %3968, %v139_v18   ;;  %v288_v43 = vpack.c.bf16 %v285_v41, %v284_v40  ;;  %v287_v44 = vld [vmem:[%s4167_s3 + $0x18] sm:$0xff]  ;;  %v159_v47 = vld [vmem:[%s3224_s8] sm:$0x1]  ;;  %v3273_v40 = vld [vmem:[%s4108_s13 + $0x30] sm:$0xff]  ;;  %s4067_s8 = smov 14   ;;  %s4761_s19 = sld [smem:[%s4816_s0 + %s4076_s16]]  }
  0x10   :  { %v289_v45 = vpack.c.bf16 %v287_v44, %v286_v42  ;;  %vm160_vm4 = vcmp.gt.f32.partialorder %v159_v47, 0.5  ;;  %v3255_v52 = vld [vmem:[%s3226_s14] ss:$0 sm:$0xff]  ;;  %v3274_v41 = vld [vmem:[%s4108_s13 + $0x38] sm:$0xff]  ;;  %s3236_s12 = sld [smem:[%s4816_s0 + %s4067_s8]]   ;;  %s4068_s14 = smov 15  }
  0x11   :  { %3573 = vmatmul.mubr.msk.bf16.vlgmr.msra.gmra.mrb[0].mxu0 %vm185_vm1, %v4119_v11  ;;  %v161_v50 = vsel %vm160_vm4, 1, %v4052_v16  ;;  %v3260_v17 = vld [vmem:[%s4204_s18] ss:$0 sm:$0xff]  ;;  %v526_v42 = vpack.c.bf16 %v3274_v41, %v3273_v40  ;;  %s3237_s17 = sld [smem:[%s4816_s0 + %s4068_s14]]   ;;  %s4081_s4 = smov 30  }
  0x12   :  { %3577 = vmatpush3.bf16.msra.mxu0 %v234_v12  ;;  %3580 = vmatprep.mubr.msk.bf16.mxu0 %vm4050_vm0, %v4048_v0  ;;  %v165_v51 = vrot.slane %v161_v50, %v164_v49  ;;  %s4082_s8 = smov 31   ;;  %s4083_s14 = smov 32  }
  0x13   :  { %3578 = vmatprep.subr.bf16.mxu0 %v4048_v0 }
  0x14   :  { %vm166_vm5 = vcmp.eq.s32.totalorder %v165_v51, 1 }
  0x16   :  { %3579 = vmatpush3.bf16.msra.mxu0 %v235_v15 }
  0x17   :  { %3584 = vmatprep.subr.bf16.mxu0 %v4048_v0 }
  0x19   :  { %3581 = vmatmul.mubr.msk.bf16.vlgmr.msra.gmra.mrb[4].mxu0 %vm185_vm1, %v4119_v11 }
  0x1a   :  { %3588 = vmatprep.mubr.msk.bf16.mxu0 %vm4050_vm0, %v4048_v0  ;;  %3585 = vmatpush3.bf16.msra.mxu0 %v288_v43  ;;  %v3269_v43 = vld [vmem:[%s4141_s21 + $0x1] ss:$0 sm:$0xff] }
  0x1b   :  { %3586 = vmatprep.subr.bf16.mxu0 %v4048_v0 }
  0x1e   :  { %3587 = vmatpush3.bf16.msra.mxu0 %v289_v45 }
  0x1f   :  { %3598 = vmatprep.subr.bf16.mxu0 %v4048_v0 }
  0x21   :  { %3589 = vmatmul.mubr.msk.bf16.vlgmr.msra.gmra.mrb[8].mxu0 %vm185_vm1, %v4119_v11 }
  0x22   :  { %3600 = vmatprep.mubr.msk.bf16.mxu0 %vm4050_vm0, %v4048_v0 }
  0x8a   :  { %v144_v37 = vpop.permute.xlu0 %143 }
  0x8b   :  { %vm1602_vm3 = vcmp.eq.f32.partialorder %v144_v37, %v3343_v36  ;;  %vm157_vm6 = vcmp.eq.f32.partialorder %v144_v37, %v3255_v52 }
  0x8c   :  { %v4162_v39 = vsel %vm1602_vm3, 0.0, %v4057_v38  ;;  %vm167_vm7 = vmand %vm157_vm6, %vm166_vm5 }
  0x8d   :  { %v4190_v54 = vsel %vm167_vm7, 0.0, %v4057_v38 }
  0x8e   :  { %v4186_v53 = vpop.permute.xlu0 %148 }
  0x8f   :  { %vm158_vm8 = vcmp.eq.f32.partialorder %v4186_v53, %v3255_v52 }
  0x90   :  { %vm168_vm9 = vmand %vm158_vm8, %vm166_vm5 }
  0x91   :  { %v4194_v62 = vsel %vm168_vm9, 0.0, %v4057_v38 }
  0xe4   :  { %v223_v20 = vpop.f32.mrb[0].mxu0 }
  0xe5   :  { %v3574_v21 = vpop.f32.mrb[1].mxu0  ;;  %v224_v23 = vadd.f32 %v3256_v19, %v223_v20 }
  0xe6   :  { %v226_v22 = vpop.f32.mrb[2].mxu0 }
  0xe7   :  { %v227_v24 = vadd.f32 %v3256_v19, %v226_v22  ;;  %v3575_v25 = vpop.f32.mrb[3].mxu0  ;;  %v3264_v22 = vld [vmem:[%s4093_s6 + $0x20] sm:$0xff] }
  0xe8   :  { %v3266_v25 = vld [vmem:[%s4093_s6 + $0x30] sm:$0xff] }
  0xe9   :  { %v338_v26 = vpack.c.bf16 %v227_v24, %v224_v23  ;;  %v3265_v23 = vld [vmem:[%s4093_s6 + $0x28] sm:$0xff] }
  0xea   :  { %v469_v24 = vpack.c.bf16 %v3265_v23, %v3264_v22 }
  0xec   :  { %v277_v28 = vpop.f32.mrb[4].mxu0 }
  0xed   :  { %v3582_v29 = vpop.f32.mrb[5].mxu0  ;;  %v278_v31 = vadd.f32 %v3258_v27, %v277_v28 }
  0xee   :  { %v280_v30 = vpop.f32.mrb[6].mxu0 }
  0xef   :  { %v281_v32 = vadd.f32 %v3258_v27, %v280_v30  ;;  %v3583_v33 = vpop.f32.mrb[7].mxu0 }
  0xf1   :  { %v339_v34 = vpack.c.bf16 %v281_v32, %v278_v31  ;;  %v3271_v31 = vld [vmem:[%s4108_s13 + $0x20] sm:$0xff]  ;;  %v3272_v32 = vld [vmem:[%s4108_s13 + $0x28] sm:$0xff] }
  0xf2   :  { %v525_v36 = vpack.c.bf16 %v3272_v32, %v3271_v31 }
  0xf3   :  { %v345_v35 = vsel %vm340_vm2, %v339_v34, 0 }
  0xf4   :  { %3593 = vmatpush3.bf16.xpose.msra.mxu1 %v345_v35  ;;  %v331_v14 = vpop.f32.mrb[8].mxu0 }
  0xf5   :  { %3604 = vmatprep.subr.bf16.mxu1 %v4048_v0  ;;  %v3590_v15 = vpop.f32.mrb[9].mxu0  ;;  %v332_v19 = vadd.f32 %v3260_v17, %v331_v14 }
  0xf6   :  { %v334_v16 = vpop.f32.mrb[10].mxu0 }
  0xf7   :  { %v3591_v18 = vpop.f32.mrb[11].mxu0  ;;  %v335_v20 = vadd.f32 %v3260_v17, %v334_v16 }
  0xf9   :  { %v416_v21 = vpack.c.bf16 %v335_v20, %v332_v19 }
  0xfb   :  { %3595 = vmatmul.mubr.msk.bf16.vlgmr.msra.gmra.mrb[0].mxu1 %vm340_vm2, %v338_v26  ;;  %3599 = vmatpush3.bf16.msra.mxu0 %v416_v21  ;;  %v3267_v26 = vld [vmem:[%s4093_s6 + $0x38] sm:$0xff] }
  0xfc   :  { %3608 = vmatprep.mubr.msk.bf16.mxu1 %vm4050_vm0, %v4048_v0  ;;  %3612 = vmatprep.subr.bf16.mxu0 %v4048_v0  ;;  %v470_v27 = vpack.c.bf16 %v3267_v26, %v3266_v25 }
  0xfd   :  { %3605 = vmatpush3.bf16.msra.mxu1 %v469_v24 }
  0xfe   :  { %3606 = vmatprep.subr.bf16.mxu1 %v4048_v0 }
 0x101   :  { %3607 = vmatpush3.bf16.msra.mxu1 %v470_v27 }
 0x102   :  { %3620 = vmatprep.subr.bf16.mxu1 %v4048_v0 }
 0x104   :  { %3609 = vmatmul.mubr.msk.bf16.vlgmr.msra.gmra.mrb[4].mxu1 %vm185_vm1, %v4119_v11 }
 0x105   :  { %3624 = vmatprep.mubr.msk.bf16.mxu1 %vm4050_vm0, %v4048_v0 }
 0x1ce   :  { %v381_v55 = vpop.f32.mrb[0].mxu1 }
 0x1cf   :  { %v388_v56 = vmul.f32 0.35355338, %v381_v55  ;;  %v3596_v57 = vpop.f32.mrb[1].mxu1 }
 0x1d0   :  { %v384_v58 = vpop.f32.mrb[2].mxu1 }
 0x1d1   :  { %v389_v59 = vmul.f32 0.35355338, %v384_v58  ;;  %v3597_v60 = vpop.f32.mrb[3].mxu1  ;;  %v390_v61 = vadd.f32 %v388_v56, %v4190_v54  ;;  %v3276_v58 = vld [vmem:[%s4147_s25 + $0x1] ss:$0 sm:$0xff] }
 0x1d3   :  { %v393_v63 = vsel %vm392_vm10, %v390_v61, -inf  ;;  %v391_v1 = vadd.f32 %v389_v59, %v4194_v62 }
 0x1d4   :  { %394 = vmax.xlane.f32.xlu1 %v393_v63 }
 0x1d5   :  { %v396_v2 = vsel %vm392_vm10, %v391_v1, -inf }
 0x1d7   :  { %v513_v44 = vpop.f32.mrb[4].mxu1 }
 0x1d8   :  { %397 = vmax.xlane.f32.xlu1 %v396_v2  ;;  %v514_v45 = vadd.f32 %v3269_v43, %v513_v44  ;;  %v3610_v46 = vpop.f32.mrb[5].mxu1 }
 0x1d9   :  { %v516_v47 = vpop.f32.mrb[6].mxu1 }
 0x1da   :  { %v517_v48 = vadd.f32 %v3269_v43, %v516_v47  ;;  %v3611_v49 = vpop.f32.mrb[7].mxu1  ;;  %v461_v47 = vld [vmem:[%s4265_s23] sm:$0xff] }
 0x1db   :  { %v463_v49 = vpack.c.bf16 %v461_v47, %v461_v47 }
 0x1dc   :  { %v632_v50 = vpack.c.bf16 %v517_v48, %v514_v45 }
 0x261   :  { %v395_v3 = vpop.xlane.xlu1 %394 }
 0x262   :  { %v399_v4 = vsub.f32 %v390_v61, %v395_v3 }
 0x264   :  { %v401_v5 = vmul.f32 1.442695, %v399_v4 }
 0x265   :  { %v398_v6 = vpop.xlane.xlu1 %397 }
 0x266   :  { %3969 = vpow2.f32 %v401_v5  ;;  %v400_v7 = vsub.f32 %v391_v1, %v398_v6  ;;  %v3278_v5 = vld [vmem:[%s4167_s3 + $0x20] sm:$0xff]  ;;  %v3279_v6 = vld [vmem:[%s4167_s3 + $0x28] sm:$0xff] }
 0x268   :  { %v403_v8 = vmul.f32 1.442695, %v400_v7  ;;  %v3280_v7 = vld [vmem:[%s4167_s3 + $0x30] sm:$0xff] }
 0x26a   :  { %3971 = vpow2.f32 %v403_v8  ;;  %v581_v8 = vpack.c.bf16 %v3279_v6, %v3278_v5 }
 0x26c   :  { %3621 = vmatpush3.bf16.msra.mxu1 %v581_v8 }
 0x26d   :  { %3622 = vmatprep.subr.bf16.mxu1 %v4048_v0 }
 0x270   :  { %v3970_v9 = vpop.eup %3969 }
 0x271   :  { %v405_v10 = vsel %vm392_vm10, %v3970_v9, 0.0 }
 0x272   :  { %406 = vadd.xlane.f32.xlu0 %v405_v10 }
 0x274   :  { %v3972_v12 = vpop.eup %3971 }
 0x275   :  { %v408_v13 = vsel %vm392_vm10, %v3972_v12, 0.0 }
 0x276   :  { %409 = vadd.xlane.f32.xlu1 %v408_v13 }
 0x2ff   :  { %v407_v28 = vpop.xlane.xlu0 %406 }
 0x300   :  { %3973 = vrcp.f32 %v407_v28 }
 0x303   :  { %v410_v29 = vpop.xlane.xlu1 %409 }
 0x304   :  { %3975 = vrcp.f32 %v410_v29 }
 0x30a   :  { %v3974_v30 = vpop.eup %3973 }
 0x30b   :  { %v413_v34 = vmul.f32 %v3974_v30, %v3970_v9  ;;  %v3281_v9 = vld [vmem:[%s4167_s3 + $0x38] sm:$0xff] }
 0x30c   :  { %v582_v10 = vpack.c.bf16 %v3281_v9, %v3280_v7  ;;  %v3292_v9 = vld [vmem:[%s4093_s6 + $0x50] sm:$0xff] }
 0x30e   :  { %v3976_v33 = vpop.eup %3975  ;;  %3623 = vmatpush3.bf16.msra.mxu1 %v582_v10  ;;  %v3293_v10 = vld [vmem:[%s4093_s6 + $0x58] sm:$0xff] }
 0x30f   :  { %v414_v35 = vmul.f32 %v3976_v33, %v3972_v12  ;;  %3634 = vmatprep.subr.bf16.mxu1 %v4048_v0 }
 0x311   :  { %v415_v37 = vpack.c.bf16 %v414_v35, %v413_v34  ;;  %3625 = vmatmul.mubr.msk.bf16.vlgmr.msra.gmra.mrb[8].mxu1 %vm185_vm1, %v4119_v11  ;;  %v3283_v35 = vld [vmem:[%s4204_s18 + $0x1] ss:$0 sm:$0xff] }
 0x312   :  { %3636 = vmatprep.mubr.msk.bf16.mxu1 %vm4050_vm0, %v4048_v0 }
 0x313   :  { %3601 = vmatmul.mubr.msk.bf16.vlgmr.msra.gmra.mrb[12].mxu0 %vm392_vm10, %v415_v37 }
 0x314   :  { %3613 = vmatpush3.bf16.msra.mxu0 %v525_v36  ;;  %3616 = vmatprep.mubr.msk.bf16.mxu0 %vm4050_vm0, %v4048_v0 }
 0x315   :  { %3614 = vmatprep.subr.bf16.mxu0 %v4048_v0 }
 0x318   :  { %3615 = vmatpush3.bf16.msra.mxu0 %v526_v42  ;;  %v3287_v42 = vld [vmem:[%s4265_s23 + $0x8] sm:$0xff] }
 0x319   :  { %3628 = vmatprep.subr.bf16.mxu0 %v4048_v0  ;;  %v756_v43 = vpack.c.bf16 %v3287_v42, %v3287_v42  ;;  %v3304_v42 = vld [vmem:[%s4167_s3 + $0x40] sm:$0xff] }
 0x31b   :  { %3617 = vmatmul.mubr.msk.bf16.vlgmr.msra.gmra.mrb[16].mxu0 %vm185_vm1, %v4119_v11  ;;  %v762_v44 = vsel %vm760_vm11, %v756_v43, 0  ;;  %v3305_v43 = vld [vmem:[%s4167_s3 + $0x48] sm:$0xff] }
 0x31c   :  { %3630 = vmatprep.mubr.msk.bf16.mxu0 %vm4050_vm0, %v4048_v0 }
 0x3e4   :  { %v625_v32 = vpop.f32.mrb[8].mxu1 }
 0x3e5   :  { %v3626_v33 = vpop.f32.mrb[9].mxu1  ;;  %v626_v37 = vadd.f32 %v3283_v35, %v625_v32  ;;  %v3295_v32 = vld [vmem:[%s4141_s21 + $0x2] ss:$0 sm:$0xff] }
 0x3e6   :  { %v4232_v51 = vpop.f32.mrb[12].mxu0  ;;  %v628_v34 = vpop.f32.mrb[10].mxu1 }
 0x3e7   :  { %v3602_v52 = vpop.f32.mrb[13].mxu0  ;;  %v3627_v36 = vpop.f32.mrb[11].mxu1  ;;  %v629_v40 = vadd.f32 %v3283_v35, %v628_v34 }
 0x3e8   :  { %v4234_v55 = vpop.f32.mrb[14].mxu0 }
 0x3e9   :  { %v462_v56 = vpack.c.bf16 %v4234_v55, %v4232_v51  ;;  %v3603_v57 = vpop.f32.mrb[15].mxu0  ;;  %v708_v41 = vpack.c.bf16 %v629_v40, %v626_v37  ;;  %v3290_v51 = vld [vmem:[%s4093_s6 + $0x40] sm:$0xff]  ;;  %v3291_v55 = vld [vmem:[%s4093_s6 + $0x48] sm:$0xff] }
 0x3ea   :  { %v857_v6 = vpack.c.bf16 %v3291_v55, %v3290_v51 }
 0x3eb   :  { %3635 = vmatpush3.bf16.msra.mxu1 %v708_v41 }
 0x3ec   :  { %3646 = vmatprep.subr.bf16.mxu1 %v4048_v0 }
 0x3ee   :  { %v569_v59 = vpop.f32.mrb[16].mxu0 }
 0x3ef   :  { %v3618_v60 = vpop.f32.mrb[17].mxu0  ;;  %v570_v63 = vadd.f32 %v3276_v58, %v569_v59  ;;  %v809_v59 = vsel %vm760_vm11, %v463_v49, 0 }
 0x3f0   :  { %v572_v61 = vpop.f32.mrb[18].mxu0  ;;  %v3297_v60 = vld [vmem:[%s4108_s13 + $0x40] sm:$0xff] }
 0x3f1   :  { %v573_v1 = vadd.f32 %v3276_v58, %v572_v61  ;;  %v3619_v2 = vpop.f32.mrb[19].mxu0  ;;  %v3298_v61 = vld [vmem:[%s4108_s13 + $0x48] sm:$0xff] }
 0x3f2   :  { %v3300_v2 = vld [vmem:[%s4108_s13 + $0x58] sm:$0xff] }
 0x3f3   :  { %v633_v3 = vpack.c.bf16 %v573_v1, %v570_v63  ;;  %v913_v63 = vpack.c.bf16 %v3298_v61, %v3297_v60  ;;  %v3299_v1 = vld [vmem:[%s4108_s13 + $0x50] sm:$0xff] }
 0x3f5   :  { %v638_v4 = vsel %vm340_vm2, %v633_v3, 0  ;;  %v914_v3 = vpack.c.bf16 %v3300_v2, %v3299_v1 }
 0x3f6   :  { %3629 = vmatpush3.bf16.xpose.msra.mxu0 %v638_v4 }
 0x3f7   :  { %3640 = vmatprep.subr.bf16.mxu0 %v4048_v0 }
 0x3fd   :  { %3631 = vmatmul.mubr.msk.bf16.vlgmr.msra.gmra.mrb[20].mxu0 %vm340_vm2, %v632_v50 }
 0x3fe   :  { %3642 = vmatprep.mubr.msk.bf16.mxu0 %vm4050_vm0, %v4048_v0  ;;  %3641 = vmatpush3.bf16.msra.mxu0 %v762_v44  ;;  %v3306_v44 = vld [vmem:[%s4167_s3 + $0x50] sm:$0xff] }
 0x3ff   :  { %3652 = vmatprep.subr.bf16.mxu0 %v4048_v0 }
 0x4d0   :  { %v674_v12 = vpop.f32.mrb[20].mxu0 }
 0x4d1   :  { %v681_v13 = vmul.f32 0.35355338, %v674_v12  ;;  %v3632_v14 = vpop.f32.mrb[21].mxu0  ;;  %v858_v12 = vpack.c.bf16 %v3293_v10, %v3292_v9 }
 0x4d2   :  { %v677_v15 = vpop.f32.mrb[22].mxu0 }
 0x4d3   :  { %v682_v16 = vmul.f32 0.35355338, %v677_v15  ;;  %v3633_v17 = vpop.f32.mrb[23].mxu0  ;;  %v683_v18 = vadd.f32 %v681_v13, %v4190_v54 }
 0x4d4   :  { %v3302_v17 = vld [vmem:[%s4147_s25 + $0x2] ss:$0 sm:$0xff] }
 0x4d5   :  { %v685_v19 = vsel %vm392_vm10, %v683_v18, -inf  ;;  %v684_v20 = vadd.f32 %v682_v16, %v4194_v62 }
 0x4d6   :  { %686 = vmax.xlane.f32.xlu1 %v685_v19 }
 0x4d7   :  { %v688_v21 = vsel %vm392_vm10, %v684_v20, -inf }
 0x4da   :  { %689 = vmax.xlane.f32.xlu1 %v688_v21 }
 0x563   :  { %v687_v22 = vpop.xlane.xlu1 %686 }
 0x564   :  { %v691_v23 = vsub.f32 %v683_v18, %v687_v22 }
 0x566   :  { %v693_v24 = vmul.f32 1.442695, %v691_v23 }
 0x567   :  { %v690_v25 = vpop.xlane.xlu1 %689 }
 0x568   :  { %3977 = vpow2.f32 %v693_v24  ;;  %v692_v26 = vsub.f32 %v684_v20, %v690_v25 }
 0x56a   :  { %v695_v27 = vmul.f32 1.442695, %v692_v26 }
 0x56c   :  { %3979 = vpow2.f32 %v695_v27 }
 0x572   :  { %v3978_v28 = vpop.eup %3977 }
 0x573   :  { %v697_v29 = vsel %vm392_vm10, %v3978_v28, 0.0 }
 0x574   :  { %698 = vadd.xlane.f32.xlu1 %v697_v29 }
 0x576   :  { %v3980_v30 = vpop.eup %3979 }
 0x577   :  { %v700_v31 = vsel %vm392_vm10, %v3980_v30, 0.0 }
 0x578   :  { %701 = vadd.xlane.f32.xlu1 %v700_v31 }
 0x601   :  { %v699_v45 = vpop.xlane.xlu1 %698 }
 0x602   :  { %3981 = vrcp.f32 %v699_v45  ;;  %v969_v45 = vpack.c.bf16 %v3305_v43, %v3304_v42 }
 0x605   :  { %v702_v46 = vpop.xlane.xlu1 %701 }
 0x606   :  { %3983 = vrcp.f32 %v702_v46  ;;  %v3307_v46 = vld [vmem:[%s4167_s3 + $0x58] sm:$0xff] }
 0x607   :  { %v970_v47 = vpack.c.bf16 %v3307_v46, %v3306_v44  ;;  %v3325_v46 = vld [vmem:[%s4108_s13 + $0x78] sm:$0xff] }
 0x60c   :  { %v3982_v48 = vpop.eup %3981 }
 0x60d   :  { %v705_v52 = vmul.f32 %v3982_v48, %v3978_v28 }
 0x610   :  { %v3984_v50 = vpop.eup %3983 }
 0x611   :  { %v706_v57 = vmul.f32 %v3984_v50, %v3980_v30 }
 0x613   :  { %v707_v58 = vpack.c.bf16 %v706_v57, %v705_v52 }
 0x615   :  { %3637 = vmatmul.mubr.msk.bf16.vlgmr.msra.gmra.mrb[12].mxu1 %vm392_vm10, %v707_v58 }
 0x616   :  { %3647 = vmatpush3.bf16.msra.mxu1 %v809_v59  ;;  %3648 = vmatprep.mubr.msk.bf16.mxu1 %vm4050_vm0, %v4048_v0 }
 0x617   :  { %3660 = vmatprep.subr.bf16.mxu1 %v4048_v0 }
 0x61d   :  { %3649 = vmatmul.mubr.msk.bf16.vlgmr.msra.gmra.mrb[16].mxu1 %vm340_vm2, %v462_v56 }
 0x61e   :  { %3661 = vmatpush3.bf16.msra.mxu1 %v913_v63  ;;  %3664 = vmatprep.mubr.msk.bf16.mxu1 %vm4050_vm0, %v4048_v0 }
 0x61f   :  { %3662 = vmatprep.subr.bf16.mxu1 %v4048_v0 }
 0x622   :  { %3663 = vmatpush3.bf16.msra.mxu1 %v914_v3 }
 0x623   :  { %3676 = vmatprep.subr.bf16.mxu1 %v4048_v0 }
 0x625   :  { %3665 = vmatmul.mubr.msk.bf16.vlgmr.msra.gmra.mrb[20].mxu1 %vm185_vm1, %v4119_v11 }
 0x626   :  { %3678 = vmatprep.mubr.msk.bf16.mxu1 %vm4050_vm0, %v4048_v0 }
 0x6e8   :  { %v746_v56 = vpop.f32.mrb[12].mxu1 }
 0x6e9   :  { %v3638_v4 = vpop.f32.mrb[13].mxu1 }
 0x6ea   :  { %v749_v5 = vpop.f32.mrb[14].mxu1 }
 0x6eb   :  { %v755_v7 = vpack.c.bf16 %v749_v5, %v746_v56  ;;  %v3639_v8 = vpop.f32.mrb[15].mxu1 }
 0x6ed   :  { %3643 = vmatmul.mubr.msk.bf16.vlgmr.msra.gmra.mrb[24].mxu0 %vm340_vm2, %v755_v7 }
 0x6ee   :  { %3653 = vmatpush3.bf16.msra.mxu0 %v857_v6  ;;  %3656 = vmatprep.mubr.msk.bf16.mxu0 %vm4050_vm0, %v4048_v0 }
 0x6ef   :  { %3654 = vmatprep.subr.bf16.mxu0 %v4048_v0 }
 0x6f0   :  { %v845_v13 = vpop.f32.mrb[16].mxu1 }
 0x6f1   :  { %v3650_v14 = vpop.f32.mrb[17].mxu1 }
 0x6f2   :  { %v848_v15 = vpop.f32.mrb[18].mxu1  ;;  %3655 = vmatpush3.bf16.msra.mxu0 %v858_v12  ;;  %v3309_v12 = vld [vmem:[%s4204_s18 + $0x2] ss:$0 sm:$0xff] }
 0x6f3   :  { %v3651_v16 = vpop.f32.mrb[19].mxu1  ;;  %3668 = vmatprep.subr.bf16.mxu0 %v4048_v0 }
 0x6f5   :  { %3657 = vmatmul.mubr.msk.bf16.vlgmr.msra.gmra.mrb[28].mxu0 %vm185_vm1, %v4119_v11 }
 0x6f6   :  { %3672 = vmatprep.mubr.msk.bf16.mxu0 %vm4050_vm0, %v4048_v0  ;;  %3669 = vmatpush3.bf16.msra.mxu0 %v969_v45  ;;  %v3324_v45 = vld [vmem:[%s4108_s13 + $0x70] sm:$0xff] }
 0x6f7   :  { %3670 = vmatprep.subr.bf16.mxu0 %v4048_v0 }
 0x6f8   :  { %v957_v18 = vpop.f32.mrb[20].mxu1 }
 0x6f9   :  { %v958_v19 = vadd.f32 %v3302_v17, %v957_v18  ;;  %v3666_v20 = vpop.f32.mrb[21].mxu1 }
 0x6fa   :  { %v960_v21 = vpop.f32.mrb[22].mxu1  ;;  %3671 = vmatpush3.bf16.msra.mxu0 %v970_v47  ;;  %v1256_v47 = vpack.c.bf16 %v3325_v46, %v3324_v45  ;;  %v3338_v45 = vld [vmem:[%s4265_s23 + $0x18] sm:$0xff] }
 0x6fb   :  { %v961_v22 = vadd.f32 %v3302_v17, %v960_v21  ;;  %v3667_v23 = vpop.f32.mrb[23].mxu1  ;;  %3682 = vmatprep.subr.bf16.mxu0 %v4048_v0  ;;  %v3313_v17 = vld [vmem:[%s4265_s23 + $0x10] sm:$0xff]  ;;  %v1486_v46 = vpack.c.bf16 %v3338_v45, %v3338_v45  ;;  %s4070_s23 = smov 17  }
 0x6fc   :  { %v1144_v18 = vpack.c.bf16 %v3313_v17, %v3313_v17 }
 0x6fd   :  { %v1021_v24 = vpack.c.bf16 %v961_v22, %v958_v19  ;;  %3673 = vmatmul.mubr.msk.bf16.vlgmr.msra.gmra.mrb[32].mxu0 %vm185_vm1, %v4119_v11 }
 0x6fe   :  { %3684 = vmatprep.mubr.msk.bf16.mxu0 %vm4050_vm0, %v4048_v0  ;;  %v1149_v19 = vsel %vm760_vm11, %v1144_v18, 0 }
 0x6ff   :  { %v1026_v25 = vsel %vm340_vm2, %v1021_v24, 0 }
 0x700   :  { %3677 = vmatpush3.bf16.xpose.msra.mxu1 %v1026_v25 }
 0x701   :  { %3688 = vmatprep.subr.bf16.mxu1 %v4048_v0 }
 0x7c0   :  { %v798_v26 = vpop.f32.mrb[24].mxu0 }
 0x7c1   :  { %v4308_v27 = vadd.f32 %v845_v13, %v798_v26  ;;  %v3644_v28 = vpop.f32.mrb[25].mxu0 }
 0x7c2   :  { %v801_v29 = vpop.f32.mrb[26].mxu0  ;;  %v3315_v28 = vld [vmem:[%s4093_s6 + $0x60] sm:$0xff] }
 0x7c3   :  { %v4310_v30 = vadd.f32 %v848_v15, %v801_v29  ;;  %v3645_v31 = vpop.f32.mrb[27].mxu0  ;;  %v3316_v29 = vld [vmem:[%s4093_s6 + $0x68] sm:$0xff] }
 0x7c4   :  { %v1199_v31 = vpack.c.bf16 %v3316_v29, %v3315_v28 }
 0x7c8   :  { %v901_v33 = vpop.f32.mrb[28].mxu0 }
 0x7c9   :  { %v3658_v34 = vpop.f32.mrb[29].mxu0  ;;  %v902_v36 = vadd.f32 %v3295_v32, %v901_v33  ;;  %v3318_v33 = vld [vmem:[%s4093_s6 + $0x78] sm:$0xff] }
 0x7ca   :  { %v904_v35 = vpop.f32.mrb[30].mxu0 }
 0x7cb   :  { %v905_v37 = vadd.f32 %v3295_v32, %v904_v35  ;;  %v3659_v40 = vpop.f32.mrb[31].mxu0  ;;  %v3317_v32 = vld [vmem:[%s4093_s6 + $0x70] sm:$0xff]  ;;  %v3322_v35 = vld [vmem:[%s4108_s13 + $0x60] sm:$0xff]  ;;  %s4063_s6 = smov 13  }
 0x7cc   :  { %v1200_v34 = vpack.c.bf16 %v3318_v33, %v3317_v32  ;;  %s3235_s24 = sld [smem:[%s4816_s0 + %s4063_s6]]  }
 0x7cd   :  { %v1020_v41 = vpack.c.bf16 %v905_v37, %v902_v36  ;;  %v3323_v36 = vld [vmem:[%s4108_s13 + $0x68] sm:$0xff]  ;;  %s3246_s6 = sld [smem:[%s4816_s0 + %s4077_s20]]   ;;  %s4078_s13 = smov 25  }
 0x7ce   :  { %v1255_v42 = vpack.c.bf16 %v3323_v36, %v3322_v35 }
 0x7cf   :  { %3679 = vmatmul.mubr.msk.bf16.vlgmr.msra.gmra.mrb[24].mxu1 %vm340_vm2, %v1020_v41 }
 0x7d0   :  { %3690 = vmatprep.mubr.msk.bf16.mxu1 %vm4050_vm0, %v4048_v0  ;;  %v1013_v8 = vpop.f32.mrb[32].mxu0  ;;  %3689 = vmatpush3.bf16.msra.mxu1 %v1149_v19 }
 0x7d1   :  { %v3674_v9 = vpop.f32.mrb[33].mxu0  ;;  %v1014_v14 = vadd.f32 %v3309_v12, %v1013_v8  ;;  %3702 = vmatprep.subr.bf16.mxu1 %v4048_v0 }
 0x7d2   :  { %v1016_v10 = vpop.f32.mrb[34].mxu0 }
 0x7d3   :  { %v3675_v13 = vpop.f32.mrb[35].mxu0  ;;  %v1017_v15 = vadd.f32 %v3309_v12, %v1016_v10  ;;  %v3330_v10 = vld [vmem:[%s4167_s3 + $0x68] sm:$0xff]  ;;  %v3331_v12 = vld [vmem:[%s4167_s3 + $0x70] sm:$0xff] }
 0x7d5   :  { %v1096_v16 = vpack.c.bf16 %v1017_v15, %v1014_v14  ;;  %v3332_v14 = vld [vmem:[%s4167_s3 + $0x78] sm:$0xff] }
 0x7d6   :  { %v1312_v15 = vpack.c.bf16 %v3332_v14, %v3331_v12  ;;  %v4046_v12 = vld [vmem:[%s4100_s9 + $0x8] sm:$0xff] }
 0x7d7   :  { %3683 = vmatpush3.bf16.msra.mxu0 %v1096_v16 }
 0x7d8   :  { %3694 = vmatprep.subr.bf16.mxu0 %v4048_v0 }
 0x8a2   :  { %v1062_v48 = vpop.f32.mrb[24].mxu1 }
 0x8a3   :  { %v1069_v49 = vmul.f32 0.35355338, %v1062_v48  ;;  %v3680_v50 = vpop.f32.mrb[25].mxu1  ;;  %v3320_v48 = vld [vmem:[%s4141_s21 + $0x3] ss:$0 sm:$0xff]  ;;  %s4486_s21 = sld [smem:[%s4816_s0 + %s4070_s23]]  }
 0x8a4   :  { %v1065_v52 = vpop.f32.mrb[26].mxu1 }
 0x8a5   :  { %v1070_v57 = vmul.f32 0.35355338, %v1065_v52  ;;  %v3681_v58 = vpop.f32.mrb[27].mxu1  ;;  %v1071_v59 = vadd.f32 %v1069_v49, %v4190_v54 }
 0x8a7   :  { %v1073_v60 = vsel %vm392_vm10, %v1071_v59, -inf  ;;  %v1072_v61 = vadd.f32 %v1070_v57, %v4194_v62 }
 0x8a8   :  { %1074 = vmax.xlane.f32.xlu1 %v1073_v60 }
 0x8a9   :  { %v1076_v63 = vsel %vm392_vm10, %v1072_v61, -inf }
 0x8ac   :  { %1077 = vmax.xlane.f32.xlu1 %v1076_v63 }
 0x935   :  { %v1075_v1 = vpop.xlane.xlu1 %1074 }
 0x936   :  { %v1079_v2 = vsub.f32 %v1071_v59, %v1075_v1 }
 0x938   :  { %v1081_v3 = vmul.f32 1.442695, %v1079_v2 }
 0x939   :  { %v1078_v51 = vpop.xlane.xlu1 %1077 }
 0x93a   :  { %3985 = vpow2.f32 %v1081_v3  ;;  %v1080_v55 = vsub.f32 %v1072_v61, %v1078_v51 }
 0x93c   :  { %v1083_v56 = vmul.f32 1.442695, %v1080_v55  ;;  %v3327_v55 = vld [vmem:[%s4147_s25 + $0x3] ss:$0 sm:$0xff]  ;;  %s4079_s25 = smov 27  }
 0x93d   :  { %s3249_s28 = sld [smem:[%s4816_s0 + %s4079_s25]]  }
 0x93e   :  { %3987 = vpow2.f32 %v1083_v56 }
 0x944   :  { %v3986_v4 = vpop.eup %3985 }
 0x945   :  { %v1085_v5 = vsel %vm392_vm10, %v3986_v4, 0.0 }
 0x946   :  { %1086 = vadd.xlane.f32.xlu1 %v1085_v5 }
 0x948   :  { %v3988_v6 = vpop.eup %3987 }
 0x949   :  { %v1088_v7 = vsel %vm392_vm10, %v3988_v6, 0.0 }
 0x94a   :  { %1089 = vadd.xlane.f32.xlu0 %v1088_v7 }
 0x9d3   :  { %v1087_v20 = vpop.xlane.xlu1 %1086 }
 0x9d4   :  { %3989 = vrcp.f32 %v1087_v20 }
 0x9d7   :  { %v1090_v21 = vpop.xlane.xlu0 %1089 }
 0x9d8   :  { %3991 = vrcp.f32 %v1090_v21 }
 0x9de   :  { %v3990_v22 = vpop.eup %3989 }
 0x9df   :  { %v1093_v24 = vmul.f32 %v3990_v22, %v3986_v4 }
 0x9e2   :  { %v3992_v23 = vpop.eup %3991 }
 0x9e3   :  { %v1094_v25 = vmul.f32 %v3992_v23, %v3988_v6 }
 0x9e5   :  { %v1095_v26 = vpack.c.bf16 %v1094_v25, %v1093_v24 }
 0x9e7   :  { %3685 = vmatmul.mubr.msk.bf16.vlgmr.msra.gmra.mrb[36].mxu0 %vm392_vm10, %v1095_v26 }
 0x9e8   :  { %3698 = vmatprep.mubr.msk.bf16.mxu0 %vm4050_vm0, %v4048_v0  ;;  %3695 = vmatpush3.bf16.msra.mxu0 %v1199_v31 }
 0x9e9   :  { %3696 = vmatprep.subr.bf16.mxu0 %v4048_v0 }
 0x9ec   :  { %3697 = vmatpush3.bf16.msra.mxu0 %v1200_v34 }
 0x9ed   :  { %3710 = vmatprep.subr.bf16.mxu0 %v4048_v0 }
 0x9ef   :  { %3699 = vmatmul.mubr.msk.bf16.vlgmr.msra.gmra.mrb[40].mxu0 %vm185_vm1, %v4119_v11 }
 0x9f0   :  { %3714 = vmatprep.mubr.msk.bf16.mxu0 %vm4050_vm0, %v4048_v0 }
 0xaba   :  { %v1134_v37 = vpop.f32.mrb[36].mxu0 }
 0xabb   :  { %v3686_v40 = vpop.f32.mrb[37].mxu0 }
 0xabc   :  { %v1137_v41 = vpop.f32.mrb[38].mxu0  ;;  %v3334_v40 = vld [vmem:[%s4204_s18 + $0x3] ss:$0 sm:$0xff]  ;;  %s4069_s18 = smov 19  }
 0xabd   :  { %v1143_v43 = vpack.c.bf16 %v1137_v41, %v1134_v37  ;;  %v3687_v44 = vpop.f32.mrb[39].mxu0  ;;  %s4478_s22 = sld [smem:[%s4816_s0 + %s4069_s18]]  }
 0xabf   :  { %3691 = vmatmul.mubr.msk.bf16.vlgmr.msra.gmra.mrb[28].mxu1 %vm340_vm2, %v1143_v43 }
 0xac0   :  { %3703 = vmatpush3.bf16.msra.mxu1 %v1255_v42  ;;  %3706 = vmatprep.mubr.msk.bf16.mxu1 %vm4050_vm0, %v4048_v0 }
 0xac1   :  { %3704 = vmatprep.subr.bf16.mxu1 %v4048_v0 }
 0xac2   :  { %v1243_v49 = vpop.f32.mrb[40].mxu0 }
 0xac3   :  { %v1244_v50 = vadd.f32 %v3320_v48, %v1243_v49  ;;  %v3700_v52 = vpop.f32.mrb[41].mxu0 }
 0xac4   :  { %3705 = vmatpush3.bf16.msra.mxu1 %v1256_v47  ;;  %v1246_v57 = vpop.f32.mrb[42].mxu0  ;;  %v1491_v47 = vsel %vm760_vm11, %v1486_v46, 0 }
 0xac5   :  { %3718 = vmatprep.subr.bf16.mxu1 %v4048_v0  ;;  %v1247_v58 = vadd.f32 %v3320_v48, %v1246_v57  ;;  %v3701_v59 = vpop.f32.mrb[43].mxu0 }
 0xac7   :  { %3707 = vmatmul.mubr.msk.bf16.vlgmr.msra.gmra.mrb[32].mxu1 %vm185_vm1, %v4119_v11  ;;  %v1362_v60 = vpack.c.bf16 %v1247_v58, %v1244_v50 }
 0xac8   :  { %3720 = vmatprep.mubr.msk.bf16.mxu1 %vm4050_vm0, %v4048_v0 }
 0xb92   :  { %v1185_v61 = vpop.f32.mrb[28].mxu1 }
 0xb93   :  { %v4365_v63 = vadd.f32 %v1185_v61, %v4308_v27  ;;  %v3692_v1 = vpop.f32.mrb[29].mxu1 }
 0xb94   :  { %v1188_v2 = vpop.f32.mrb[30].mxu1 }
 0xb95   :  { %v4368_v3 = vadd.f32 %v1188_v2, %v4310_v30  ;;  %v3693_v51 = vpop.f32.mrb[31].mxu1  ;;  %v3329_v30 = vld [vmem:[%s4167_s3 + $0x60] sm:$0xff]  ;;  %s4066_s3 = smov 16  }
 0xb96   :  { %v1311_v13 = vpack.c.bf16 %v3330_v10, %v3329_v30  ;;  %s4437_s7 = sld [smem:[%s4816_s0 + %s4066_s3]]  }
 0xb97   :  { %s3251_s3 = sld [smem:[%s4816_s0 + %s4080_s30]]  }
 0xb98   :  { %3711 = vmatpush3.bf16.msra.mxu0 %v1311_v13 }
 0xb99   :  { %3712 = vmatprep.subr.bf16.mxu0 %v4048_v0 }
 0xb9a   :  { %v1299_v56 = vpop.f32.mrb[32].mxu1 }
 0xb9b   :  { %v3708_v4 = vpop.f32.mrb[33].mxu1  ;;  %v1300_v6 = vadd.f32 %v3327_v55, %v1299_v56  ;;  %v3340_v56 = vld [vmem:[%s3235_s24] ss:$0 sm:$0xff]  ;;  %s4071_s24 = smov 20  }
 0xb9c   :  { %v1302_v5 = vpop.f32.mrb[34].mxu1  ;;  %3713 = vmatpush3.bf16.msra.mxu0 %v1312_v15  ;;  %s4505_s26 = sld [smem:[%s4816_s0 + %s4071_s24]]  }
 0xb9d   :  { %v1303_v7 = vadd.f32 %v3327_v55, %v1302_v5  ;;  %v3709_v8 = vpop.f32.mrb[35].mxu1  ;;  %3724 = vmatprep.subr.bf16.mxu0 %v4048_v0 }
 0xb9f   :  { %v1363_v9 = vpack.c.bf16 %v1303_v7, %v1300_v6  ;;  %3715 = vmatmul.mubr.msk.bf16.vlgmr.msra.gmra.mrb[44].mxu0 %vm185_vm1, %v4119_v11 }
 0xba0   :  { %3726 = vmatprep.mubr.msk.bf16.mxu0 %vm4050_vm0, %v4048_v0 }
 0xba1   :  { %v1368_v27 = vsel %vm340_vm2, %v1363_v9, 0 }
 0xba2   :  { %3719 = vmatpush3.bf16.xpose.msra.mxu1 %v1368_v27  ;;  %v4045_v27 = vld [vmem:[%s4100_s9] sm:$0xff]  ;;  %s4064_s9 = smov 18  }
 0xba3   :  { %3730 = vmatprep.subr.bf16.mxu1 %v4048_v0  ;;  %s4427_s27 = sld [smem:[%s4816_s0 + %s4064_s9]]  }
 0xba4   :  { %s3247_s9 = sld [smem:[%s4816_s0 + %s4078_s13]]  }
 0xba9   :  { %3721 = vmatmul.mubr.msk.bf16.vlgmr.msra.gmra.mrb[36].mxu1 %vm340_vm2, %v1362_v60 }
 0xbaa   :  { %3732 = vmatprep.mubr.msk.bf16.mxu1 %vm4050_vm0, %v4048_v0  ;;  %3731 = vmatpush3.bf16.msra.mxu1 %v1491_v47 }
 0xbab   :  { %3744 = vmatprep.subr.bf16.mxu1 %v4048_v0 }
 0xc72   :  { %v1355_v35 = vpop.f32.mrb[44].mxu0 }
 0xc73   :  { %v3716_v36 = vpop.f32.mrb[45].mxu0  ;;  %v1356_v42 = vadd.f32 %v3334_v40, %v1355_v35 }
 0xc74   :  { %v1358_v37 = vpop.f32.mrb[46].mxu0 }
 0xc75   :  { %v3717_v41 = vpop.f32.mrb[47].mxu0  ;;  %v1359_v43 = vadd.f32 %v3334_v40, %v1358_v37 }
 0xc77   :  { %v1438_v44 = vpack.c.bf16 %v1359_v43, %v1356_v42 }
 0xc79   :  { %3725 = vmatpush3.bf16.msra.mxu0 %v1438_v44 }
 0xc7a   :  { %3736 = vmatprep.subr.bf16.mxu0 %v4048_v0 }
 0xc7c   :  { %v1404_v16 = vpop.f32.mrb[36].mxu1 }
 0xc7d   :  { %v1411_v17 = vmul.f32 0.35355338, %v1404_v16  ;;  %v3722_v18 = vpop.f32.mrb[37].mxu1 }
 0xc7e   :  { %v1407_v19 = vpop.f32.mrb[38].mxu1  ;;  %v1664_v18 = vld [vmem:[%s4427_s27] sm:$0xff] }
 0xc7f   :  { %v1412_v20 = vmul.f32 0.35355338, %v1407_v19  ;;  %v3723_v21 = vpop.f32.mrb[39].mxu1  ;;  %v1413_v22 = vadd.f32 %v1411_v17, %v4190_v54  ;;  %v1665_v19 = vld [vmem:[%s4427_s27 + $0x8] sm:$0xff] }
 0xc80   :  { %v1666_v21 = vld [vmem:[%s4427_s27 + $0x10] sm:$0xff] }
 0xc81   :  { %v1415_v23 = vsel %vm392_vm10, %v1413_v22, -inf  ;;  %v1414_v24 = vadd.f32 %v1412_v20, %v4194_v62  ;;  %v1669_v20 = vpack.c.bf16 %v1665_v19, %v1664_v18  ;;  %v3354_v18 = vld [vmem:[%s4437_s7 + $0x30] sm:$0xff]  ;;  %v3355_v19 = vld [vmem:[%s4437_s7 + $0x38] sm:$0xff] }
 0xc82   :  { %1416 = vmax.xlane.f32.xlu1 %v1415_v23 }
 0xc83   :  { %v1418_v25 = vsel %vm392_vm10, %v1414_v24, -inf }
 0xc84   :  { %1419 = vmax.xlane.f32.xlu0 %v1418_v25 }
 0xd0f   :  { %v1417_v11 = vpop.xlane.xlu1 %1416 }
 0xd10   :  { %v1421_v26 = vsub.f32 %v1413_v22, %v1417_v11  ;;  %v1667_v22 = vld [vmem:[%s4427_s27 + $0x18] sm:$0xff]  ;;  %v1606_v11 = vld [vmem:[%s4437_s7] sm:$0xff] }
 0xd11   :  { %v1420_v28 = vpop.xlane.xlu0 %1419  ;;  %v1670_v23 = vpack.c.bf16 %v1667_v22, %v1666_v21  ;;  %v1721_v21 = vld [vmem:[%s4505_s26] sm:$0xff]  ;;  %v1722_v22 = vld [vmem:[%s4505_s26 + $0x8] sm:$0xff] }
 0xd12   :  { %v1423_v29 = vmul.f32 1.442695, %v1421_v26  ;;  %v1422_v31 = vsub.f32 %v1414_v24, %v1420_v28  ;;  %v137_v24 = vld [vmem:[%s3223_s2] sm:$0xff]  ;;  %v1607_v26 = vld [vmem:[%s4437_s7 + $0x8] sm:$0xff]  ;;  %s4073_s2 = smov 22  }
 0xd13   :  { %v4442_v25 = vpack.c.bf16 %v137_v24, %v137_v24  ;;  %v1611_v28 = vpack.c.bf16 %v1607_v26, %v1606_v11  ;;  %v1725_v24 = vpack.c.bf16 %v1722_v22, %v1721_v21  ;;  %v1724_v11 = vld [vmem:[%s4505_s26 + $0x18] sm:$0xff]  ;;  %s4593_s5 = sld [smem:[%s4816_s0 + %s4073_s2]]  }
 0xd14   :  { %3993 = vpow2.f32 %v1423_v29  ;;  %v1425_v32 = vmul.f32 1.442695, %v1422_v31  ;;  %v1608_v29 = vld [vmem:[%s4437_s7 + $0x10] sm:$0xff]  ;;  %v1609_v31 = vld [vmem:[%s4437_s7 + $0x18] sm:$0xff] }
 0xd16   :  { %3995 = vpow2.f32 %v1425_v32  ;;  %v1612_v32 = vpack.c.bf16 %v1609_v31, %v1608_v29  ;;  %v4047_v29 = vld [vmem:[%s4155_s29] ss:$0 sm:$0xff]  ;;  %s4072_s29 = smov 21  }
 0xd17   :  { %vm1603_vm12 = vcmp.eq.f32.partialorder %v4186_v53, %v4047_v29  ;;  %s4538_s1 = sld [smem:[%s4816_s0 + %s4072_s29]]  }
 0xd1e   :  { %v3994_v33 = vpop.eup %3993 }
 0xd1f   :  { %v1427_v54 = vsel %vm392_vm10, %v3994_v33, 0.0 }
 0xd20   :  { %v3996_v34 = vpop.eup %3995  ;;  %1428 = vadd.xlane.f32.xlu1 %v1427_v54 }
 0xd21   :  { %v1430_v62 = vsel %vm392_vm10, %v3996_v34, 0.0 }
 0xd22   :  { %1431 = vadd.xlane.f32.xlu0 %v1430_v62 }
 0xdad   :  { %v1429_v48 = vpop.xlane.xlu1 %1428 }
 0xdae   :  { %3997 = vrcp.f32 %v1429_v48 }
 0xdaf   :  { %v1432_v49 = vpop.xlane.xlu0 %1431 }
 0xdb0   :  { %3999 = vrcp.f32 %v1432_v49  ;;  %v3341_v49 = vld [vmem:[%s3236_s12] ss:$0 sm:$0xff]  ;;  %s3253_s12 = sld [smem:[%s4816_s0 + %s4082_s8]]  }
 0xdb8   :  { %v3998_v50 = vpop.eup %3997 }
 0xdb9   :  { %v1435_v57 = vmul.f32 %v3998_v50, %v3994_v33 }
 0xdba   :  { %v4000_v52 = vpop.eup %3999 }
 0xdbb   :  { %v1436_v58 = vmul.f32 %v4000_v52, %v3996_v34 }
 0xdbd   :  { %v1437_v59 = vpack.c.bf16 %v1436_v58, %v1435_v57 }
 0xdbf   :  { %3727 = vmatmul.mubr.msk.bf16.vlgmr.msra.gmra.mrb[48].mxu0 %vm392_vm10, %v1437_v59 }
 0xdc0   :  { %3740 = vmatprep.mubr.msk.bf16.mxu0 %vm4050_vm0, %v4048_v0  ;;  %3737 = vmatpush3.bf16.msra.mxu0 %v1611_v28 }
 0xdc1   :  { %3738 = vmatprep.subr.bf16.mxu0 %v4048_v0 }
 0xdc4   :  { %3739 = vmatpush3.bf16.msra.mxu0 %v1612_v32 }
 0xdc5   :  { %3752 = vmatprep.subr.bf16.mxu0 %v4048_v0 }
 0xe92   :  { %v1476_v60 = vpop.f32.mrb[48].mxu0 }
 0xe93   :  { %v3728_v61 = vpop.f32.mrb[49].mxu0 }
 0xe94   :  { %v1479_v1 = vpop.f32.mrb[50].mxu0 }
 0xe95   :  { %v1485_v2 = vpack.c.bf16 %v1479_v1, %v1476_v60  ;;  %v3729_v51 = vpop.f32.mrb[51].mxu0  ;;  %v3342_v60 = vld [vmem:[%s3237_s17] ss:$0 sm:$0xff]  ;;  %s3254_s17 = sld [smem:[%s4816_s0 + %s4083_s14]]  }
 0xe97   :  { %3733 = vmatmul.mubr.msk.bf16.vlgmr.msra.gmra.mrb[40].mxu1 %vm340_vm2, %v1485_v2 }
 0xe98   :  { %3748 = vmatprep.mubr.msk.bf16.mxu1 %vm4050_vm0, %v4048_v0  ;;  %3745 = vmatpush3.bf16.msra.mxu1 %v1669_v20  ;;  %v1907_v20 = vpack.c.bf16 %v3355_v19, %v3354_v18  ;;  %v3362_v18 = vld [vmem:[%s4427_s27 + $0x38] sm:$0xff] }
 0xe99   :  { %3746 = vmatprep.subr.bf16.mxu1 %v4048_v0 }
 0xe9c   :  { %3747 = vmatpush3.bf16.msra.mxu1 %v1670_v23  ;;  %v1723_v23 = vld [vmem:[%s4505_s26 + $0x10] sm:$0xff] }
 0xe9d   :  { %3760 = vmatprep.subr.bf16.mxu1 %v4048_v0  ;;  %v1726_v26 = vpack.c.bf16 %v1724_v11, %v1723_v23  ;;  %v3364_v11 = vld [vmem:[%s4478_s22 + $0x1] ss:$0 sm:$0xff] }
 0xe9f   :  { %3749 = vmatmul.mubr.msk.bf16.vlgmr.msra.gmra.mrb[44].mxu1 %vm185_vm1, %v4442_v25 }
 0xea0   :  { %3762 = vmatprep.mubr.msk.bf16.mxu1 %vm4050_vm0, %v4048_v0 }
 0xf6a   :  { %v1527_v55 = vpop.f32.mrb[40].mxu1 }
 0xf6b   :  { %v1534_v4 = vadd.f32 %v1527_v55, %v4365_v63  ;;  %v3734_v5 = vpop.f32.mrb[41].mxu1  ;;  %v3346_v55 = vld [vmem:[%s4478_s22] ss:$0 sm:$0xff] }
 0xf6c   :  { %v1530_v6 = vpop.f32.mrb[42].mxu1 }
 0xf6d   :  { %v1543_v7 = vadd.f32 %v3340_v56, %v1534_v4  ;;  %v1535_v8 = vadd.f32 %v1530_v6, %v4368_v3  ;;  %v3735_v9 = vpop.f32.mrb[43].mxu1 }
 0xf6f   :  { %v4409_v30 = vadd.f32 %v4045_v27, %v1543_v7  ;;  %v1544_v10 = vadd.f32 %v3340_v56, %v1535_v8  ;;  %v3344_v27 = vld [vmem:[%s4486_s21] ss:$0 sm:$0xff] }
 0xf71   :  { %v4412_v13 = vadd.f32 %v4046_v12, %v1544_v10  ;;  %v1549_v14 = vsel %vm185_vm1, %v4409_v30, 0.0  ;;  %v1555_v15 = vmul.f32 %v4409_v30, %v4409_v30  ;;  %v3352_v12 = vld [vmem:[%s4437_s7 + $0x20] sm:$0xff] }
 0xf72   :  { %1550 = vadd.xlane.f32.xlu1 %v1549_v14  ;;  %v1715_v56 = vpop.f32.mrb[44].mxu1 }
 0xf73   :  { %v1552_v63 = vsel %vm185_vm1, %v4412_v13, 0.0  ;;  %v1556_v3 = vmul.f32 %v4412_v13, %v4412_v13  ;;  %v1557_v16 = vsel %vm185_vm1, %v1555_v15, 0.0  ;;  %v1716_v4 = vadd.f32 %v3346_v55, %v1715_v56  ;;  %v3750_v5 = vpop.f32.mrb[45].mxu1 }
 0xf74   :  { %1553 = vadd.xlane.f32.xlu0 %v1552_v63  ;;  %v1718_v6 = vpop.f32.mrb[46].mxu1  ;;  %v3348_v5 = vld [vmem:[%s4538_s1] ss:$0 sm:$0xff] }
 0xf75   :  { %v1560_v17 = vsel %vm185_vm1, %v1556_v3, 0.0  ;;  %v1775_v7 = vpack.c.bf16 %v1716_v4, %v1716_v4  ;;  %v3751_v8 = vpop.f32.mrb[47].mxu1 }
 0xf76   :  { %1558 = vadd.xlane.f32.xlu1 %v1557_v16 }
 0xf77   :  { %v1780_v9 = vsel %vm340_vm2, %v1775_v7, 0 }
 0xf78   :  { %1561 = vadd.xlane.f32.xlu0 %v1560_v17  ;;  %3761 = vmatpush3.bf16.xpose.msra.mxu1 %v1780_v9 }
 0xf79   :  { %3772 = vmatprep.subr.bf16.mxu1 %v4048_v0 }
 0xfff   :  { %v1551_v33 = vpop.xlane.xlu1 %1550 }
0x1000   :  { %v1563_v54 = vmul.f32 0.03125, %v1551_v33 }
0x1001   :  { %v1554_v34 = vpop.xlane.xlu0 %1553 }
0x1002   :  { %v1564_v62 = vmul.f32 0.03125, %v1554_v34  ;;  %v1567_v36 = vmul.f32 %v1563_v54, %v1563_v54  ;;  %v1571_v47 = vsub.f32 %v4409_v30, %v1563_v54 }
0x1003   :  { %v1559_v35 = vpop.xlane.xlu1 %1558 }
0x1004   :  { %v1565_v37 = vmul.f32 0.03125, %v1559_v35  ;;  %v1568_v41 = vmul.f32 %v1564_v62, %v1564_v62  ;;  %v1572_v50 = vsub.f32 %v4412_v13, %v1564_v62  ;;  %v3353_v13 = vld [vmem:[%s4437_s7 + $0x28] sm:$0xff]  ;;  %v4521_v35 = vsel %vm1603_vm12, 0.0, %v4057_v38 }
0x1005   :  { %v1562_v40 = vpop.xlane.xlu0 %1561  ;;  %v1906_v16 = vpack.c.bf16 %v3353_v13, %v3352_v12  ;;  %v3359_v12 = vld [vmem:[%s4427_s27 + $0x20] sm:$0xff]  ;;  %v3360_v13 = vld [vmem:[%s4427_s27 + $0x28] sm:$0xff] }
0x1006   :  { %v1569_v42 = vsub.f32 %v1565_v37, %v1567_v36  ;;  %v1566_v43 = vmul.f32 0.03125, %v1562_v40 }
0x1008   :  { %v1573_v44 = vadd.f32 1e-05, %v1569_v42  ;;  %v1570_v45 = vsub.f32 %v1566_v43, %v1568_v41  ;;  %v3357_v41 = vld [vmem:[%s4486_s21 + $0x1] ss:$0 sm:$0xff] }
0x100a   :  { %4001 = vrsqrt.f32 %v1573_v44  ;;  %v1574_v46 = vadd.f32 1e-05, %v1570_v45 }
0x100c   :  { %4003 = vrsqrt.f32 %v1574_v46 }
0x1014   :  { %v4002_v48 = vpop.eup %4001 }
0x1015   :  { %v1577_v52 = vmul.f32 %v4002_v48, %v1571_v47 }
0x1016   :  { %v4004_v57 = vpop.eup %4003 }
0x1017   :  { %v1578_v58 = vmul.f32 %v4004_v57, %v1572_v50  ;;  %v1585_v59 = vmul.f32 %v3341_v49, %v1577_v52 }
0x1019   :  { %v1586_v61 = vmul.f32 %v3341_v49, %v1578_v58  ;;  %v4463_v1 = vadd.f32 %v3342_v60, %v1585_v59 }
0x101b   :  { %v4465_v2 = vadd.f32 %v3342_v60, %v1586_v61 }
0x101d   :  { %v4469_v51 = vpack.c.bf16 %v4465_v2, %v4463_v1 }
0x101f   :  { %3741 = vmatmul.mubr.msk.bf16.vlgmr.msra.gmra.mrb[52].mxu0 %vm185_vm1, %v4469_v51 }
0x1020   :  { %3756 = vmatprep.mubr.msk.bf16.mxu0 %vm4050_vm0, %v4048_v0  ;;  %3753 = vmatpush3.bf16.msra.mxu0 %v1725_v24 }
0x1021   :  { %3754 = vmatprep.subr.bf16.mxu0 %v4048_v0 }
0x1024   :  { %3755 = vmatpush3.bf16.msra.mxu0 %v1726_v26 }
0x1025   :  { %3766 = vmatprep.subr.bf16.mxu0 %v4048_v0 }
0x1027   :  { %3757 = vmatmul.mubr.msk.bf16.vlgmr.msra.gmra.mrb[56].mxu0 %vm185_vm1, %v4442_v25 }
0x1028   :  { %3768 = vmatprep.mubr.msk.bf16.mxu0 %vm4050_vm0, %v4048_v0 }
0x10f2   :  { %v1657_v30 = vpop.f32.mrb[52].mxu0 }
0x10f3   :  { %v3742_v10 = vpop.f32.mrb[53].mxu0  ;;  %v1658_v15 = vadd.f32 %v3344_v27, %v1657_v30 }
0x10f4   :  { %v1660_v14 = vpop.f32.mrb[54].mxu0 }
0x10f5   :  { %v1661_v63 = vadd.f32 %v3344_v27, %v1660_v14  ;;  %v3743_v3 = vpop.f32.mrb[55].mxu0 }
0x10f6   :  { %v1962_v3 = vpack.c.bf16 %v3360_v13, %v3359_v12  ;;  %v3375_v12 = vld [vmem:[%s4593_s5 + $0x8] sm:$0xff] }
0x10f7   :  { %v1774_v17 = vpack.c.bf16 %v1661_v63, %v1658_v15  ;;  %v2194_v13 = vpack.c.bf16 %v3375_v12, %v3375_v12  ;;  %v3393_v12 = vld [vmem:[%s4505_s26 + $0x48] sm:$0xff] }
0x10f9   :  { %3763 = vmatmul.mubr.msk.bf16.vlgmr.msra.gmra.mrb[48].mxu1 %vm340_vm2, %v1774_v17  ;;  %v3361_v17 = vld [vmem:[%s4427_s27 + $0x30] sm:$0xff] }
0x10fa   :  { %3773 = vmatpush3.bf16.msra.mxu1 %v1906_v16  ;;  %3776 = vmatprep.mubr.msk.bf16.mxu1 %vm4050_vm0, %v4048_v0  ;;  %v1768_v55 = vpop.f32.mrb[56].mxu0  ;;  %v1963_v19 = vpack.c.bf16 %v3362_v18, %v3361_v17 }
0x10fb   :  { %3774 = vmatprep.subr.bf16.mxu1 %v4048_v0  ;;  %v3758_v56 = vpop.f32.mrb[57].mxu0  ;;  %v1769_v7 = vadd.f32 %v3348_v5, %v1768_v55 }
0x10fc   :  { %v1771_v4 = vpop.f32.mrb[58].mxu0 }
0x10fd   :  { %v3759_v6 = vpop.f32.mrb[59].mxu0  ;;  %v1850_v8 = vpack.c.bf16 %v1769_v7, %v1769_v7 }
0x10fe   :  { %3775 = vmatpush3.bf16.msra.mxu1 %v1907_v20 }
0x10ff   :  { %3788 = vmatprep.subr.bf16.mxu1 %v4048_v0  ;;  %v1855_v9 = vsel %vm760_vm11, %v1850_v8, 0  ;;  %v3371_v8 = vld [vmem:[%s4538_s1 + $0x1] ss:$0 sm:$0xff] }
0x1100   :  { %3767 = vmatpush3.bf16.msra.mxu0 %v1855_v9 }
0x1101   :  { %3777 = vmatmul.mubr.msk.bf16.vlgmr.msra.gmra.mrb[52].mxu1 %vm185_vm1, %v4469_v51  ;;  %3780 = vmatprep.subr.bf16.mxu0 %v4048_v0 }
0x1102   :  { %3792 = vmatprep.mubr.msk.bf16.mxu1 %vm4050_vm0, %v4048_v0 }
0x11cc   :  { %v1816_v28 = vpop.f32.mrb[48].mxu1 }
0x11cd   :  { %v1823_v31 = vmul.f32 0.35355338, %v1816_v28  ;;  %v3764_v32 = vpop.f32.mrb[49].mxu1 }
0x11ce   :  { %v1819_v33 = vpop.f32.mrb[50].mxu1 }
0x11cf   :  { %v1824_v54 = vmul.f32 0.35355338, %v1819_v33  ;;  %v3765_v34 = vpop.f32.mrb[51].mxu1  ;;  %v1825_v62 = vadd.f32 %v1823_v31, %v4162_v39 }
0x11d0   :  { %v3366_v34 = vld [vmem:[%s4505_s26 + $0x20] sm:$0xff] }
0x11d1   :  { %v1827_v36 = vsel %vm340_vm2, %v1825_v62, -inf  ;;  %v1826_v37 = vadd.f32 %v1824_v54, %v4521_v35 }
0x11d2   :  { %1828 = vmax.xlane.f32.xlu1 %v1827_v36  ;;  %v3368_v36 = vld [vmem:[%s4505_s26 + $0x30] sm:$0xff] }
0x11d3   :  { %v1830_v40 = vsel %vm340_vm2, %v1826_v37, -inf }
0x11d4   :  { %1831 = vmax.xlane.f32.xlu0 %v1830_v40  ;;  %v1950_v53 = vpop.f32.mrb[52].mxu1  ;;  %v3369_v40 = vld [vmem:[%s4505_s26 + $0x38] sm:$0xff] }
0x11d5   :  { %v3778_v42 = vpop.f32.mrb[53].mxu1  ;;  %v4527_v44 = vadd.f32 %v3357_v41, %v1950_v53 }
0x11d6   :  { %v1953_v43 = vpop.f32.mrb[54].mxu1 }
0x11d7   :  { %v4529_v45 = vadd.f32 %v3357_v41, %v1953_v43  ;;  %v3779_v46 = vpop.f32.mrb[55].mxu1  ;;  %v2018_v41 = vpack.c.bf16 %v3369_v40, %v3368_v36  ;;  %v3380_v40 = vld [vmem:[%s4437_s7 + $0x50] sm:$0xff] }
0x11d9   :  { %v2067_v38 = vpack.c.bf16 %v4529_v45, %v4527_v44 }
0x125f   :  { %v1829_v47 = vpop.xlane.xlu1 %1828 }
0x1260   :  { %v1833_v48 = vsub.f32 %v1825_v62, %v1829_v47  ;;  %v3367_v62 = vld [vmem:[%s4505_s26 + $0x28] sm:$0xff] }
0x1261   :  { %v1832_v49 = vpop.xlane.xlu0 %1831 }
0x1262   :  { %v1835_v50 = vmul.f32 1.442695, %v1833_v48  ;;  %v1834_v52 = vsub.f32 %v1826_v37, %v1832_v49  ;;  %v2017_v37 = vpack.c.bf16 %v3367_v62, %v3366_v34 }
0x1264   :  { %4005 = vpow2.f32 %v1835_v50  ;;  %v1837_v57 = vmul.f32 1.442695, %v1834_v52  ;;  %3789 = vmatpush3.bf16.msra.mxu1 %v2017_v37 }
0x1265   :  { %3790 = vmatprep.subr.bf16.mxu1 %v4048_v0 }
0x1266   :  { %4007 = vpow2.f32 %v1837_v57 }
0x1268   :  { %3791 = vmatpush3.bf16.msra.mxu1 %v2018_v41  ;;  %v3381_v41 = vld [vmem:[%s4437_s7 + $0x58] sm:$0xff] }
0x1269   :  { %3802 = vmatprep.subr.bf16.mxu1 %v4048_v0 }
0x126b   :  { %3793 = vmatmul.mubr.msk.bf16.vlgmr.msra.gmra.mrb[56].mxu1 %vm185_vm1, %v4442_v25 }
0x126c   :  { %3804 = vmatprep.mubr.msk.bf16.mxu1 %vm4050_vm0, %v4048_v0 }
0x126e   :  { %v4006_v58 = vpop.eup %4005 }
0x126f   :  { %v1839_v59 = vsel %vm340_vm2, %v4006_v58, 0.0 }
0x1270   :  { %v4008_v60 = vpop.eup %4007  ;;  %1840 = vadd.xlane.f32.xlu1 %v1839_v59 }
0x1271   :  { %v1842_v61 = vsel %vm340_vm2, %v4008_v60, 0.0 }
0x1272   :  { %1843 = vadd.xlane.f32.xlu0 %v1842_v61 }
0x12fd   :  { %v1841_v27 = vpop.xlane.xlu1 %1840 }
0x12fe   :  { %4009 = vrcp.f32 %v1841_v27 }
0x12ff   :  { %v1844_v30 = vpop.xlane.xlu0 %1843 }
0x1300   :  { %4011 = vrcp.f32 %v1844_v30 }
0x1308   :  { %v4010_v10 = vpop.eup %4009 }
0x1309   :  { %v1847_v15 = vmul.f32 %v4010_v10, %v4006_v58 }
0x130a   :  { %v4012_v14 = vpop.eup %4011 }
0x130b   :  { %v1848_v63 = vmul.f32 %v4012_v14, %v4008_v60  ;;  %v2199_v14 = vsel %vm760_vm11, %v2194_v13, 0  ;;  %v3394_v13 = vld [vmem:[%s4505_s26 + $0x50] sm:$0xff] }
0x130d   :  { %v1849_v16 = vpack.c.bf16 %v1848_v63, %v1847_v15 }
0x130f   :  { %3769 = vmatmul.mubr.msk.bf16.vlgmr.msra.gmra.mrb[60].mxu0 %vm340_vm2, %v1849_v16 }
0x1310   :  { %3781 = vmatpush3.bf16.msra.mxu0 %v1962_v3  ;;  %3784 = vmatprep.mubr.msk.bf16.mxu0 %vm4050_vm0, %v4048_v0  ;;  %v1898_v3 = vld [vmem:[%s4593_s5] sm:$0xff] }
0x1311   :  { %3782 = vmatprep.subr.bf16.mxu0 %v4048_v0  ;;  %v1900_v17 = vpack.c.bf16 %v1898_v3, %v1898_v3 }
0x1314   :  { %3783 = vmatpush3.bf16.msra.mxu0 %v1963_v19 }
0x1315   :  { %3796 = vmatprep.subr.bf16.mxu0 %v4048_v0 }
0x1317   :  { %3785 = vmatmul.mubr.msk.bf16.vlgmr.msra.gmra.mrb[64].mxu0 %vm185_vm1, %v4442_v25 }
0x1318   :  { %3798 = vmatprep.mubr.msk.bf16.mxu0 %vm4050_vm0, %v4048_v0 }
0x133e   :  { %v2061_v5 = vpop.f32.mrb[56].mxu1 }
0x133f   :  { %v3794_v6 = vpop.f32.mrb[57].mxu1  ;;  %v2062_v27 = vadd.f32 %v3371_v8, %v2061_v5 }
0x1340   :  { %v2064_v7 = vpop.f32.mrb[58].mxu1 }
0x1341   :  { %v3795_v9 = vpop.f32.mrb[59].mxu1  ;;  %v2143_v30 = vpack.c.bf16 %v2062_v27, %v2062_v27 }
0x1343   :  { %v2148_v10 = vsel %vm760_vm11, %v2143_v30, 0 }
0x1344   :  { %3803 = vmatpush3.bf16.msra.mxu1 %v2148_v10  ;;  %v3392_v10 = vld [vmem:[%s4505_s26 + $0x40] sm:$0xff] }
0x1345   :  { %3814 = vmatprep.subr.bf16.mxu1 %v4048_v0 }
0x13e2   :  { %v4556_v20 = vpop.f32.mrb[60].mxu0 }
0x13e3   :  { %v3770_v21 = vpop.f32.mrb[61].mxu0 }
0x13e4   :  { %v4558_v22 = vpop.f32.mrb[62].mxu0 }
0x13e5   :  { %v1899_v23 = vpack.c.bf16 %v4558_v22, %v4556_v20  ;;  %v3771_v24 = vpop.f32.mrb[63].mxu0  ;;  %v3378_v20 = vld [vmem:[%s4437_s7 + $0x40] sm:$0xff]  ;;  %v3379_v22 = vld [vmem:[%s4437_s7 + $0x48] sm:$0xff] }
0x13e6   :  { %v2294_v62 = vpack.c.bf16 %v3379_v22, %v3378_v20 }
0x13ea   :  { %v2006_v26 = vpop.f32.mrb[64].mxu0 }
0x13eb   :  { %v2007_v28 = vadd.f32 %v3364_v11, %v2006_v26  ;;  %v3786_v29 = vpop.f32.mrb[65].mxu0  ;;  %v2246_v11 = vsel %vm760_vm11, %v1900_v17, 0  ;;  %v3385_v26 = vld [vmem:[%s4427_s27 + $0x40] sm:$0xff] }
0x13ec   :  { %v2009_v31 = vpop.f32.mrb[66].mxu0 }
0x13ed   :  { %v2068_v32 = vpack.c.bf16 %v2007_v28, %v2007_v28  ;;  %v3787_v33 = vpop.f32.mrb[67].mxu0  ;;  %v3386_v28 = vld [vmem:[%s4427_s27 + $0x48] sm:$0xff]  ;;  %v3387_v31 = vld [vmem:[%s4427_s27 + $0x50] sm:$0xff] }
0x13ee   :  { %v2350_v29 = vpack.c.bf16 %v3386_v28, %v3385_v26 }
0x13ef   :  { %v2073_v54 = vsel %vm340_vm2, %v2068_v32, 0  ;;  %v3388_v32 = vld [vmem:[%s4427_s27 + $0x58] sm:$0xff] }
0x13f0   :  { %3797 = vmatpush3.bf16.xpose.msra.mxu0 %v2073_v54  ;;  %v2351_v33 = vpack.c.bf16 %v3388_v32, %v3387_v31 }
0x13f1   :  { %3808 = vmatprep.subr.bf16.mxu0 %v4048_v0 }
0x13f7   :  { %3799 = vmatmul.mubr.msk.bf16.vlgmr.msra.gmra.mrb[68].mxu0 %vm340_vm2, %v2067_v38 }
0x13f8   :  { %3810 = vmatprep.mubr.msk.bf16.mxu0 %vm4050_vm0, %v4048_v0  ;;  %3809 = vmatpush3.bf16.msra.mxu0 %v2199_v14  ;;  %v2405_v14 = vpack.c.bf16 %v3393_v12, %v3392_v10 }
0x13f9   :  { %3820 = vmatprep.subr.bf16.mxu0 %v4048_v0 }
0x14ca   :  { %v2109_v53 = vpop.f32.mrb[68].mxu0 }
0x14cb   :  { %v2116_v42 = vmul.f32 0.35355338, %v2109_v53  ;;  %v3800_v43 = vpop.f32.mrb[69].mxu0  ;;  %v2295_v53 = vpack.c.bf16 %v3381_v41, %v3380_v40  ;;  %v3397_v41 = vld [vmem:[%s4538_s1 + $0x2] ss:$0 sm:$0xff] }
0x14cc   :  { %v2112_v44 = vpop.f32.mrb[70].mxu0 }
0x14cd   :  { %v2117_v45 = vmul.f32 0.35355338, %v2112_v44  ;;  %v3801_v46 = vpop.f32.mrb[71].mxu0  ;;  %v2118_v38 = vadd.f32 %v2116_v42, %v4162_v39 }
0x14ce   :  { %v3390_v46 = vld [vmem:[%s4478_s22 + $0x2] ss:$0 sm:$0xff] }
0x14cf   :  { %v2120_v47 = vsel %vm340_vm2, %v2118_v38, -inf  ;;  %v2119_v48 = vadd.f32 %v2117_v45, %v4521_v35 }
0x14d0   :  { %2121 = vmax.xlane.f32.xlu1 %v2120_v47 }
0x14d1   :  { %v2123_v49 = vsel %vm340_vm2, %v2119_v48, -inf }
0x14d2   :  { %2124 = vmax.xlane.f32.xlu0 %v2123_v49 }
0x155d   :  { %v2122_v50 = vpop.xlane.xlu1 %2121 }
0x155e   :  { %v2126_v52 = vsub.f32 %v2118_v38, %v2122_v50 }
0x155f   :  { %v2125_v57 = vpop.xlane.xlu0 %2124 }
0x1560   :  { %v2128_v58 = vmul.f32 1.442695, %v2126_v52  ;;  %v2127_v59 = vsub.f32 %v2119_v48, %v2125_v57 }
0x1562   :  { %4013 = vpow2.f32 %v2128_v58  ;;  %v2130_v60 = vmul.f32 1.442695, %v2127_v59 }
0x1564   :  { %4015 = vpow2.f32 %v2130_v60 }
0x156c   :  { %v4014_v61 = vpop.eup %4013 }
0x156d   :  { %v2132_v55 = vsel %vm340_vm2, %v4014_v61, 0.0 }
0x156e   :  { %v4016_v56 = vpop.eup %4015  ;;  %2133 = vadd.xlane.f32.xlu1 %v2132_v55 }
0x156f   :  { %v2135_v4 = vsel %vm340_vm2, %v4016_v56, 0.0 }
0x1570   :  { %2136 = vadd.xlane.f32.xlu0 %v2135_v4  ;;  %v3383_v4 = vld [vmem:[%s4486_s21 + $0x2] ss:$0 sm:$0xff] }
0x15fb   :  { %v2134_v15 = vpop.xlane.xlu1 %2133 }
0x15fc   :  { %4017 = vrcp.f32 %v2134_v15  ;;  %v3395_v15 = vld [vmem:[%s4505_s26 + $0x58] sm:$0xff] }
0x15fd   :  { %v2137_v63 = vpop.xlane.xlu0 %2136 }
0x15fe   :  { %4019 = vrcp.f32 %v2137_v63  ;;  %v2406_v63 = vpack.c.bf16 %v3395_v15, %v3394_v13  ;;  %v3413_v15 = vld [vmem:[%s4427_s27 + $0x78] sm:$0xff] }
0x1606   :  { %v4018_v16 = vpop.eup %4017 }
0x1607   :  { %v2140_v19 = vmul.f32 %v4018_v16, %v4014_v61 }
0x1608   :  { %v4020_v18 = vpop.eup %4019 }
0x1609   :  { %v2141_v21 = vmul.f32 %v4020_v18, %v4016_v56 }
0x160b   :  { %v2142_v24 = vpack.c.bf16 %v2141_v21, %v2140_v19 }
0x160d   :  { %3805 = vmatmul.mubr.msk.bf16.vlgmr.msra.gmra.mrb[60].mxu1 %vm340_vm2, %v2142_v24 }
0x160e   :  { %3815 = vmatpush3.bf16.msra.mxu1 %v2246_v11  ;;  %3816 = vmatprep.mubr.msk.bf16.mxu1 %vm4050_vm0, %v4048_v0 }
0x160f   :  { %3828 = vmatprep.subr.bf16.mxu1 %v4048_v0 }
0x1615   :  { %3817 = vmatmul.mubr.msk.bf16.vlgmr.msra.gmra.mrb[64].mxu1 %vm340_vm2, %v1899_v23 }
0x1616   :  { %3829 = vmatpush3.bf16.msra.mxu1 %v2350_v29  ;;  %3832 = vmatprep.mubr.msk.bf16.mxu1 %vm4050_vm0, %v4048_v0 }
0x1617   :  { %3830 = vmatprep.subr.bf16.mxu1 %v4048_v0 }
0x161a   :  { %3831 = vmatpush3.bf16.msra.mxu1 %v2351_v33 }
0x161b   :  { %3844 = vmatprep.subr.bf16.mxu1 %v4048_v0 }
0x161d   :  { %3833 = vmatmul.mubr.msk.bf16.vlgmr.msra.gmra.mrb[68].mxu1 %vm185_vm1, %v4442_v25 }
0x161e   :  { %3846 = vmatprep.mubr.msk.bf16.mxu1 %vm4050_vm0, %v4048_v0 }
0x16e0   :  { %v2184_v23 = vpop.f32.mrb[60].mxu1 }
0x16e1   :  { %v3806_v54 = vpop.f32.mrb[61].mxu1 }
0x16e2   :  { %v2187_v34 = vpop.f32.mrb[62].mxu1 }
0x16e3   :  { %v2193_v36 = vpack.c.bf16 %v2187_v34, %v2184_v23  ;;  %v3807_v37 = vpop.f32.mrb[63].mxu1 }
0x16e5   :  { %3811 = vmatmul.mubr.msk.bf16.vlgmr.msra.gmra.mrb[72].mxu0 %vm340_vm2, %v2193_v36 }
0x16e6   :  { %3821 = vmatpush3.bf16.msra.mxu0 %v2294_v62  ;;  %3824 = vmatprep.mubr.msk.bf16.mxu0 %vm4050_vm0, %v4048_v0 }
0x16e7   :  { %3822 = vmatprep.subr.bf16.mxu0 %v4048_v0 }
0x16e8   :  { %v2282_v42 = vpop.f32.mrb[64].mxu1 }
0x16e9   :  { %v3818_v43 = vpop.f32.mrb[65].mxu1 }
0x16ea   :  { %v2285_v44 = vpop.f32.mrb[66].mxu1  ;;  %3823 = vmatpush3.bf16.msra.mxu0 %v2295_v53 }
0x16eb   :  { %v3819_v45 = vpop.f32.mrb[67].mxu1  ;;  %3836 = vmatprep.subr.bf16.mxu0 %v4048_v0 }
0x16ec   :  { %v3401_v45 = vld [vmem:[%s4593_s5 + $0x10] sm:$0xff] }
0x16ed   :  { %3825 = vmatmul.mubr.msk.bf16.vlgmr.msra.gmra.mrb[76].mxu0 %vm185_vm1, %v4469_v51 }
0x16ee   :  { %3840 = vmatprep.mubr.msk.bf16.mxu0 %vm4050_vm0, %v4048_v0  ;;  %3837 = vmatpush3.bf16.msra.mxu0 %v2405_v14  ;;  %v3412_v14 = vld [vmem:[%s4427_s27 + $0x70] sm:$0xff] }
0x16ef   :  { %3838 = vmatprep.subr.bf16.mxu0 %v4048_v0 }
0x16f0   :  { %v2394_v38 = vpop.f32.mrb[68].mxu1 }
0x16f1   :  { %v2395_v47 = vadd.f32 %v3390_v46, %v2394_v38  ;;  %v3834_v48 = vpop.f32.mrb[69].mxu1  ;;  %v2582_v46 = vpack.c.bf16 %v3401_v45, %v3401_v45 }
0x16f2   :  { %v2397_v49 = vpop.f32.mrb[70].mxu1  ;;  %3839 = vmatpush3.bf16.msra.mxu0 %v2406_v63  ;;  %v2694_v63 = vpack.c.bf16 %v3413_v15, %v3412_v14 }
0x16f3   :  { %v2456_v50 = vpack.c.bf16 %v2395_v47, %v2395_v47  ;;  %v3835_v52 = vpop.f32.mrb[71].mxu1  ;;  %3850 = vmatprep.subr.bf16.mxu0 %v4048_v0  ;;  %v2587_v38 = vsel %vm760_vm11, %v2582_v46, 0 }
0x16f4   :  { %v3404_v52 = vld [vmem:[%s4437_s7 + $0x68] sm:$0xff] }
0x16f5   :  { %v2461_v57 = vsel %vm340_vm2, %v2456_v50, 0  ;;  %3841 = vmatmul.mubr.msk.bf16.vlgmr.msra.gmra.mrb[80].mxu0 %vm185_vm1, %v4442_v25  ;;  %v3403_v50 = vld [vmem:[%s4437_s7 + $0x60] sm:$0xff] }
0x16f6   :  { %3845 = vmatpush3.bf16.xpose.msra.mxu1 %v2461_v57  ;;  %3852 = vmatprep.mubr.msk.bf16.mxu0 %vm4050_vm0, %v4048_v0 }
0x16f7   :  { %3856 = vmatprep.subr.bf16.mxu1 %v4048_v0 }
0x17b8   :  { %v2235_v58 = vpop.f32.mrb[72].mxu0 }
0x17b9   :  { %v4636_v59 = vadd.f32 %v2282_v42, %v2235_v58  ;;  %v3812_v60 = vpop.f32.mrb[73].mxu0 }
0x17ba   :  { %v2238_v61 = vpop.f32.mrb[74].mxu0 }
0x17bb   :  { %v4638_v55 = vadd.f32 %v2285_v44, %v2238_v61  ;;  %v3813_v56 = vpop.f32.mrb[75].mxu0  ;;  %v2637_v61 = vpack.c.bf16 %v3404_v52, %v3403_v50 }
0x17c0   :  { %v2338_v5 = vpop.f32.mrb[76].mxu0 }
0x17c1   :  { %v3826_v6 = vpop.f32.mrb[77].mxu0  ;;  %v2339_v8 = vadd.f32 %v3383_v4, %v2338_v5  ;;  %v3406_v5 = vld [vmem:[%s4437_s7 + $0x78] sm:$0xff] }
0x17c2   :  { %v2341_v7 = vpop.f32.mrb[78].mxu0 }
0x17c3   :  { %v2342_v9 = vadd.f32 %v3383_v4, %v2341_v7  ;;  %v3827_v27 = vpop.f32.mrb[79].mxu0  ;;  %v3405_v4 = vld [vmem:[%s4437_s7 + $0x70] sm:$0xff]  ;;  %v3410_v7 = vld [vmem:[%s4427_s27 + $0x60] sm:$0xff]  ;;  %s3252_s7 = sld [smem:[%s4816_s0 + %s4081_s4]]  }
0x17c4   :  { %v2638_v6 = vpack.c.bf16 %v3406_v5, %v3405_v4 }
0x17c5   :  { %v2455_v30 = vpack.c.bf16 %v2342_v9, %v2339_v8  ;;  %v3411_v8 = vld [vmem:[%s4427_s27 + $0x68] sm:$0xff]  ;;  %s4074_s27 = smov 23  }
0x17c6   :  { %v2693_v10 = vpack.c.bf16 %v3411_v8, %v3410_v7  ;;  %v3422_v8 = vld [vmem:[%s4538_s1 + $0x3] ss:$0 sm:$0xff]  ;;  %s3245_s10 = sld [smem:[%s4816_s0 + %s4074_s27]]  }
0x17c7   :  { %3847 = vmatmul.mubr.msk.bf16.vlgmr.msra.gmra.mrb[72].mxu1 %vm340_vm2, %v2455_v30 }
0x17c8   :  { %3858 = vmatprep.mubr.msk.bf16.mxu1 %vm4050_vm0, %v4048_v0  ;;  %v2449_v36 = vpop.f32.mrb[80].mxu0  ;;  %3857 = vmatpush3.bf16.msra.mxu1 %v2587_v38 }
0x17c9   :  { %v3842_v37 = vpop.f32.mrb[81].mxu0  ;;  %v2450_v42 = vadd.f32 %v3397_v41, %v2449_v36  ;;  %3870 = vmatprep.subr.bf16.mxu1 %v4048_v0  ;;  %v3418_v36 = vld [vmem:[%s4505_s26 + $0x68] sm:$0xff]  ;;  %v3420_v41 = vld [vmem:[%s4505_s26 + $0x78] sm:$0xff] }
0x17ca   :  { %v2452_v40 = vpop.f32.mrb[82].mxu0  ;;  %v3419_v37 = vld [vmem:[%s4505_s26 + $0x70] sm:$0xff] }
0x17cb   :  { %v3843_v53 = vpop.f32.mrb[83].mxu0  ;;  %v2531_v43 = vpack.c.bf16 %v2450_v42, %v2450_v42 }
0x17cc   :  { %v2749_v53 = vpack.c.bf16 %v3420_v41, %v3419_v37  ;;  %v3035_v41 = vld [vmem:[%s3248_s15 + $0x8] sm:$0xff] }
0x17cd   :  { %v2536_v44 = vsel %vm760_vm11, %v2531_v43, 0 }
0x17ce   :  { %3851 = vmatpush3.bf16.msra.mxu0 %v2536_v44 }
0x17cf   :  { %3862 = vmatprep.subr.bf16.mxu0 %v4048_v0 }
0x189a   :  { %v2497_v3 = vpop.f32.mrb[72].mxu1 }
0x189b   :  { %v2504_v16 = vmul.f32 0.35355338, %v2497_v3  ;;  %v3848_v17 = vpop.f32.mrb[73].mxu1 }
0x189c   :  { %v2500_v18 = vpop.f32.mrb[74].mxu1 }
0x189d   :  { %v2505_v19 = vmul.f32 0.35355338, %v2500_v18  ;;  %v3849_v21 = vpop.f32.mrb[75].mxu1  ;;  %v2506_v24 = vadd.f32 %v2504_v16, %v4162_v39 }
0x189f   :  { %v2508_v11 = vsel %vm340_vm2, %v2506_v24, -inf  ;;  %v2507_v26 = vadd.f32 %v2505_v19, %v4521_v35 }
0x18a0   :  { %2509 = vmax.xlane.f32.xlu1 %v2508_v11 }
0x18a1   :  { %v2511_v28 = vsel %vm340_vm2, %v2507_v26, -inf }
0x18a2   :  { %2512 = vmax.xlane.f32.xlu0 %v2511_v28 }
0x192d   :  { %v2510_v29 = vpop.xlane.xlu1 %2509 }
0x192e   :  { %v2514_v31 = vsub.f32 %v2506_v24, %v2510_v29 }
0x192f   :  { %v2513_v32 = vpop.xlane.xlu0 %2512 }
0x1930   :  { %v2516_v33 = vmul.f32 1.442695, %v2514_v31  ;;  %v2515_v20 = vsub.f32 %v2507_v26, %v2513_v32 }
0x1932   :  { %4021 = vpow2.f32 %v2516_v33  ;;  %v2518_v22 = vmul.f32 1.442695, %v2515_v20  ;;  %v3415_v33 = vld [vmem:[%s4478_s22 + $0x3] ss:$0 sm:$0xff] }
0x1934   :  { %4023 = vpow2.f32 %v2518_v22 }
0x193c   :  { %v4022_v23 = vpop.eup %4021 }
0x193d   :  { %v2520_v54 = vsel %vm340_vm2, %v4022_v23, 0.0 }
0x193e   :  { %v4024_v34 = vpop.eup %4023  ;;  %2521 = vadd.xlane.f32.xlu1 %v2520_v54 }
0x193f   :  { %v2523_v62 = vsel %vm340_vm2, %v4024_v34, 0.0 }
0x1940   :  { %2524 = vadd.xlane.f32.xlu0 %v2523_v62 }
0x19cb   :  { %v2522_v47 = vpop.xlane.xlu1 %2521 }
0x19cc   :  { %4025 = vrcp.f32 %v2522_v47 }
0x19cd   :  { %v2525_v48 = vpop.xlane.xlu0 %2524 }
0x19ce   :  { %4027 = vrcp.f32 %v2525_v48 }
0x19d6   :  { %v4026_v49 = vpop.eup %4025 }
0x19d7   :  { %v2528_v58 = vmul.f32 %v4026_v49, %v4022_v23 }
0x19d8   :  { %v4028_v57 = vpop.eup %4027 }
0x19d9   :  { %v2529_v60 = vmul.f32 %v4028_v57, %v4024_v34 }
0x19db   :  { %v2530_v56 = vpack.c.bf16 %v2529_v60, %v2528_v58 }
0x19dd   :  { %3853 = vmatmul.mubr.msk.bf16.vlgmr.msra.gmra.mrb[84].mxu0 %vm340_vm2, %v2530_v56 }
0x19de   :  { %3863 = vmatpush3.bf16.msra.mxu0 %v2637_v61  ;;  %3866 = vmatprep.mubr.msk.bf16.mxu0 %vm4050_vm0, %v4048_v0 }
0x19df   :  { %3864 = vmatprep.subr.bf16.mxu0 %v4048_v0 }
0x19e2   :  { %3865 = vmatpush3.bf16.msra.mxu0 %v2638_v6 }
0x19e3   :  { %3878 = vmatprep.subr.bf16.mxu0 %v4048_v0 }
0x19e5   :  { %3867 = vmatmul.mubr.msk.bf16.vlgmr.msra.gmra.mrb[88].mxu0 %vm185_vm1, %v4469_v51  ;;  %v3408_v51 = vld [vmem:[%s4486_s21 + $0x3] ss:$0 sm:$0xff] }
0x19e6   :  { %3882 = vmatprep.mubr.msk.bf16.mxu0 %vm4050_vm0, %v4048_v0 }
0x1ab0   :  { %v2572_v9 = vpop.f32.mrb[84].mxu0 }
0x1ab1   :  { %v3854_v27 = vpop.f32.mrb[85].mxu0 }
0x1ab2   :  { %v2575_v30 = vpop.f32.mrb[86].mxu0 }
0x1ab3   :  { %v2581_v12 = vpack.c.bf16 %v2575_v30, %v2572_v9  ;;  %v3855_v13 = vpop.f32.mrb[87].mxu0 }
0x1ab5   :  { %3859 = vmatmul.mubr.msk.bf16.vlgmr.msra.gmra.mrb[76].mxu1 %vm340_vm2, %v2581_v12  ;;  %v3426_v12 = vld [vmem:[%s4593_s5 + $0x18] sm:$0xff] }
0x1ab6   :  { %3871 = vmatpush3.bf16.msra.mxu1 %v2693_v10  ;;  %3874 = vmatprep.mubr.msk.bf16.mxu1 %vm4050_vm0, %v4048_v0  ;;  %v2925_v13 = vpack.c.bf16 %v3426_v12, %v3426_v12 }
0x1ab7   :  { %3872 = vmatprep.subr.bf16.mxu1 %v4048_v0 }
0x1ab8   :  { %v2681_v3 = vpop.f32.mrb[88].mxu0  ;;  %v2930_v14 = vsel %vm760_vm11, %v2925_v13, 0 }
0x1ab9   :  { %v3868_v16 = vpop.f32.mrb[89].mxu0  ;;  %v2682_v18 = vadd.f32 %v3408_v51, %v2681_v3 }
0x1aba   :  { %v2684_v17 = vpop.f32.mrb[90].mxu0  ;;  %3873 = vmatpush3.bf16.msra.mxu1 %v2694_v63 }
0x1abb   :  { %v2685_v19 = vadd.f32 %v3408_v51, %v2684_v17  ;;  %v3869_v21 = vpop.f32.mrb[91].mxu0  ;;  %3886 = vmatprep.subr.bf16.mxu1 %v4048_v0 }
0x1abd   :  { %v2798_v24 = vpack.c.bf16 %v2685_v19, %v2682_v18  ;;  %3875 = vmatmul.mubr.msk.bf16.vlgmr.msra.gmra.mrb[80].mxu1 %vm185_vm1, %v4442_v25 }
0x1abe   :  { %3888 = vmatprep.mubr.msk.bf16.mxu1 %vm4050_vm0, %v4048_v0 }
0x1b88   :  { %v2623_v11 = vpop.f32.mrb[76].mxu1 }
0x1b89   :  { %v4694_v26 = vadd.f32 %v2623_v11, %v4636_v59  ;;  %v3860_v28 = vpop.f32.mrb[77].mxu1 }
0x1b8a   :  { %v2626_v29 = vpop.f32.mrb[78].mxu1 }
0x1b8b   :  { %v4697_v31 = vadd.f32 %v2626_v29, %v4638_v55  ;;  %v3861_v32 = vpop.f32.mrb[79].mxu1  ;;  %v3417_v55 = vld [vmem:[%s4505_s26 + $0x60] sm:$0xff] }
0x1b8c   :  { %v2748_v40 = vpack.c.bf16 %v3418_v36, %v3417_v55  ;;  %v3428_v32 = vld [vmem:[%s3245_s10] ss:$0 sm:$0xff] }
0x1b8e   :  { %3879 = vmatpush3.bf16.msra.mxu0 %v2748_v40  ;;  %v3034_v40 = vld [vmem:[%s3248_s15] sm:$0xff] }
0x1b8f   :  { %3880 = vmatprep.subr.bf16.mxu0 %v4048_v0 }
0x1b90   :  { %v2737_v20 = vpop.f32.mrb[80].mxu1 }
0x1b91   :  { %v2738_v22 = vadd.f32 %v3415_v33, %v2737_v20  ;;  %v3876_v23 = vpop.f32.mrb[81].mxu1 }
0x1b92   :  { %v2740_v54 = vpop.f32.mrb[82].mxu1  ;;  %3881 = vmatpush3.bf16.msra.mxu0 %v2749_v53  ;;  %v3039_v53 = vpack.c.bf16 %v3035_v41, %v3034_v40 }
0x1b93   :  { %v2799_v34 = vpack.c.bf16 %v2738_v22, %v2738_v22  ;;  %v3877_v62 = vpop.f32.mrb[83].mxu1  ;;  %3892 = vmatprep.subr.bf16.mxu0 %v4048_v0 }
0x1b95   :  { %v2804_v59 = vsel %vm340_vm2, %v2799_v34, 0  ;;  %3883 = vmatmul.mubr.msk.bf16.vlgmr.msra.gmra.mrb[92].mxu0 %vm185_vm1, %v4442_v25 }
0x1b96   :  { %3887 = vmatpush3.bf16.xpose.msra.mxu1 %v2804_v59  ;;  %3894 = vmatprep.mubr.msk.bf16.mxu0 %vm4050_vm0, %v4048_v0 }
0x1b97   :  { %3898 = vmatprep.subr.bf16.mxu1 %v4048_v0 }
0x1b9d   :  { %3889 = vmatmul.mubr.msk.bf16.vlgmr.msra.gmra.mrb[84].mxu1 %vm340_vm2, %v2798_v24 }
0x1b9e   :  { %3900 = vmatprep.mubr.msk.bf16.mxu1 %vm4050_vm0, %v4048_v0  ;;  %3899 = vmatpush3.bf16.msra.mxu1 %v2930_v14 }
0x1b9f   :  { %3912 = vmatprep.subr.bf16.mxu1 %v4048_v0 }
0x1c68   :  { %v2792_v5 = vpop.f32.mrb[92].mxu0 }
0x1c69   :  { %v3884_v6 = vpop.f32.mrb[93].mxu0  ;;  %v2793_v27 = vadd.f32 %v3422_v8, %v2792_v5 }
0x1c6a   :  { %v2795_v7 = vpop.f32.mrb[94].mxu0 }
0x1c6b   :  { %v3885_v9 = vpop.f32.mrb[95].mxu0  ;;  %v2874_v30 = vpack.c.bf16 %v2793_v27, %v2793_v27 }
0x1c6d   :  { %v2879_v10 = vsel %vm760_vm11, %v2874_v30, 0 }
0x1c6e   :  { %3893 = vmatpush3.bf16.msra.mxu0 %v2879_v10 }
0x1c6f   :  { %3904 = vmatprep.subr.bf16.mxu0 %v4048_v0 }
0x1c70   :  { %v2840_v42 = vpop.f32.mrb[84].mxu1 }
0x1c71   :  { %v2847_v43 = vmul.f32 0.35355338, %v2840_v42  ;;  %v3890_v44 = vpop.f32.mrb[85].mxu1  ;;  %v3036_v42 = vld [vmem:[%s3248_s15 + $0x10] sm:$0xff] }
0x1c72   :  { %v2843_v45 = vpop.f32.mrb[86].mxu1 }
0x1c73   :  { %v2848_v46 = vmul.f32 0.35355338, %v2843_v45  ;;  %v3891_v38 = vpop.f32.mrb[87].mxu1  ;;  %v2849_v47 = vadd.f32 %v2847_v43, %v4162_v39  ;;  %v3037_v43 = vld [vmem:[%s3248_s15 + $0x18] sm:$0xff]  ;;  %v3094_v45 = vld [vmem:[%s4761_s19] sm:$0xff] }
0x1c74   :  { %v3040_v44 = vpack.c.bf16 %v3037_v43, %v3036_v42  ;;  %v3096_v38 = vld [vmem:[%s4761_s19 + $0x10] sm:$0xff] }
0x1c75   :  { %v2851_v48 = vsel %vm340_vm2, %v2849_v47, -inf  ;;  %v2850_v49 = vadd.f32 %v2848_v46, %v4521_v35  ;;  %v3095_v46 = vld [vmem:[%s4761_s19 + $0x8] sm:$0xff] }
0x1c76   :  { %2852 = vmax.xlane.f32.xlu1 %v2851_v48  ;;  %v3097_v48 = vld [vmem:[%s4761_s19 + $0x18] sm:$0xff] }
0x1c77   :  { %v2854_v50 = vsel %vm340_vm2, %v2850_v49, -inf }
0x1c78   :  { %2855 = vmax.xlane.f32.xlu0 %v2854_v50  ;;  %v3098_v50 = vld [vmem:[%s4761_s19 + $0x20] sm:$0xff] }
0x1d03   :  { %v2853_v25 = vpop.xlane.xlu1 %2852 }
0x1d04   :  { %v2857_v52 = vsub.f32 %v2849_v47, %v2853_v25  ;;  %v3111_v47 = vpack.c.bf16 %v3095_v46, %v3094_v45  ;;  %v3099_v25 = vld [vmem:[%s4761_s19 + $0x28] sm:$0xff] }
0x1d05   :  { %v2856_v57 = vpop.xlane.xlu0 %2855 }
0x1d06   :  { %v2859_v58 = vmul.f32 1.442695, %v2857_v52  ;;  %v2858_v60 = vsub.f32 %v2850_v49, %v2856_v57  ;;  %v3112_v49 = vpack.c.bf16 %v3097_v48, %v3096_v38  ;;  %v3113_v52 = vpack.c.bf16 %v3099_v25, %v3098_v50  ;;  %v3100_v57 = vld [vmem:[%s4761_s19 + $0x30] sm:$0xff] }
0x1d08   :  { %4029 = vpow2.f32 %v2859_v58  ;;  %v2861_v61 = vmul.f32 1.442695, %v2858_v60  ;;  %v3101_v58 = vld [vmem:[%s4761_s19 + $0x38] sm:$0xff] }
0x1d09   :  { %v3114_v60 = vpack.c.bf16 %v3101_v58, %v3100_v57 }
0x1d0a   :  { %4031 = vpow2.f32 %v2861_v61  ;;  %v3102_v61 = vld [vmem:[%s4761_s19 + $0x40] sm:$0xff] }
0x1d12   :  { %v4030_v56 = vpop.eup %4029 }
0x1d13   :  { %v2863_v39 = vsel %vm340_vm2, %v4030_v56, 0.0 }
0x1d14   :  { %v4032_v4 = vpop.eup %4031  ;;  %2864 = vadd.xlane.f32.xlu1 %v2863_v39 }
0x1d15   :  { %v2866_v35 = vsel %vm340_vm2, %v4032_v4, 0.0 }
0x1d16   :  { %2867 = vadd.xlane.f32.xlu0 %v2866_v35  ;;  %v3105_v35 = vld [vmem:[%s4761_s19 + $0x58] sm:$0xff] }
0x1da1   :  { %v2865_v15 = vpop.xlane.xlu1 %2864 }
0x1da2   :  { %4033 = vrcp.f32 %v2865_v15 }
0x1da3   :  { %v2868_v63 = vpop.xlane.xlu0 %2867 }
0x1da4   :  { %4035 = vrcp.f32 %v2868_v63 }
0x1dac   :  { %v4034_v51 = vpop.eup %4033 }
0x1dad   :  { %v2871_v16 = vmul.f32 %v4034_v51, %v4030_v56  ;;  %v3103_v56 = vld [vmem:[%s4761_s19 + $0x48] sm:$0xff] }
0x1dae   :  { %v4036_v3 = vpop.eup %4035  ;;  %v3115_v39 = vpack.c.bf16 %v3103_v56, %v3102_v61 }
0x1daf   :  { %v2872_v17 = vmul.f32 %v4036_v3, %v4032_v4  ;;  %v3104_v4 = vld [vmem:[%s4761_s19 + $0x50] sm:$0xff] }
0x1db0   :  { %v3116_v5 = vpack.c.bf16 %v3105_v35, %v3104_v4 }
0x1db1   :  { %v2873_v18 = vpack.c.bf16 %v2872_v17, %v2871_v16 }
0x1db3   :  { %3895 = vmatmul.mubr.msk.bf16.vlgmr.msra.gmra.mrb[96].mxu0 %vm340_vm2, %v2873_v18  ;;  %v3429_v18 = vld [vmem:[%s3246_s6] ss:$0 sm:$0xff] }
0x1db4   :  { %3908 = vmatprep.mubr.msk.bf16.mxu0 %vm4050_vm0, %v4048_v0  ;;  %3905 = vmatpush3.bf16.msra.mxu0 %v3039_v53 }
0x1db5   :  { %3906 = vmatprep.subr.bf16.mxu0 %v4048_v0 }
0x1db8   :  { %3907 = vmatpush3.bf16.msra.mxu0 %v3040_v44 }
0x1e86   :  { %v2915_v19 = vpop.f32.mrb[96].mxu0 }
0x1e87   :  { %v3896_v21 = vpop.f32.mrb[97].mxu0 }
0x1e88   :  { %v2918_v24 = vpop.f32.mrb[98].mxu0 }
0x1e89   :  { %v2924_v11 = vpack.c.bf16 %v2918_v24, %v2915_v19  ;;  %v3897_v28 = vpop.f32.mrb[99].mxu0 }
0x1e8b   :  { %3901 = vmatmul.mubr.msk.bf16.vlgmr.msra.gmra.mrb[88].mxu1 %vm340_vm2, %v2924_v11 }
0x1e8c   :  { %3928 = vmatprep.mubr.msk.bf16.mxu1 %vm4050_vm0, %v4048_v0  ;;  %3913 = vmatpush3.bf16.msra.mxu1 %v3111_v47 }
0x1e8d   :  { %3914 = vmatprep.subr.bf16.mxu1 %v4048_v0 }
0x1e90   :  { %3915 = vmatpush3.bf16.msra.mxu1 %v3112_v49 }
0x1e91   :  { %3916 = vmatprep.subr.bf16.mxu1 %v4048_v0 }
0x1e94   :  { %3917 = vmatpush3.bf16.msra.mxu1 %v3113_v52 }
0x1e95   :  { %3918 = vmatprep.subr.bf16.mxu1 %v4048_v0 }
0x1e98   :  { %3919 = vmatpush3.bf16.msra.mxu1 %v3114_v60 }
0x1e99   :  { %3920 = vmatprep.subr.bf16.mxu1 %v4048_v0 }
0x1e9c   :  { %3921 = vmatpush3.bf16.msra.mxu1 %v3115_v39 }
0x1e9d   :  { %3922 = vmatprep.subr.bf16.mxu1 %v4048_v0 }
0x1ea0   :  { %3923 = vmatpush3.bf16.msra.mxu1 %v3116_v5 }
0x1ea1   :  { %3924 = vmatprep.subr.bf16.mxu1 %v4048_v0 }
0x1f5e   :  { %v2966_v29 = vpop.f32.mrb[88].mxu1 }
0x1f5f   :  { %v2973_v33 = vadd.f32 %v2966_v29, %v4694_v26  ;;  %v3902_v20 = vpop.f32.mrb[89].mxu1  ;;  %v3430_v29 = vld [vmem:[%s3247_s9] ss:$0 sm:$0xff] }
0x1f60   :  { %v2969_v22 = vpop.f32.mrb[90].mxu1 }
0x1f61   :  { %v2982_v23 = vadd.f32 %v3428_v32, %v2973_v33  ;;  %v2974_v54 = vadd.f32 %v2969_v22, %v4697_v31  ;;  %v3903_v34 = vpop.f32.mrb[91].mxu1 }
0x1f63   :  { %v4739_v62 = vadd.f32 %v2982_v23, %v4463_v1  ;;  %v2983_v59 = vadd.f32 %v3428_v32, %v2974_v54  ;;  %v3106_v23 = vld [vmem:[%s4761_s19 + $0x60] sm:$0xff]  ;;  %v3107_v54 = vld [vmem:[%s4761_s19 + $0x68] sm:$0xff] }
0x1f64   :  { %v3117_v34 = vpack.c.bf16 %v3107_v54, %v3106_v23 }
0x1f65   :  { %v4742_v55 = vadd.f32 %v2983_v59, %v4465_v2  ;;  %v2988_v36 = vsel %vm185_vm1, %v4739_v62, 0.0  ;;  %v2994_v37 = vmul.f32 %v4739_v62, %v4739_v62  ;;  %v3109_v59 = vld [vmem:[%s4761_s19 + $0x78] sm:$0xff] }
0x1f66   :  { %2989 = vadd.xlane.f32.xlu1 %v2988_v36  ;;  %3925 = vmatpush3.bf16.msra.mxu1 %v3117_v34  ;;  %v3431_v36 = vld [vmem:[%s3249_s28] ss:$0 sm:$0xff] }
0x1f67   :  { %v2991_v26 = vsel %vm185_vm1, %v4742_v55, 0.0  ;;  %v2995_v31 = vmul.f32 %v4742_v55, %v4742_v55  ;;  %v2996_v1 = vsel %vm185_vm1, %v2994_v37, 0.0  ;;  %3926 = vmatprep.subr.bf16.mxu1 %v4048_v0  ;;  %v3433_v0 = vld [vmem:[%s3251_s3] ss:$0 sm:$0xff] }
0x1f68   :  { %2992 = vadd.xlane.f32.xlu0 %v2991_v26 }
0x1f69   :  { %v2999_v2 = vsel %vm185_vm1, %v2995_v31, 0.0 }
0x1f6a   :  { %2997 = vadd.xlane.f32.xlu1 %v2996_v1 }
0x1f6c   :  { %3000 = vadd.xlane.f32.xlu0 %v2999_v2 }
0x1ff3   :  { %v2990_v6 = vpop.xlane.xlu1 %2989 }
0x1ff4   :  { %v3002_v7 = vmul.f32 0.03125, %v2990_v6 }
0x1ff5   :  { %v2993_v8 = vpop.xlane.xlu0 %2992 }
0x1ff6   :  { %v3003_v9 = vmul.f32 0.03125, %v2993_v8  ;;  %v3006_v30 = vmul.f32 %v3002_v7, %v3002_v7  ;;  %v3010_v16 = vsub.f32 %v4739_v62, %v3002_v7  ;;  %v3108_v62 = vld [vmem:[%s4761_s19 + $0x70] sm:$0xff] }
0x1ff7   :  { %v2998_v27 = vpop.xlane.xlu1 %2997 }
0x1ff8   :  { %v3004_v10 = vmul.f32 0.03125, %v2998_v27  ;;  %v3007_v13 = vmul.f32 %v3003_v9, %v3003_v9  ;;  %v3011_v19 = vsub.f32 %v4742_v55, %v3003_v9  ;;  %v3118_v55 = vpack.c.bf16 %v3109_v59, %v3108_v62 }
0x1ff9   :  { %v3001_v12 = vpop.xlane.xlu0 %3000 }
0x1ffa   :  { %v3008_v14 = vsub.f32 %v3004_v10, %v3006_v30  ;;  %v3005_v15 = vmul.f32 0.03125, %v3001_v12  ;;  %3927 = vmatpush3.bf16.msra.mxu1 %v3118_v55 }
0x1ffc   :  { %v3012_v63 = vadd.f32 1e-05, %v3008_v14  ;;  %v3009_v51 = vsub.f32 %v3005_v15, %v3007_v13  ;;  %v3434_v15 = vld [vmem:[%s3252_s7] ss:$0 sm:$0xff] }
0x1ffe   :  { %4037 = vrsqrt.f32 %v3012_v63  ;;  %v3013_v3 = vadd.f32 1e-05, %v3009_v51 }
0x2000   :  { %4039 = vrsqrt.f32 %v3013_v3 }
0x2008   :  { %v4038_v17 = vpop.eup %4037 }
0x2009   :  { %v3016_v21 = vmul.f32 %v4038_v17, %v3010_v16  ;;  %v3435_v16 = vld [vmem:[%s3253_s12] ss:$0 sm:$0xff] }
0x200a   :  { %v4040_v24 = vpop.eup %4039 }
0x200b   :  { %v3017_v11 = vmul.f32 %v4040_v24, %v3011_v19  ;;  %v3024_v28 = vmul.f32 %v3429_v18, %v3016_v21 }
0x200d   :  { %v3025_v32 = vmul.f32 %v3429_v18, %v3017_v11  ;;  %v3032_v33 = vadd.f32 %v3430_v29, %v3024_v28 }
0x200f   :  { %v3033_v20 = vadd.f32 %v3430_v29, %v3025_v32 }
0x2011   :  { %v3038_v22 = vpack.c.bf16 %v3033_v20, %v3032_v33 }
0x2013   :  { %3909 = vmatmul.mubr.msk.bf16.vlgmr.msra.gmra.mrb[100].mxu0 %vm185_vm1, %v3038_v22 }
0x20e6   :  { %v3085_v37 = vpop.f32.mrb[100].mxu0 }
0x20e7   :  { %v3086_v26 = vadd.f32 %v3431_v36, %v3085_v37  ;;  %v3910_v31 = vpop.f32.mrb[101].mxu0 }
0x20e8   :  { %v3088_v1 = vpop.f32.mrb[102].mxu0 }
0x20e9   :  { %v3089_v2 = vadd.f32 %v3431_v36, %v3088_v1  ;;  %v3911_v40 = vpop.f32.mrb[103].mxu0  ;;  %v3092_v41 = vmax.f32 %v3086_v26, 0.0 }
0x20eb   :  { %v3093_v53 = vmax.f32 %v3089_v2, 0.0 }
0x20ed   :  { %v3110_v42 = vpack.c.bf16 %v3093_v53, %v3092_v41 }
0x20ef   :  { %3929 = vmatmul.mubr.bf16.vlgmr.msra.gmra.mrb[92].mxu1 %v3110_v42 }
0x21c2   :  { %v3160_v43 = vpop.f32.mrb[92].mxu1 }
0x21c3   :  { %v3161_v44 = vadd.f32 %v3433_v0, %v3160_v43  ;;  %v3930_v45 = vpop.f32.mrb[93].mxu1 }
0x21c4   :  { %v3163_v46 = vpop.f32.mrb[94].mxu1 }
0x21c5   :  { %v3167_v38 = vadd.f32 %v3161_v44, %v3032_v33  ;;  %v3164_v47 = vadd.f32 %v3433_v0, %v3163_v46  ;;  %v3931_v48 = vpop.f32.mrb[95].mxu1 }
0x21c7   :  { %v3168_v49 = vadd.f32 %v3164_v47, %v3033_v20  ;;  %v3171_v50 = vsel %vm185_vm1, %v3167_v38, 0.0  ;;  %v3177_v25 = vmul.f32 %v3167_v38, %v3167_v38 }
0x21c8   :  { %3172 = vadd.xlane.f32.xlu1 %v3171_v50 }
0x21c9   :  { %v3174_v52 = vsel %vm185_vm1, %v3168_v49, 0.0  ;;  %v3178_v57 = vmul.f32 %v3168_v49, %v3168_v49  ;;  %v3179_v58 = vsel %vm185_vm1, %v3177_v25, 0.0 }
0x21ca   :  { %3175 = vadd.xlane.f32.xlu0 %v3174_v52 }
0x21cb   :  { %v3182_v60 = vsel %vm185_vm1, %v3178_v57, 0.0 }
0x21cc   :  { %3180 = vadd.xlane.f32.xlu1 %v3179_v58 }
0x21ce   :  { %3183 = vadd.xlane.f32.xlu0 %v3182_v60 }
0x2255   :  { %v3173_v61 = vpop.xlane.xlu1 %3172 }
0x2256   :  { %v3185_v56 = vmul.f32 0.03125, %v3173_v61 }
0x2257   :  { %v3176_v39 = vpop.xlane.xlu0 %3175 }
0x2258   :  { %v3186_v4 = vmul.f32 0.03125, %v3176_v39  ;;  %v3189_v5 = vmul.f32 %v3185_v56, %v3185_v56  ;;  %v3193_v13 = vsub.f32 %v3167_v38, %v3185_v56 }
0x2259   :  { %v3181_v35 = vpop.xlane.xlu1 %3180 }
0x225a   :  { %v3187_v6 = vmul.f32 0.03125, %v3181_v35  ;;  %v3190_v8 = vmul.f32 %v3186_v4, %v3186_v4  ;;  %v3194_v63 = vsub.f32 %v3168_v49, %v3186_v4 }
0x225b   :  { %v3184_v7 = vpop.xlane.xlu0 %3183 }
0x225c   :  { %v3191_v9 = vsub.f32 %v3187_v6, %v3189_v5  ;;  %v3188_v27 = vmul.f32 0.03125, %v3184_v7 }
0x225e   :  { %v3195_v30 = vadd.f32 1e-05, %v3191_v9  ;;  %v3192_v10 = vsub.f32 %v3188_v27, %v3190_v8 }
0x2260   :  { %4041 = vrsqrt.f32 %v3195_v30  ;;  %v3196_v12 = vadd.f32 1e-05, %v3192_v10 }
0x2262   :  { %4043 = vrsqrt.f32 %v3196_v12 }
0x226a   :  { %v4042_v14 = vpop.eup %4041 }
0x226b   :  { %v3199_v51 = vmul.f32 %v4042_v14, %v3193_v13 }
0x226c   :  { %v4044_v3 = vpop.eup %4043 }
0x226d   :  { %v3207_v17 = vmul.f32 %v3434_v15, %v3199_v51  ;;  %v3200_v18 = vmul.f32 %v4044_v3, %v3194_v63 }
0x226f   :  { %v3215_v19 = vadd.f32 %v3435_v16, %v3207_v17  ;;  %v3208_v21 = vmul.f32 %v3434_v15, %v3200_v18 }
0x2271   :  { %3217 = vst.msk [vmem:[%s3254_s17] sm:$0xff] %vm185_vm1, %v3215_v19  ;;  %v3216_v24 = vadd.f32 %v3435_v16, %v3208_v21 }
0x2273   :  { %3218 = vst.msk [vmem:[%s3254_s17 + $0x8] sm:$0xff] %vm185_vm1, %v3216_v24 }

</bundles_post_ra>
